<compile_context>
chip_gen: v7x
topology: tpu7x:2x2x1
jax: 0.10.0
libtpu: 0.0.40
codegen_flags: <defaults>
</compile_context>

<pallas_src>
import jax
import jax.numpy as jnp
from jax.experimental import pallas as pl
from jax.experimental.pallas import tpu as pltpu

CLASS_LIST = [5, 3, 3, 3, 2, 3, 2, 3]   # [label, pn, str, pig, rs, dag, bwv, vs]
TOTAL_OUT = sum(CLASS_LIST)             # 24
IN_DIM, HID1, HID2 = 2048, 512, 128
BN_EPS = 1e-5


def _swish(x):
    return x * jax.nn.sigmoid(x)


def _fusion_kernel(x_ref, w1_ref, s1_ref, b1_ref, w2_ref, s2_ref, b2_ref,
                   wh_ref, bh_ref, out_ref):
    """One grid step = `nb` branches (nb=3 on single-TC chips, nb=1 otherwise).

    BN is pre-folded into (w, b); w1/w2 arrive as int8 with per-output-column
    f32 dequant scales, wh as bf16.  MXU inputs are bf16, accumulation and all
    elementwise math are f32.
    """
    nb = x_ref.shape[0]
    for b in range(nb):                                   # static unroll (1 or 3)
        x = x_ref[b]                                      # (B, 2048) bf16
        w1 = w1_ref[b].astype(jnp.bfloat16)               # int8 -> bf16 (exact)
        h = jnp.dot(x, w1, preferred_element_type=jnp.float32)
        h = h * s1_ref[b] + b1_ref[b]                     # dequant + folded BN/bias
        h = _swish(h)                                     # Swish_Module
        # TODO(synk): Dropout(p=0.3) layers are identity in eval mode; this
        # kernel has no training path.
        w2 = w2_ref[b].astype(jnp.bfloat16)               # int8 -> bf16 (exact)
        h = jnp.dot(h.astype(jnp.bfloat16), w2,
                    preferred_element_type=jnp.float32)
        h = h * s2_ref[b] + b2_ref[b]
        h = _swish(h)
        # all 8 classification heads concatenated -> single (B, 24) matmul
        out_ref[b] = (jnp.dot(h.astype(jnp.bfloat16), wh_ref[b],
                              preferred_element_type=jnp.float32)
                      + bh_ref[b])


def _branches_per_step():
    """3 branches per grid step on single-TC chips (v5e/v6e); 1 elsewhere."""
    try:
        kind = jax.devices()[0].device_kind.lower()
    except Exception:
        return 3
    single_tc = any(t in kind for t in
                    ("v5e", "v5 lite", "v5lite", "v6e", "v6 lite", "v6lite"))
    return 3 if single_tc else 1


def fusionnet_client_last_forward(x_clic, x_derm, x_fusion, kparams,
                                  branches_per_step=None):
    """Eval-mode forward.  Returns [(derm logits x8), (clic x8), (fusion x8)]."""
    B = x_clic.shape[0]
    nb = _branches_per_step() if branches_per_step is None else branches_per_step
    assert 3 % nb == 0

    # kernel branch order: [clic, derm, fusion]; cast activations to bf16 once
    x = jnp.stack([x_clic, x_derm, x_fusion], axis=0).astype(jnp.bfloat16)

    def spec(arr):
        nd = arr.ndim
        return pl.BlockSpec((nb,) + arr.shape[1:],
                            lambda i, _nd=nd: (i,) + (0,) * (_nd - 1))

    args = (x,
            kparams["w1"], kparams["s1"], kparams["b1"],
            kparams["w2"], kparams["s2"], kparams["b2"],
            kparams["wh"], kparams["bh"])

    out = pl.pallas_call(
        _fusion_kernel,
        out_shape=jax.ShapeDtypeStruct((3, B, TOTAL_OUT), jnp.float32),
        grid_spec=pltpu.PrefetchScalarGridSpec(
            num_scalar_prefetch=0,
            grid=(3 // nb,),
            in_specs=[spec(a) for a in args],
            out_specs=pl.BlockSpec((nb, B, TOTAL_OUT), lambda i: (i, 0, 0)),
        ),
        compiler_params=pltpu.CompilerParams(
            # branches are independent; on multi-TC chips grid=(3,) gets
            # sharded across cores (accepted 2:1 imbalance).  Single grid step
            # on v5e/v6e, so this is a no-op there.
            dimension_semantics=("parallel",)),
    )(*args)

    # split concatenated heads back into the 8 per-attribute logits
    def split_heads(branch_out):
        logits, off = [], 0
        for n in CLASS_LIST:
            logits.append(branch_out[:, off:off + n])
            off += n
        return tuple(logits)

    clic_logits = split_heads(out[0])
    derm_logits = split_heads(out[1])
    fusion_logits = split_heads(out[2])
    # PyTorch return order: [derm, clic, fusion]
    return [derm_logits, clic_logits, fusion_logits]


# ----------------------------- parameter setup -------------------------------
def init_params(key):
    """Deterministic synthetic parameters (raw f32, BN stats separate)."""
    ks = iter(jax.random.split(key, 32))

    def lin_w(k, fan_in, shape):
        bound = 1.0 / (fan_in ** 0.5)
        return jax.random.uniform(k, shape, jnp.float32, -bound, bound)

    def bn_fold(kg, kb, km, kv, n):
        gamma = jax.random.uniform(kg, (3, 1, n), jnp.float32, 0.5, 1.5)
        beta = 0.1 * jax.random.normal(kb, (3, 1, n), jnp.float32)
        rmean = 0.1 * jax.random.normal(km, (3, 1, n), jnp.float32)
        rvar = jax.random.uniform(kv, (3, 1, n), jnp.float32, 0.5, 1.5)
        scale = gamma * jax.lax.rsqrt(rvar + BN_EPS)
        shift = beta - rmean * scale
        return scale, shift

    p = {}
    p["w1"] = lin_w(next(ks), IN_DIM, (3, IN_DIM, HID1))
    p["b1"] = lin_w(next(ks), IN_DIM, (3, 1, HID1))
    p["s1"], p["t1"] = bn_fold(next(ks), next(ks), next(ks), next(ks), HID1)
    p["w2"] = lin_w(next(ks), HID1, (3, HID1, HID2))
    p["b2"] = lin_w(next(ks), HID1, (3, 1, HID2))
    p["s2"], p["t2"] = bn_fold(next(ks), next(ks), next(ks), next(ks), HID2)
    p["wh"] = lin_w(next(ks), HID2, (3, HID2, TOTAL_OUT))
    p["bh"] = lin_w(next(ks), HID2, (3, 1, TOTAL_OUT))
    return p


def _quantize_int8_per_col(w):
    """Symmetric per-output-column int8 quantization of (3, K, N) weights."""
    absmax = jnp.max(jnp.abs(w), axis=1, keepdims=True)          # (3, 1, N)
    scale = jnp.maximum(absmax, 1e-12) / 127.0
    wq = jnp.clip(jnp.round(w / scale), -127.0, 127.0).astype(jnp.int8)
    return wq, scale.astype(jnp.float32)


def prepare_kernel_params(params):
    """Fold eval-mode BN into the Linears, int8-quantize w1/w2, bf16 wh."""
    w1f = params["w1"] * params["s1"]                    # column-wise BN scale
    b1f = params["b1"] * params["s1"] + params["t1"]
    w2f = params["w2"] * params["s2"]
    b2f = params["b2"] * params["s2"] + params["t2"]
    w1q, q1 = _quantize_int8_per_col(w1f)
    w2q, q2 = _quantize_int8_per_col(w2f)
    return {
        "w1": w1q, "s1": q1, "b1": b1f,
        "w2": w2q, "s2": q2, "b2": b2f,
        "wh": params["wh"].astype(jnp.bfloat16), "bh": params["bh"],
    }


# ----------------------------- pure-JAX reference ----------------------------
def reference_forward(x_clic, x_derm, x_fusion, params):
    """f32, un-folded BN, un-quantized — ground truth for the fused kernel."""
    xs = [x_clic, x_derm, x_fusion]
    outs = []
    for b in range(3):
        h = xs[b] @ params["w1"][b] + params["b1"][b]
        h = h * params["s1"][b] + params["t1"][b]
        h = _swish(h)
        h = h @ params["w2"][b] + params["b2"][b]
        h = h * params["s2"][b] + params["t2"][b]
        h = _swish(h)
        outs.append(h @ params["wh"][b] + params["bh"][b])
    return outs  # [clic, derm, fusion], concatenated heads


if __name__ == "__main__":
    key = jax.random.PRNGKey(0)
    kx, kp = jax.random.split(key)
    B = 8   # multiple of 8 (sublane) for clean (B, *) tiles
    kc, kd, kf = jax.random.split(kx, 3)
    x_clic = jax.random.normal(kc, (B, IN_DIM), jnp.float32)
    x_derm = jax.random.normal(kd, (B, IN_DIM), jnp.float32)
    x_fusion = jax.random.normal(kf, (B, IN_DIM), jnp.float32)

    params = init_params(kp)
    kparams = prepare_kernel_params(params)

    result = fusionnet_client_last_forward(x_clic, x_derm, x_fusion, kparams)
    result = jax.block_until_ready(result)

    # verify against pure-JAX f32 reference (bf16 acts + int8 weights => loose tol)
    ref_clic, ref_derm, ref_fusion = reference_forward(
        x_clic, x_derm, x_fusion, params)
    derm_logits, clic_logits, fusion_logits = result
    got_derm = jnp.concatenate(derm_logits, axis=-1)
    got_clic = jnp.concatenate(clic_logits, axis=-1)
    got_fusion = jnp.concatenate(fusion_logits, axis=-1)
    for got, ref in ((got_derm, ref_derm), (got_clic, ref_clic),
                     (got_fusion, ref_fusion)):
        assert got.shape == (B, TOTAL_OUT)
        assert jnp.allclose(got, ref, rtol=3e-2, atol=3e-2), (
            float(jnp.max(jnp.abs(got - ref))))

    print("KERNEL_OK")
</pallas_src>

<mosaic_0001>
module attributes {stable_mosaic.version = 11 : i64} {
  func.func @_fusion_kernel(%arg0: i32, %arg1: memref<1x8x2048xbf16, #tpu.memory_space<vmem>>, %arg2: memref<1x2048x512xi8, #tpu.memory_space<vmem>>, %arg3: memref<1x1x512xf32, #tpu.memory_space<vmem>>, %arg4: memref<1x1x512xf32, #tpu.memory_space<vmem>>, %arg5: memref<1x512x128xi8, #tpu.memory_space<vmem>>, %arg6: memref<1x1x128xf32, #tpu.memory_space<vmem>>, %arg7: memref<1x1x128xf32, #tpu.memory_space<vmem>>, %arg8: memref<1x128x24xbf16, #tpu.memory_space<vmem>>, %arg9: memref<1x1x24xf32, #tpu.memory_space<vmem>>, %arg10: memref<1x8x24xf32, #tpu.memory_space<vmem>>) attributes {dimension_semantics = [#tpu.dimension_semantics<parallel>], iteration_bounds = array<i64: 3>, scalar_prefetch = 0 : i64, scratch_operands = 0 : i64, tpu.core_type = #tpu.core_type<tc>, window_params = [{transform_indices = @transform_0, window_bounds = array<i64: 1, 8, 2048>}, {transform_indices = @transform_1, window_bounds = array<i64: 1, 2048, 512>}, {transform_indices = @transform_2, window_bounds = array<i64: 1, 1, 512>}, {transform_indices = @transform_3, window_bounds = array<i64: 1, 1, 512>}, {transform_indices = @transform_4, window_bounds = array<i64: 1, 512, 128>}, {transform_indices = @transform_5, window_bounds = array<i64: 1, 1, 128>}, {transform_indices = @transform_6, window_bounds = array<i64: 1, 1, 128>}, {transform_indices = @transform_7, window_bounds = array<i64: 1, 128, 24>}, {transform_indices = @transform_8, window_bounds = array<i64: 1, 1, 24>}, {transform_indices = @transform_9, window_bounds = array<i64: 1, 8, 24>}]} {
    %c0 = arith.constant 0 : index
    %c0_0 = arith.constant 0 : index
    %c0_1 = arith.constant 0 : index
    %0 = vector.load %arg1[%c0, %c0_0, %c0_1] : memref<1x8x2048xbf16, #tpu.memory_space<vmem>>, vector<1x8x2048xbf16>
    %1 = vector.shape_cast %0 : vector<1x8x2048xbf16> to vector<8x2048xbf16>
    %c0_2 = arith.constant 0 : index
    %c0_3 = arith.constant 0 : index
    %c0_4 = arith.constant 0 : index
    %2 = vector.load %arg2[%c0_2, %c0_3, %c0_4] : memref<1x2048x512xi8, #tpu.memory_space<vmem>>, vector<1x2048x512xi8>
    %3 = vector.shape_cast %2 : vector<1x2048x512xi8> to vector<2048x512xi8>
    %4 = arith.sitofp %3 : vector<2048x512xi8> to vector<2048x512xbf16>
    %cst = arith.constant dense<0.000000e+00> : vector<8x512xf32>
    %5 = tpu.matmul %1, %4, %cst {dimension_numbers = #tpu.dot_dimension_numbers<[1], [0], [0], [1], [0, 0, 1, 1], [], []>} : vector<8x2048xbf16>, vector<2048x512xbf16>, vector<8x512xf32> -> vector<8x512xf32>
    %c0_5 = arith.constant 0 : index
    %c0_6 = arith.constant 0 : index
    %c0_7 = arith.constant 0 : index
    %6 = vector.load %arg3[%c0_5, %c0_6, %c0_7] : memref<1x1x512xf32, #tpu.memory_space<vmem>>, vector<1x1x512xf32>
    %7 = vector.shape_cast %6 : vector<1x1x512xf32> to vector<1x512xf32>
    %8 = vector.broadcast %7 : vector<1x512xf32> to vector<8x512xf32>
    %9 = arith.mulf %5, %8 : vector<8x512xf32>
    %c0_8 = arith.constant 0 : index
    %c0_9 = arith.constant 0 : index
    %c0_10 = arith.constant 0 : index
    %10 = vector.load %arg4[%c0_8, %c0_9, %c0_10] : memref<1x1x512xf32, #tpu.memory_space<vmem>>, vector<1x1x512xf32>
    %11 = vector.shape_cast %10 : vector<1x1x512xf32> to vector<1x512xf32>
    %12 = vector.broadcast %11 : vector<1x512xf32> to vector<8x512xf32>
    %13 = arith.addf %9, %12 : vector<8x512xf32>
    %14 = arith.negf %13 : vector<8x512xf32>
    %15 = math.exp %14 : vector<8x512xf32>
    %cst_11 = arith.constant 1.000000e+00 : f32
    %16 = vector.broadcast %cst_11 : f32 to vector<8x512xf32>
    %17 = arith.addf %16, %15 : vector<8x512xf32>
    %18 = arith.divf %16, %17 : vector<8x512xf32>
    %19 = arith.mulf %13, %18 : vector<8x512xf32>
    %c0_12 = arith.constant 0 : index
    %c0_13 = arith.constant 0 : index
    %c0_14 = arith.constant 0 : index
    %20 = vector.load %arg5[%c0_12, %c0_13, %c0_14] : memref<1x512x128xi8, #tpu.memory_space<vmem>>, vector<1x512x128xi8>
    %21 = vector.shape_cast %20 : vector<1x512x128xi8> to vector<512x128xi8>
    %22 = arith.sitofp %21 : vector<512x128xi8> to vector<512x128xbf16>
    %23 = arith.truncf %19 : vector<8x512xf32> to vector<8x512xbf16>
    %cst_15 = arith.constant dense<0.000000e+00> : vector<8x128xf32>
    %24 = tpu.matmul %23, %22, %cst_15 {dimension_numbers = #tpu.dot_dimension_numbers<[1], [0], [0], [1], [0, 0, 1, 1], [], []>} : vector<8x512xbf16>, vector<512x128xbf16>, vector<8x128xf32> -> vector<8x128xf32>
    %c0_16 = arith.constant 0 : index
    %c0_17 = arith.constant 0 : index
    %c0_18 = arith.constant 0 : index
    %25 = vector.load %arg6[%c0_16, %c0_17, %c0_18] : memref<1x1x128xf32, #tpu.memory_space<vmem>>, vector<1x1x128xf32>
    %26 = vector.shape_cast %25 : vector<1x1x128xf32> to vector<1x128xf32>
    %27 = vector.broadcast %26 : vector<1x128xf32> to vector<8x128xf32>
    %28 = arith.mulf %24, %27 : vector<8x128xf32>
    %c0_19 = arith.constant 0 : index
    %c0_20 = arith.constant 0 : index
    %c0_21 = arith.constant 0 : index
    %29 = vector.load %arg7[%c0_19, %c0_20, %c0_21] : memref<1x1x128xf32, #tpu.memory_space<vmem>>, vector<1x1x128xf32>
    %30 = vector.shape_cast %29 : vector<1x1x128xf32> to vector<1x128xf32>
    %31 = vector.broadcast %30 : vector<1x128xf32> to vector<8x128xf32>
    %32 = arith.addf %28, %31 : vector<8x128xf32>
    %33 = arith.negf %32 : vector<8x128xf32>
    %34 = math.exp %33 : vector<8x128xf32>
    %cst_22 = arith.constant 1.000000e+00 : f32
    %35 = vector.broadcast %cst_22 : f32 to vector<8x128xf32>
    %36 = arith.addf %35, %34 : vector<8x128xf32>
    %37 = arith.divf %35, %36 : vector<8x128xf32>
    %38 = arith.mulf %32, %37 : vector<8x128xf32>
    %39 = arith.truncf %38 : vector<8x128xf32> to vector<8x128xbf16>
    %c0_23 = arith.constant 0 : index
    %c0_24 = arith.constant 0 : index
    %c0_25 = arith.constant 0 : index
    %40 = vector.load %arg8[%c0_23, %c0_24, %c0_25] : memref<1x128x24xbf16, #tpu.memory_space<vmem>>, vector<1x128x24xbf16>
    %41 = vector.shape_cast %40 : vector<1x128x24xbf16> to vector<128x24xbf16>
    %cst_26 = arith.constant dense<0.000000e+00> : vector<8x24xf32>
    %42 = tpu.matmul %39, %41, %cst_26 {dimension_numbers = #tpu.dot_dimension_numbers<[1], [0], [0], [1], [0, 0, 1, 1], [], []>} : vector<8x128xbf16>, vector<128x24xbf16>, vector<8x24xf32> -> vector<8x24xf32>
    %c0_27 = arith.constant 0 : index
    %c0_28 = arith.constant 0 : index
    %c0_29 = arith.constant 0 : index
    %43 = vector.load %arg9[%c0_27, %c0_28, %c0_29] : memref<1x1x24xf32, #tpu.memory_space<vmem>>, vector<1x1x24xf32>
    %44 = vector.shape_cast %43 : vector<1x1x24xf32> to vector<1x24xf32>
    %45 = vector.broadcast %44 : vector<1x24xf32> to vector<8x24xf32>
    %46 = arith.addf %42, %45 : vector<8x24xf32>
    %c0_30 = arith.constant 0 : index
    %c0_31 = arith.constant 0 : index
    %c0_32 = arith.constant 0 : index
    %47 = vector.load %arg10[%c0_30, %c0_31, %c0_32] : memref<1x8x24xf32, #tpu.memory_space<vmem>>, vector<1x8x24xf32>
    %48 = vector.shape_cast %47 : vector<1x8x24xf32> to vector<8x24xf32>
    %49 = vector.shape_cast %46 : vector<8x24xf32> to vector<1x8x24xf32>
    tpu.vector_store %arg10[%c0_30, %c0_31, %c0_32], %49 {strides = array<i32>} : memref<1x8x24xf32, #tpu.memory_space<vmem>>, vector<1x8x24xf32>,
    return
  }
  func.func @transform_0(%arg0: i32) -> (i32, i32, i32) {
    %c0_i32 = arith.constant 0 : i32
    %c0_i32_0 = arith.constant 0 : i32
    %c0_i32_1 = arith.constant 0 : i32
    return %arg0, %c0_i32, %c0_i32_0 : i32, i32, i32
  }
  func.func @transform_1(%arg0: i32) -> (i32, i32, i32) {
    %c0_i32 = arith.constant 0 : i32
    %c0_i32_0 = arith.constant 0 : i32
    %c0_i32_1 = arith.constant 0 : i32
    return %arg0, %c0_i32, %c0_i32_0 : i32, i32, i32
  }
  func.func @transform_2(%arg0: i32) -> (i32, i32, i32) {
    %c0_i32 = arith.constant 0 : i32
    %c0_i32_0 = arith.constant 0 : i32
    %c0_i32_1 = arith.constant 0 : i32
    return %arg0, %c0_i32, %c0_i32_0 : i32, i32, i32
  }
  func.func @transform_3(%arg0: i32) -> (i32, i32, i32) {
    %c0_i32 = arith.constant 0 : i32
    %c0_i32_0 = arith.constant 0 : i32
    %c0_i32_1 = arith.constant 0 : i32
    return %arg0, %c0_i32, %c0_i32_0 : i32, i32, i32
  }
  func.func @transform_4(%arg0: i32) -> (i32, i32, i32) {
    %c0_i32 = arith.constant 0 : i32
    %c0_i32_0 = arith.constant 0 : i32
    %c0_i32_1 = arith.constant 0 : i32
    return %arg0, %c0_i32, %c0_i32_0 : i32, i32, i32
  }
  func.func @transform_5(%arg0: i32) -> (i32, i32, i32) {
    %c0_i32 = arith.constant 0 : i32
    %c0_i32_0 = arith.constant 0 : i32
    %c0_i32_1 = arith.constant 0 : i32
    return %arg0, %c0_i32, %c0_i32_0 : i32, i32, i32
  }
  func.func @transform_6(%arg0: i32) -> (i32, i32, i32) {
    %c0_i32 = arith.constant 0 : i32
    %c0_i32_0 = arith.constant 0 : i32
    %c0_i32_1 = arith.constant 0 : i32
    return %arg0, %c0_i32, %c0_i32_0 : i32, i32, i32
  }
  func.func @transform_7(%arg0: i32) -> (i32, i32, i32) {
    %c0_i32 = arith.constant 0 : i32
    %c0_i32_0 = arith.constant 0 : i32
    %c0_i32_1 = arith.constant 0 : i32
    return %arg0, %c0_i32, %c0_i32_0 : i32, i32, i32
  }
  func.func @transform_8(%arg0: i32) -> (i32, i32, i32) {
    %c0_i32 = arith.constant 0 : i32
    %c0_i32_0 = arith.constant 0 : i32
    %c0_i32_1 = arith.constant 0 : i32
    return %arg0, %c0_i32, %c0_i32_0 : i32, i32, i32
  }
  func.func @transform_9(%arg0: i32) -> (i32, i32, i32) {
    %c0_i32 = arith.constant 0 : i32
    %c0_i32_0 = arith.constant 0 : i32
    %c0_i32_1 = arith.constant 0 : i32
    return %arg0, %c0_i32, %c0_i32_0 : i32, i32, i32
  }
}

</mosaic_0001>

<bundles_post_ra>
// kernel: tpu_custom_call.1
= control target key start
LH: loop header
LB: loop body
LE: loop exit
PB: predicated region body
PF: predicated region fallthrough
CT: control target
= control target key end

     0   :  { %s4165_s0 = inlined_call_operand.hbm [shape: bf16[3,8,2048], index: 0, kind: input, shape index: {}]   ;;  %s4166_s1 = inlined_call_operand.hbm [shape: s8[3,2048,512], index: 1, kind: input, shape index: {}]   ;;  %s4167_s2 = inlined_call_operand.hbm [shape: f32[3,1,512], index: 2, kind: input, shape index: {}]   ;;  %s4168_s3 = inlined_call_operand.hbm [shape: f32[3,1,512], index: 3, kind: input, shape index: {}]   ;;  %s4169_s4 = inlined_call_operand.hbm [shape: s8[3,512,128], index: 4, kind: input, shape index: {}]   ;;  %s4170_s5 = inlined_call_operand.hbm [shape: f32[3,1,128], index: 5, kind: input, shape index: {}]   ;;  %s4171_s6 = inlined_call_operand.hbm [shape: f32[3,1,128], index: 6, kind: input, shape index: {}]   ;;  %s4172_s7 = inlined_call_operand.vmem [shape: bf16[3,128,24], index: 7, kind: input, shape index: {}]   ;;  %s4173_s8 = inlined_call_operand.hbm [shape: f32[3,1,24], index: 8, kind: input, shape index: {}]   ;;  %s4174_s9 = inlined_call_operand.hbm [shape: f32[3,8,24], index: 9, kind: output, shape index: {}]  }
   0x1   :  { %4188 = sst [smem:[#allocation28_spill]] %s4166_s1 }
   0x2   :  { %4189 = sst [smem:[#allocation29_spill]] %s4168_s3 }
   0x3   :  { %4190 = sst [smem:[#allocation30_spill]] %s4170_s5 }
   0x4   :  { %4191 = sst [smem:[#allocation31_spill]] %s4174_s9 }
   0x5   :  { %14 = vsyncpa [#allocation3], 0 }
   0x6   :  { %16 = vsyncpa [#allocation3 + $0x1], 0 }
   0x7   :  { %17 = vsyncpa [#allocation6], 0 }
   0x8   :  { %19 = vsyncpa [#allocation6 + $0x1], 0 }
   0x9   :  { %20 = vsyncpa [#allocation9], 0 }
   0xa   :  { %22 = vsyncpa [#allocation9 + $0x1], 0 }
   0xb   :  { %23 = vsyncpa [#allocation12], 0 }
   0xc   :  { %25 = vsyncpa [#allocation12 + $0x1], 0 }
   0xd   :  { %26 = vsyncpa [#allocation15], 0 }
   0xe   :  { %28 = vsyncpa [#allocation15 + $0x1], 0 }
   0xf   :  { %29 = vsyncpa [#allocation4], 0 }
  0x10   :  { %31 = vsyncpa [#allocation4 + $0x1], 0  ;;  %s3416_s30 = smov 0   ;;  %s3418_s10 = smov 0  }
  0x11   :  { %s3420_s11 = smov 0   ;;  %s3422_s12 = smov 0  }
  0x12 LB: > { %4192 = sst [smem:[#allocation23_spill]] %s3337_s30  ;;  %s3437_s13 = sadd.s32 4294967295, %s3349_s12   ;;  %s3349_s12 = sphi %s3422_s12, %s4224_s12   ;;  %s3345_s11 = sphi %s3420_s11, %s4226_s11   ;;  %s3341_s10 = sphi %s3418_s10, %s4228_s10   ;;  %s3337_s30 = sphi %s3416_s30, %s4227_s30  }
  0x13   : > { %4193 = sst [smem:[#allocation24_spill]] %s3345_s11  ;;  %s2695_s14 = sadd.s32 4294967294, %s3349_s12  }
  0x14   : > { %s3441_s15 = sadd.s32 1, %s3349_s12   ;;  %s44_s16 = sadd.s32 1, %s3345_s11 }
  0x15   : > { %4194 = sst [smem:[#allocation25_spill]] %s3441_s15  ;;  %s41_s17 = ssub.s32 %s3349_s12, %s3441_s15 }
  0x16   : > { %p51_p0 = scmp.ne.s32.totalorder %s3345_s11, %s3341_s10  ;;  %p42_p1 = scmp.eq.s32.totalorder %s41_s17, 0 }
  0x17   : > { %p52_p2 = scmp.eq.s32.totalorder %s3349_s12, 0  ;;  %p57_p3 = scmp.ne.s32.totalorder %s3341_s10, %s3337_s30 }
  0x18   : > { %p58_p4 = scmp.eq.s32.totalorder %s3437_s13, 0  ;;  %p289_p7 = scmp.eq.s32.totalorder %s3437_s13, 2 }
  0x19   : > { %s3453_s18 = scalar_select %p42_p1, %s3345_s11, %s44_s16  }
  0x1a   : > { %p53_p5 = por %p52_p2, %p51_p0  ;;  %p3455_p6 = por %p58_p4, %p57_p3 }
  0x1b   : > { %4195 = sst [smem:[#allocation26_spill]] %s3453_s18  ;;  %p295_p8 = scmp.eq.s32.totalorder %s2695_s14, 2 }
  0x1c   : > { %s4196_s19 = scalar_select %p3455_p6, 1, 0 }
  0x1d   : > { %p2943_p9 = scmp.lt.s32.totalorder %s3349_s12, 3  ;;  %p3461_p10 = por %p289_p7, %p51_p0 }
  0x1e   : > { %p3465_p11 = por %p295_p8, %p57_p3  ;;  %s3470_s22 = sand.u32 1, %s3345_s11  }
  0x1f   : > { %s4197_s20 = scalar_select %p3461_p10, 1, 0 }
  0x20   : > { %s4198_s21 = scalar_select %p3465_p11, 1, 0 }
  0x21   : > { %p3472_p12 = pnand %p2943_p9, %p53_p5  ;;  %s3477_s24 = sand.u32 1, %s3349_s12  }
  0x22   : > { %4199 = sst [smem:[#allocation27_spill]] %s4198_s21  ;;  %s2701_s25 = sshll.u32 %s3470_s22, 11 }
  0x23   : > { %s4200_s23 = scalar_select %p3472_p12, 1, 0 }
  0x24   : > { %s2762_s26 = sshll.u32 %s3349_s12, 15  ;;  %s4201_s1 = sld [smem:[#allocation28_spill]] }
  0x25   : > { %s338_s14 = scalar_lea.vmem [#allocation5], %s2701_s25  ;;  %p3494_p1 = pneg %p3472_p12 }
  0x26   : > { %s345_s16 = sshll.u32 %s338_s14, 4  ;;  %s3486_s16 = int_to_ptr.vmem [resolvable:$true] %s345_s16 }
  0x2a   : > { %s3484_s29 = scalar_lea.hbm %s4201_s1, %s2762_s26  ;;  %s3032_s25 = scalar_lea.hbm %s4201_s1, 98304 }
  0x2b   : > { %s3027_s18 = scalar_lea.hbm %s3484_s29, 32768  ;;  %p3033_p4 = scmp.lt.u32.totalorder %s3484_s29, %s4201_s1 }
  0x2c   : > { %p3028_p0 = scmp.ne.s32.totalorder %s3484_s29, %s3027_s18  ;;  %p3034_p5 = scmp.lt.u32.totalorder %s3032_s25, %s3027_s18 }
  0x2d   : > { %p3036_p8 = scmp.lt.u32.totalorder %s3027_s18, %s3484_s29 }
  0x2e   : > { %p3030_p2 = pnand %p3494_p1, %p3028_p0  ;;  %p3035_p7 = por %p3034_p5, %p3033_p4 }
  0x30   : > { %p3031_p3 = pneg %p3030_p2  ;;  %p3037_p9 = por %p3036_p8, %p3035_p7 }
  0x32   : > { %p3038_p13 = pnand %p3037_p9, %p3031_p3 }
  0x34   : > { %3041 = shalt.err (!%p3038_p13)
}
  0x35   : > { %s3042_s17 = scalar_lea.vmem %s3486_s16, 32768  ;;  %s3351_s26 = smov [#allocation5]  }
  0x36   : > { %p3043_p0 = scmp.ne.s32.totalorder %s3486_s16, %s3042_s17  ;;  %s3047_s27 = sshll.u32 %s3351_s26, 4  ;;  %s3048_s27 = int_to_ptr.vmem [resolvable:$false] %s3047_s27 }
  0x37   : > { %s3049_s28 = scalar_lea.vmem %s3048_s27, 65536  ;;  %p3050_p10 = scmp.lt.s32.totalorder %s3486_s16, %s3048_s27 }
  0x38   : > { %p3045_p2 = pnand %p3043_p0, %p3494_p1  ;;  %p3051_p6 = scmp.lt.s32.totalorder %s3049_s28, %s3042_s17 }
  0x3a   : > { %p3046_p11 = pneg %p3045_p2  ;;  %p3052_p4 = por %p3051_p6, %p3050_p10 }
  0x3c   : > { %p3053_p5 = pnand %p3052_p4, %p3046_p11 }
  0x3e   : > { %3056 = shalt.err (!%p3053_p5)
}
  0x3f   : > { %s3352_s18 = smov 512   ;;  %s3353_s25 = smov 32  }
  0x40   : > { %s4203_s14 = scalar_lea.sflag [#allocation6], %s3477_s24  ;;  %p471_p13 = scmp.lt.s32.totalorder %s3349_s12, 4 }
  0x41   : > { %2920 = dma.hbm_to_vmem [thread:$0]  (!%p3472_p12), %s3484_s29, 32768, %s3486_s16, %s4203_s14, %s3352_s18, %s3352_s18, %s3353_s25  }
  0x42   : > { %s4183_s17 = sshll.u32 %s3470_s22, 2  ;;  %s2763_s26 = sshll.u32 %s3349_s12, 6 }
  0x43   : > { %p4204_p6 = scmp.ge.s32.totalorder %s3349_s12, 1  ;;  %s3531_s15 = scalar_lea.hbm %s4167_s2, %s2763_s26 }
  0x44   : > { %s4206_s3 = sld [smem:[#allocation29_spill]]  ;;  %s378_s29 = scalar_lea.vmem [#allocation8], %s4183_s17 }
  0x45   : > { %p3524_p10 = pnand %p4204_p6, %p471_p13  ;;  %s386_s16 = sshll.u32 %s378_s29, 4  ;;  %s387_s16 = int_to_ptr.vmem [resolvable:$true] %s386_s16 }
  0x46   : > { %s4186_s18 = scalar_lea.sflag [#allocation9], %s3477_s24 }
  0x47   : > { %s4205_s27 = scalar_select %p3524_p10, 1, 0 }
  0x4a   : > { %s3536_s9 = scalar_lea.hbm %s4206_s3, %s2763_s26  ;;  %s3062_s30 = scalar_lea.hbm %s4206_s3, 192 }
  0x4b   : > { %s3057_s25 = scalar_lea.hbm %s3536_s9, 64  ;;  %p3063_p8 = scmp.lt.u32.totalorder %s3536_s9, %s4206_s3 }
  0x4c   : > { %p3058_p11 = scmp.ne.s32.totalorder %s3536_s9, %s3057_s25  ;;  %p3064_p9 = scmp.lt.u32.totalorder %s3062_s30, %s3057_s25 }
  0x4d   : > { %p3066_p2 = scmp.lt.u32.totalorder %s3057_s25, %s3536_s9 }
  0x4e   : > { %p3060_p3 = pnand %p3058_p11, %p3494_p1  ;;  %p3065_p0 = por %p3064_p9, %p3063_p8 }
  0x50   : > { %p3061_p7 = pneg %p3060_p3  ;;  %p3067_p4 = por %p3066_p2, %p3065_p0 }
  0x52   : > { %p3068_p5 = pnand %p3067_p4, %p3061_p7 }
  0x54   : > { %3071 = shalt.err (!%p3068_p5)
}
  0x55   : > { %s3072_s28 = scalar_lea.vmem %s387_s16, 64  ;;  %s3354_s29 = smov [#allocation8]  }
  0x56   : > { %p3073_p13 = scmp.ne.s32.totalorder %s387_s16, %s3072_s28  ;;  %s3077_s17 = sshll.u32 %s3354_s29, 4  ;;  %s3078_s17 = int_to_ptr.vmem [resolvable:$false] %s3077_s17 }
  0x57   : > { %s3079_s1 = scalar_lea.vmem %s3078_s17, 128  ;;  %p3080_p3 = scmp.lt.s32.totalorder %s387_s16, %s3078_s17 }
  0x58   : > { %p3075_p6 = pnand %p3073_p13, %p3494_p1  ;;  %p3081_p10 = scmp.lt.s32.totalorder %s3079_s1, %s3072_s28 }
  0x5a   : > { %p3076_p11 = pneg %p3075_p6  ;;  %p3082_p12 = por %p3081_p10, %p3080_p3 }
  0x5c   : > { %p3083_p8 = pnand %p3082_p12, %p3076_p11 }
  0x5e   : > { %3086 = shalt.err (!%p3083_p8)
}
  0x5f   : > { %p4207_p9 = scmp.ne.s32.totalorder %s4200_s23, 0  ;;  %s3561_s25 = sshll.u32 %s3349_s12, 4 }
  0x60   : > { %s4208_s5 = sld [smem:[#allocation30_spill]]  ;;  %s417_s21 = scalar_lea.vmem [#allocation11], %s3470_s22 }
  0x61   : > { %2926 = dma.hbm_to_vmem [thread:$0]  (!%p4207_p9), %s3536_s9, 64, %s387_s16, %s4186_s18  }
  0x62   : > { %s424_s26 = sshll.u32 %s417_s21, 4  ;;  %s425_s26 = int_to_ptr.vmem [resolvable:$true] %s424_s26 }
  0x66   : > { %s3567_s17 = scalar_lea.hbm %s4208_s5, %s3561_s25  ;;  %s3092_s1 = scalar_lea.hbm %s4208_s5, 48 }
  0x67   : > { %s3087_s29 = scalar_lea.hbm %s3567_s17, 16  ;;  %p3093_p0 = scmp.lt.u32.totalorder %s3567_s17, %s4208_s5 }
  0x68   : > { %p3088_p12 = scmp.ne.s32.totalorder %s3567_s17, %s3087_s29  ;;  %p3094_p2 = scmp.lt.u32.totalorder %s3092_s1, %s3087_s29 }
  0x69   : > { %p3096_p5 = scmp.lt.u32.totalorder %s3087_s29, %s3567_s17 }
  0x6a   : > { %p3090_p10 = pnand %p3088_p12, %p3494_p1  ;;  %p3095_p4 = por %p3094_p2, %p3093_p0 }
  0x6c   : > { %p3091_p7 = pneg %p3090_p10  ;;  %p3097_p13 = por %p3096_p5, %p3095_p4 }
  0x6e   : > { %p3098_p6 = pnand %p3097_p13, %p3091_p7 }
  0x70   : > { %3101 = shalt.err (!%p3098_p6)
}
  0x71   : > { %s3102_s21 = scalar_lea.vmem %s425_s26, 16  ;;  %s3355_s18 = smov [#allocation11]  }
  0x72   : > { %p3103_p11 = scmp.ne.s32.totalorder %s425_s26, %s3102_s21  ;;  %s3107_s28 = sshll.u32 %s3355_s18, 4  ;;  %s3108_s28 = int_to_ptr.vmem [resolvable:$false] %s3107_s28 }
  0x73   : > { %s3109_s9 = scalar_lea.vmem %s3108_s28, 32  ;;  %p3110_p12 = scmp.lt.s32.totalorder %s425_s26, %s3108_s28 }
  0x74   : > { %p3105_p3 = pnand %p3103_p11, %p3494_p1  ;;  %p3111_p10 = scmp.lt.s32.totalorder %s3109_s9, %s3102_s21 }
  0x76   : > { %p3106_p8 = pneg %p3105_p3  ;;  %p3112_p9 = por %p3111_p10, %p3110_p12 }
  0x78   : > { %p3113_p0 = pnand %p3112_p9, %p3106_p8 }
  0x7a   : > { %3116 = shalt.err (!%p3113_p0)
}
  0x7b   : > { %p4209_p2 = scmp.ne.s32.totalorder %s4200_s23, 0  ;;  %s4210_s29 = scalar_lea.sflag [#allocation12], %s3477_s24 }
  0x7c   : > { %s2698_s16 = sshll.u32 %s3470_s22, 6  ;;  %s2761_s18 = sshll.u32 %s3349_s12, 10 }
  0x7d   : > { %2932 = dma.hbm_to_vmem [thread:$0]  (!%p4209_p2), %s3567_s17, 16, %s425_s26, %s4210_s29  }
  0x7e   : > { %s3595_s28 = scalar_lea.hbm %s4165_s0, %s2761_s18  ;;  %s319_s30 = scalar_lea.vmem [#allocation2], %s2698_s16 }
  0x7f   : > { %s327_s21 = sshll.u32 %s319_s30, 4  ;;  %s4211_s9 = sshll.u32 %s3470_s22, 2  ;;  %s3599_s21 = int_to_ptr.vmem [resolvable:$true] %s327_s21 }
  0x80   : > { %s359_s3 = scalar_lea.vmem [#allocation7], %s4211_s9  ;;  %s316_s17 = scalar_lea.sflag [#allocation3], %s3470_s22 }
  0x81   : > { %s367_s5 = sshll.u32 %s359_s3, 4  ;;  %s3117_s26 = scalar_lea.hbm %s3595_s28, 1024  ;;  %s3601_s5 = int_to_ptr.vmem [resolvable:$true] %s367_s5 }
  0x82   : > { %p3118_p9 = scmp.ne.s32.totalorder %s3595_s28, %s3117_s26  ;;  %s3122_s1 = scalar_lea.hbm %s4165_s0, 3072 }
  0x83   : > { %p3123_p5 = scmp.lt.u32.totalorder %s3595_s28, %s4165_s0  ;;  %p3124_p13 = scmp.lt.u32.totalorder %s3122_s1, %s3117_s26 }
  0x84   : > { %p3120_p7 = pnand %p3118_p9, %p3494_p1  ;;  %p3126_p11 = scmp.lt.u32.totalorder %s3117_s26, %s3595_s28 }
  0x85   : > { %p3125_p6 = por %p3124_p13, %p3123_p5 }
  0x86   : > { %p3121_p4 = pneg %p3120_p7 }
  0x87   : > { %p3127_p3 = por %p3126_p11, %p3125_p6 }
  0x89   : > { %p3128_p8 = pnand %p3127_p3, %p3121_p4 }
  0x8b   : > { %3131 = shalt.err (!%p3128_p8)
}
  0x8c   : > { %s3132_s3 = scalar_lea.vmem %s3599_s21, 1024  ;;  %s3356_s30 = smov [#allocation2]  }
  0x8d   : > { %p3133_p12 = scmp.ne.s32.totalorder %s3599_s21, %s3132_s3  ;;  %s3137_s9 = sshll.u32 %s3356_s30, 4  ;;  %s3138_s9 = int_to_ptr.vmem [resolvable:$false] %s3137_s9 }
  0x8e   : > { %s3139_s29 = scalar_lea.vmem %s3138_s9, 2048  ;;  %p3140_p9 = scmp.lt.s32.totalorder %s3599_s21, %s3138_s9 }
  0x8f   : > { %p3135_p10 = pnand %p3133_p12, %p3494_p1  ;;  %p3141_p7 = scmp.lt.s32.totalorder %s3139_s29, %s3132_s3 }
  0x91   : > { %p3136_p0 = pneg %p3135_p10  ;;  %p3142_p5 = por %p3141_p7, %p3140_p9 }
  0x93   : > { %p3143_p13 = pnand %p3142_p5, %p3136_p0 }
  0x95   : > { %3146 = shalt.err (!%p3143_p13)
}
  0x96   : > { %2917 = dma.hbm_to_vmem [thread:$0]  (!%p4209_p2), %s3595_s28, 1024, %s3599_s21, %s316_s17  }
  0x97   : > { %s3147_s26 = scalar_lea.hbm %s3531_s15, 64  ;;  %s3152_s14 = scalar_lea.hbm %s4167_s2, 192 }
  0x98   : > { %p3148_p4 = scmp.ne.s32.totalorder %s3531_s15, %s3147_s26  ;;  %p3153_p3 = scmp.lt.u32.totalorder %s3531_s15, %s4167_s2 }
  0x99   : > { %p3154_p8 = scmp.lt.u32.totalorder %s3152_s14, %s3147_s26  ;;  %p3156_p10 = scmp.lt.u32.totalorder %s3147_s26, %s3531_s15 }
  0x9a   : > { %p3150_p6 = pnand %p3148_p4, %p3494_p1 }
  0x9b   : > { %p3155_p12 = por %p3154_p8, %p3153_p3 }
  0x9c   : > { %p3151_p11 = pneg %p3150_p6 }
  0x9d   : > { %p3157_p0 = por %p3156_p10, %p3155_p12 }
  0x9f   : > { %p3158_p9 = pnand %p3157_p0, %p3151_p11 }
  0xa1   : > { %3161 = shalt.err (!%p3158_p9)
}
  0xa2   : > { %s3162_s28 = scalar_lea.vmem %s3601_s5, 64  ;;  %s3357_s21 = smov [#allocation7]  }
  0xa3   : > { %p3163_p7 = scmp.ne.s32.totalorder %s3601_s5, %s3162_s28  ;;  %s3167_s17 = sshll.u32 %s3357_s21, 4  ;;  %s3168_s17 = int_to_ptr.vmem [resolvable:$false] %s3167_s17 }
  0xa4   : > { %s3169_s30 = scalar_lea.vmem %s3168_s17, 128  ;;  %p3170_p4 = scmp.lt.s32.totalorder %s3601_s5, %s3168_s17 }
  0xa5   : > { %p3165_p5 = pnand %p3163_p7, %p3494_p1  ;;  %p3171_p6 = scmp.lt.s32.totalorder %s3169_s30, %s3162_s28 }
  0xa7   : > { %p3166_p13 = pneg %p3165_p5  ;;  %p3172_p3 = por %p3171_p6, %p3170_p4 }
  0xa9   : > { %p3173_p8 = pnand %p3172_p3, %p3166_p13 }
  0xab   : > { %3176 = shalt.err (!%p3173_p8)
}
  0xac   : > { %s4212_s9 = scalar_lea.sflag [#allocation6], %s3477_s24  ;;  %s2710_s29 = sshll.u32 %s3470_s22, 7 }
  0xad   : > { %2923 = dma.hbm_to_vmem [thread:$0]  (!%p4209_p2), %s3531_s15, 64, %s3601_s5, %s4212_s9  }
  0xae   : > { %s2765_s26 = sshll.u32 %s3349_s12, 11  ;;  %s397_s16 = scalar_lea.vmem [#allocation10], %s2710_s29 }
  0xaf   : > { %s3653_s14 = scalar_lea.hbm %s4169_s4, %s2765_s26  ;;  %s404_s3 = sshll.u32 %s397_s16, 4  ;;  %s3655_s3 = int_to_ptr.vmem [resolvable:$true] %s404_s3 }
  0xb0   : > { %s3177_s28 = scalar_lea.hbm %s3653_s14, 2048  ;;  %s3182_s21 = scalar_lea.hbm %s4169_s4, 6144 }
  0xb1   : > { %p3178_p11 = scmp.ne.s32.totalorder %s3653_s14, %s3177_s28  ;;  %p3183_p0 = scmp.lt.u32.totalorder %s3653_s14, %s4169_s4 }
  0xb2   : > { %p3184_p9 = scmp.lt.u32.totalorder %s3182_s21, %s3177_s28  ;;  %p3186_p5 = scmp.lt.u32.totalorder %s3177_s28, %s3653_s14 }
  0xb3   : > { %p3180_p12 = pnand %p3178_p11, %p3494_p1 }
  0xb4   : > { %p3185_p7 = por %p3184_p9, %p3183_p0 }
  0xb5   : > { %p3181_p10 = pneg %p3180_p12 }
  0xb6   : > { %p3187_p13 = por %p3186_p5, %p3185_p7 }
  0xb8   : > { %p3188_p4 = pnand %p3187_p13, %p3181_p10 }
  0xba   : > { %3191 = shalt.err (!%p3188_p4)
}
  0xbb   : > { %s3192_s9 = scalar_lea.vmem %s3655_s3, 2048  ;;  %s3358_s29 = smov [#allocation10]  }
  0xbc   : > { %p3193_p6 = scmp.ne.s32.totalorder %s3655_s3, %s3192_s9  ;;  %s3197_s26 = sshll.u32 %s3358_s29, 4  ;;  %s3198_s26 = int_to_ptr.vmem [resolvable:$false] %s3197_s26 }
  0xbd   : > { %s3199_s18 = scalar_lea.vmem %s3198_s26, 4096  ;;  %p3200_p11 = scmp.lt.s32.totalorder %s3655_s3, %s3198_s26 }
  0xbe   : > { %p3195_p3 = pnand %p3193_p6, %p3494_p1  ;;  %p3201_p12 = scmp.lt.s32.totalorder %s3199_s18, %s3192_s9 }
  0xc0   : > { %p3196_p8 = pneg %p3195_p3  ;;  %p3202_p0 = por %p3201_p12, %p3200_p11 }
  0xc2   : > { %p3203_p9 = pnand %p3202_p0, %p3196_p8 }
  0xc4   : > { %3206 = shalt.err (!%p3203_p9)
}
  0xc5   : > { %s3359_s1 = smov 128   ;;  %s3360_s16 = smov 8  }
  0xc6   : > { %s4213_s28 = scalar_lea.sflag [#allocation9], %s3477_s24  ;;  %s3684_s21 = scalar_lea.hbm %s4171_s6, %s3561_s25 }
  0xc7   : > { %2929 = dma.hbm_to_vmem [thread:$0]  (!%p4209_p2), %s3653_s14, 2048, %s3655_s3, %s4213_s28, %s3359_s1, %s3359_s1, %s3360_s16  }
  0xc8   : > { %s434_s17 = scalar_lea.vmem [#allocation13], %s3470_s22  ;;  %s3207_s9 = scalar_lea.hbm %s3684_s21, 16 }
  0xc9   : > { %s441_s30 = sshll.u32 %s434_s17, 4  ;;  %p3208_p10 = scmp.ne.s32.totalorder %s3684_s21, %s3207_s9  ;;  %s442_s30 = int_to_ptr.vmem [resolvable:$true] %s441_s30 }
  0xca   : > { %s3212_s14 = scalar_lea.hbm %s4171_s6, 48  ;;  %p3213_p13 = scmp.lt.u32.totalorder %s3684_s21, %s4171_s6 }
  0xcb   : > { %p3210_p7 = pnand %p3208_p10, %p3494_p1  ;;  %p3214_p4 = scmp.lt.u32.totalorder %s3212_s14, %s3207_s9 }
  0xcc   : > { %p3216_p3 = scmp.lt.u32.totalorder %s3207_s9, %s3684_s21 }
  0xcd   : > { %p3211_p5 = pneg %p3210_p7  ;;  %p3215_p6 = por %p3214_p4, %p3213_p13 }
  0xcf   : > { %p3217_p8 = por %p3216_p3, %p3215_p6 }
  0xd1   : > { %p3218_p11 = pnand %p3217_p8, %p3211_p5 }
  0xd3   : > { %3221 = shalt.err (!%p3218_p11)
}
  0xd4   : > { %s3222_s1 = scalar_lea.vmem %s442_s30, 16  ;;  %s3361_s16 = smov [#allocation13]  }
  0xd5   : > { %p3223_p12 = scmp.ne.s32.totalorder %s442_s30, %s3222_s1  ;;  %s3227_s28 = sshll.u32 %s3361_s16, 4  ;;  %s3228_s28 = int_to_ptr.vmem [resolvable:$false] %s3227_s28 }
  0xd6   : > { %s3229_s5 = scalar_lea.vmem %s3228_s28, 32  ;;  %p3230_p10 = scmp.lt.s32.totalorder %s442_s30, %s3228_s28 }
  0xd7   : > { %p3225_p0 = pnand %p3223_p12, %p3494_p1  ;;  %p3231_p7 = scmp.lt.s32.totalorder %s3229_s5, %s3222_s1 }
  0xd9   : > { %p3226_p9 = pneg %p3225_p0  ;;  %p3232_p2 = por %p3231_p7, %p3230_p10 }
  0xdb   : > { %p3233_p4 = pnand %p3232_p2, %p3226_p9 }
  0xdd   : > { %3236 = shalt.err (!%p3233_p4)
}
  0xde   : > { %p4214_p13 = scmp.ne.s32.totalorder %s4200_s23, 0  ;;  %s4215_s15 = scalar_lea.sflag [#allocation12], %s3477_s24 }
  0xdf   : > { %s3710_s29 = scalar_lea.hbm %s4173_s8, %s3561_s25  ;;  %s459_s26 = scalar_lea.vmem [#allocation14], %s3470_s22 }
  0xe0   : > { %2935 = dma.hbm_to_vmem [thread:$0]  (!%p4214_p13), %s3684_s21, 16, %s442_s30, %s4215_s15  }
  0xe1   : > { %s466_s14 = sshll.u32 %s459_s26, 4  ;;  %s457_s3 = scalar_lea.sflag [#allocation15], %s3470_s22  ;;  %s467_s14 = int_to_ptr.vmem [resolvable:$true] %s466_s14 }
  0xe2   : > { %s3237_s24 = scalar_lea.hbm %s3710_s29, 16  ;;  %s3242_s30 = scalar_lea.hbm %s4173_s8, 48 }
  0xe3   : > { %p3238_p2 = scmp.ne.s32.totalorder %s3710_s29, %s3237_s24  ;;  %p3243_p3 = scmp.lt.u32.totalorder %s3710_s29, %s4173_s8 }
  0xe4   : > { %p3244_p8 = scmp.lt.u32.totalorder %s3242_s30, %s3237_s24  ;;  %p3246_p12 = scmp.lt.u32.totalorder %s3237_s24, %s3710_s29 }
  0xe5   : > { %p3240_p5 = pnand %p3238_p2, %p3494_p1 }
  0xe6   : > { %p3245_p11 = por %p3244_p8, %p3243_p3 }
  0xe7   : > { %p3241_p6 = pneg %p3240_p5 }
  0xe8   : > { %p3247_p0 = por %p3246_p12, %p3245_p11 }
  0xea   : > { %p3248_p9 = pnand %p3247_p0, %p3241_p6 }
  0xec   : > { %3251 = shalt.err (!%p3248_p9)
}
  0xed   : > { %s3252_s22 = scalar_lea.vmem %s467_s14, 16  ;;  %s3362_s16 = smov [#allocation14]  }
  0xee   : > { %p3253_p10 = scmp.ne.s32.totalorder %s467_s14, %s3252_s22  ;;  %s3257_s28 = sshll.u32 %s3362_s16, 4  ;;  %s3258_s28 = int_to_ptr.vmem [resolvable:$false] %s3257_s28 }
  0xef   : > { %s3259_s5 = scalar_lea.vmem %s3258_s28, 32  ;;  %p3260_p2 = scmp.lt.s32.totalorder %s467_s14, %s3258_s28 }
  0xf0   : > { %p3255_p7 = pnand %p3253_p10, %p3494_p1  ;;  %p3261_p5 = scmp.lt.s32.totalorder %s3259_s5, %s3252_s22 }
  0xf2   : > { %p3256_p4 = pneg %p3255_p7  ;;  %p3262_p13 = por %p3261_p5, %p3260_p2 }
  0xf4   : > { %p3263_p3 = pnand %p3262_p13, %p3256_p4 }
  0xf6   : > { %3266 = shalt.err (!%p3263_p3)
}
  0xf7   : > { %p4216_p8 = scmp.ne.s32.totalorder %s4200_s23, 0  ;;  %p4217_p6 = scmp.ne.s32.totalorder %s4205_s27, 0 }
  0xf8   : > { %s3734_s11 = sand.u32 (!%p4217_p6), 1, %s3341_s10   ;;  %p4218_p1 = scmp.ne.s32.totalorder (!%p4217_p6), %s4196_s19, 0 }
  0xf9   : > { %2938 = dma.hbm_to_vmem [thread:$0]  (!%p4216_p8), %s3710_s29, 16, %s467_s14, %s457_s3  }
  0xfa   : > { %475 = sbr.rel (%p4217_p6) target bundleno = 1514 (0x5ea), region = 56  ;;  %s2717_s15 = sshll.u32 (!%p4217_p6), %s3734_s11, 6 }
  0xfb   : > { %s478_s17 = scalar_lea.sflag (!%p4217_p6), [#allocation3], %s3734_s11  ;;  %s3738_s9 = scalar_lea.vmem (!%p4217_p6), [#allocation2], %s2717_s15 }
 0x101   : > { %3312 = dma.done.wait (%p4218_p1), %s478_s17, 1024  }
 0x102   : > { %3314 = vsyncadd (%p4218_p1), %s478_s17, 4294966272  ;;  %s486_s23 = sand.u32 1, %s3437_s13   ;;  %s2718_s27 = sshll.u32 %s3734_s11, 11 }
 0x103   : > { %s487_s29 = scalar_lea.sflag [#allocation6], %s486_s23  ;;  %s3746_s26 = scalar_lea.vmem [#allocation5], %s2718_s27 }
 0x104   : > { %3316 = dma.done.wait (%p4218_p1), %s487_s29, 32832  }
 0x105   : > { %3318 = vsyncadd (%p4218_p1), %s487_s29, 4294934464  ;;  %s2719_s14 = sshll.u32 %s3734_s11, 2  ;;  %s505_s24 = scalar_lea.sflag [#allocation9], %s486_s23 }
 0x106   : > { %s3753_s3 = scalar_lea.vmem [#allocation7], %s2719_s14  ;;  %s3755_s18 = scalar_lea.vmem [#allocation8], %s2719_s14 }
 0x107   : > { %3320 = dma.done.wait (%p4218_p1), %s505_s24, 2112  }
 0x108   : > { %3322 = vsyncadd (%p4218_p1), %s505_s24, 4294965184  ;;  %s2721_s21 = sshll.u32 %s3734_s11, 7  ;;  %s523_s1 = scalar_lea.sflag [#allocation12], %s486_s23 }
 0x109   : > { %s3762_s30 = scalar_lea.vmem [#allocation10], %s2721_s21  ;;  %s525_s25 = scalar_lea.vmem [#allocation11], %s3734_s11 }
 0x10a   : > { %3324 = dma.done.wait (%p4218_p1), %s523_s1, 32  }
 0x10b   : > { %3326 = vsyncadd (%p4218_p1), %s523_s1, 4294967264  ;;  %s533_s22 = scalar_lea.vmem [#allocation13], %s3734_s11  ;;  %s539_s16 = scalar_lea.sflag [#allocation15], %s3734_s11 }
 0x10c   : > { %s541_s28 = scalar_lea.vmem [#allocation14], %s3734_s11 }
 0x10d   : > { %3328 = dma.done.wait (%p4218_p1), %s539_s16, 16  }
 0x10e   : > { %3330 = vsyncadd (%p4218_p1), %s539_s16, 4294967280  ;;  %v628_v0 = vld [vmem:[%s3746_s26 + $0x8] sm:$0xff]  ;;  %v630_v1 = vld [vmem:[%s3746_s26 + $0x18] sm:$0xff]  ;;  %p613_p13 = scmp.lt.s32.totalorder %s3437_s13, 2  ;;  %vm3364_vm0 = vmmov 0   ;;  %s2722_s23 = sshll.u32 %s3734_s11, 3 }
 0x10f   : > { %v627_v2 = vld [vmem:[%s3746_s26] sm:$0xff]  ;;  %v884_v3 = vunpack.c.l.s8.bf16 %v628_v0  ;;  %v888_v4 = vunpack.c.h.s8.bf16 %v628_v0  ;;  %v886_v5 = vunpack.c.l.s8.bf16 %v630_v1  ;;  %v890_v6 = vunpack.c.h.s8.bf16 %v630_v1  ;;  %v629_v7 = vld [vmem:[%s3746_s26 + $0x10] sm:$0xff]  ;;  %v632_v10 = vld [vmem:[%s3746_s26 + $0x28] sm:$0xff]  ;;  %s2758_s27 = sshll.u32 %s3437_s13, 7  ;;  %s612_s29 = scalar_lea.vmem [#allocation16], %s2722_s23 }
 0x110   : > { %v883_v8 = vunpack.c.l.s8.bf16 %v627_v2  ;;  %v885_v9 = vunpack.c.l.s8.bf16 %v629_v7  ;;  %v634_v11 = vld [vmem:[%s3746_s26 + $0x38] sm:$0xff]  ;;  %v887_v12 = vunpack.c.h.s8.bf16 %v627_v2  ;;  %v889_v13 = vunpack.c.h.s8.bf16 %v629_v7  ;;  %v631_v16 = vld [vmem:[%s3746_s26 + $0x20] sm:$0xff]  ;;  %v633_v17 = vld [vmem:[%s3746_s26 + $0x30] sm:$0xff]  ;;  %s614_s19 = scalar_select %p613_p13, %s3437_s13, 2 }
 0x111   : > { %1451 = vmatprep.subr.bf16.mxu0 %v884_v3  ;;  %1779 = vmatprep.subr.bf16.mxu1 %v886_v5  ;;  %v892_v14 = vunpack.c.l.s8.bf16 %v632_v10  ;;  %v894_v15 = vunpack.c.l.s8.bf16 %v634_v11  ;;  %v891_v18 = vunpack.c.l.s8.bf16 %v631_v16  ;;  %v893_v19 = vunpack.c.l.s8.bf16 %v633_v17  ;;  %v636_v22 = vld [vmem:[%s3746_s26 + $0x48] sm:$0xff]  ;;  %v638_v23 = vld [vmem:[%s3746_s26 + $0x58] sm:$0xff]  ;;  %v635_v28 = vld [vmem:[%s3746_s26 + $0x40] sm:$0xff]  ;;  %s4219_s24 = sld [smem:[#allocation31_spill]]  ;;  %s2457_s13 = scalar_lea.sflag [#allocation4], %s3734_s11 }
 0x112   : > { %1452 = vmatpush1.bf16.msra.mxu0 %v883_v8  ;;  %1780 = vmatpush1.bf16.msra.mxu1 %v885_v9  ;;  %v896_v20 = vunpack.c.h.s8.bf16 %v632_v10  ;;  %v898_v21 = vunpack.c.h.s8.bf16 %v634_v11  ;;  %v895_v24 = vunpack.c.h.s8.bf16 %v631_v16  ;;  %v897_v25 = vunpack.c.h.s8.bf16 %v633_v17  ;;  %v637_v29 = vld [vmem:[%s3746_s26 + $0x50] sm:$0xff]  ;;  %v3789_v30 = vld [vmem:[%s3738_s9] sm:$0xff]  ;;  %v640_v36 = vld [vmem:[%s3746_s26 + $0x68] sm:$0xff]  ;;  %s2766_s5 = sshll.u32 %s614_s19, 6  ;;  %p4220_p12 = scmp.ne.s32.totalorder %s4197_s20, 0 }
 0x113   : > { %1453 = vmatprep.subr.bf16.mxu0 %v888_v4  ;;  %1781 = vmatprep.subr.bf16.mxu1 %v890_v6  ;;  %v900_v26 = vunpack.c.l.s8.bf16 %v636_v22  ;;  %v902_v27 = vunpack.c.l.s8.bf16 %v638_v23  ;;  %v899_v31 = vunpack.c.l.s8.bf16 %v635_v28  ;;  %v901_v32 = vunpack.c.l.s8.bf16 %v637_v29  ;;  %v642_v37 = vld [vmem:[%s3746_s26 + $0x78] sm:$0xff]  ;;  %v639_v42 = vld [vmem:[%s3746_s26 + $0x60] sm:$0xff]  ;;  %v641_v43 = vld [vmem:[%s3746_s26 + $0x70] sm:$0xff] }
 0x114   : > { %v904_v33 = vunpack.c.h.s8.bf16 %v636_v22  ;;  %v906_v34 = vunpack.c.h.s8.bf16 %v638_v23  ;;  %v2726_v35 = vcombine.high %v3789_v30, %v3789_v30  ;;  %v903_v38 = vunpack.c.h.s8.bf16 %v635_v28  ;;  %v644_v48 = vld [vmem:[%s3746_s26 + $0x88] sm:$0xff]  ;;  %v646_v49 = vld [vmem:[%s3746_s26 + $0x98] sm:$0xff]  ;;  %v643_v54 = vld [vmem:[%s3746_s26 + $0x80] sm:$0xff] }
 0x115   : > { %v905_v39 = vunpack.c.h.s8.bf16 %v637_v29  ;;  %v908_v40 = vunpack.c.l.s8.bf16 %v640_v36  ;;  %v910_v41 = vunpack.c.l.s8.bf16 %v642_v37  ;;  %v907_v44 = vunpack.c.l.s8.bf16 %v639_v42  ;;  %v645_v55 = vld [vmem:[%s3746_s26 + $0x90] sm:$0xff]  ;;  %v648_v60 = vld [vmem:[%s3746_s26 + $0xa8] sm:$0xff]  ;;  %v650_v61 = vld [vmem:[%s3746_s26 + $0xb8] sm:$0xff] }
 0x116   : > { %1454 = vmatpush1.bf16.msra.mxu0 %v887_v12  ;;  %1782 = vmatpush1.bf16.msra.mxu1 %v889_v13  ;;  %v909_v45 = vunpack.c.l.s8.bf16 %v641_v43  ;;  %v912_v46 = vunpack.c.h.s8.bf16 %v640_v36  ;;  %v914_v47 = vunpack.c.h.s8.bf16 %v642_v37  ;;  %v911_v50 = vunpack.c.h.s8.bf16 %v639_v42  ;;  %v647_v2 = vld [vmem:[%s3746_s26 + $0xa0] sm:$0xff]  ;;  %v649_v3 = vld [vmem:[%s3746_s26 + $0xb0] sm:$0xff]  ;;  %v652_v8 = vld [vmem:[%s3746_s26 + $0xc8] sm:$0xff] }
 0x117   : > { %1455 = vmatprep.subr.bf16.mxu0 %v892_v14  ;;  %1783 = vmatprep.subr.bf16.mxu1 %v894_v15  ;;  %v913_v51 = vunpack.c.h.s8.bf16 %v641_v43  ;;  %v916_v52 = vunpack.c.l.s8.bf16 %v644_v48  ;;  %v918_v53 = vunpack.c.l.s8.bf16 %v646_v49  ;;  %v915_v56 = vunpack.c.l.s8.bf16 %v643_v54  ;;  %v654_v9 = vld [vmem:[%s3746_s26 + $0xd8] sm:$0xff]  ;;  %v651_v14 = vld [vmem:[%s3746_s26 + $0xc0] sm:$0xff]  ;;  %v653_v15 = vld [vmem:[%s3746_s26 + $0xd0] sm:$0xff] }
 0x118   : > { %1483 = vmatprep.mubr.bf16.mxu0 %v2726_v35  ;;  %1811 = vmatprep.mubr.bf16.mxu1 %v2726_v35  ;;  %v917_v57 = vunpack.c.l.s8.bf16 %v645_v55  ;;  %v920_v58 = vunpack.c.h.s8.bf16 %v644_v48  ;;  %v922_v59 = vunpack.c.h.s8.bf16 %v646_v49  ;;  %v919_v62 = vunpack.c.h.s8.bf16 %v643_v54  ;;  %v3820_v42 = vld [vmem:[%s3738_s9 + $0x8] sm:$0xff]  ;;  %v666_v48 = vld [vmem:[%s3746_s26 + $0x138] sm:$0xff]  ;;  %v665_v54 = vld [vmem:[%s3746_s26 + $0x130] sm:$0xff] }
 0x119   : > { %v921_v63 = vunpack.c.h.s8.bf16 %v645_v55  ;;  %v924_v0 = vunpack.c.l.s8.bf16 %v648_v60  ;;  %v926_v1 = vunpack.c.l.s8.bf16 %v650_v61  ;;  %v923_v4 = vunpack.c.l.s8.bf16 %v647_v2 }
 0x11a   : > { %1456 = vmatpush1.bf16.msra.mxu0 %v891_v18  ;;  %1784 = vmatpush1.bf16.msra.mxu1 %v893_v19  ;;  %v925_v5 = vunpack.c.l.s8.bf16 %v649_v3  ;;  %v928_v6 = vunpack.c.h.s8.bf16 %v648_v60  ;;  %v930_v7 = vunpack.c.h.s8.bf16 %v650_v61  ;;  %v927_v10 = vunpack.c.h.s8.bf16 %v647_v2  ;;  %v670_v60 = vld [vmem:[%s3746_s26 + $0x158] sm:$0xff]  ;;  %v669_v2 = vld [vmem:[%s3746_s26 + $0x150] sm:$0xff] }
 0x11b   : > { %1457 = vmatprep.subr.bf16.mxu0 %v896_v20  ;;  %1785 = vmatprep.subr.bf16.mxu1 %v898_v21  ;;  %v929_v11 = vunpack.c.h.s8.bf16 %v649_v3  ;;  %v932_v12 = vunpack.c.l.s8.bf16 %v652_v8  ;;  %v934_v13 = vunpack.c.l.s8.bf16 %v654_v9  ;;  %v931_v16 = vunpack.c.l.s8.bf16 %v651_v14  ;;  %v656_v20 = vld [vmem:[%s3746_s26 + $0xe8] sm:$0xff]  ;;  %v658_v21 = vld [vmem:[%s3746_s26 + $0xf8] sm:$0xff] }
 0x11c   : > { %v933_v17 = vunpack.c.l.s8.bf16 %v653_v15  ;;  %v936_v18 = vunpack.c.h.s8.bf16 %v652_v8  ;;  %v938_v19 = vunpack.c.h.s8.bf16 %v654_v9  ;;  %v935_v22 = vunpack.c.h.s8.bf16 %v651_v14  ;;  %v674_v8 = vld [vmem:[%s3746_s26 + $0x178] sm:$0xff]  ;;  %v673_v14 = vld [vmem:[%s3746_s26 + $0x170] sm:$0xff] }
 0x11d   : > { %v937_v23 = vunpack.c.h.s8.bf16 %v653_v15  ;;  %v2728_v49 = vcombine.high %v3820_v42, %v3820_v42  ;;  %vm2454_vm1 = vcmask 195584  }
 0x11e   : > { %1458 = vmatpush1.bf16.msra.mxu0 %v895_v24  ;;  %1786 = vmatpush1.bf16.msra.mxu1 %v897_v25  ;;  %v940_v24 = vunpack.c.l.s8.bf16 %v656_v20  ;;  %v942_v25 = vunpack.c.l.s8.bf16 %v658_v21 }
 0x11f   : > { %1459 = vmatprep.subr.bf16.mxu0 %v900_v26  ;;  %1787 = vmatprep.subr.bf16.mxu1 %v902_v27  ;;  %v655_v26 = vld [vmem:[%s3746_s26 + $0xe0] sm:$0xff]  ;;  %v657_v27 = vld [vmem:[%s3746_s26 + $0xf0] sm:$0xff] }
 0x120   : > { %v939_v28 = vunpack.c.l.s8.bf16 %v655_v26  ;;  %v941_v29 = vunpack.c.l.s8.bf16 %v657_v27  ;;  %v943_v35 = vunpack.c.h.s8.bf16 %v655_v26  ;;  %v945_v36 = vunpack.c.h.s8.bf16 %v657_v27  ;;  %v677_v26 = vld [vmem:[%s3746_s26 + $0x190] sm:$0xff] }
 0x122   : > { %1460 = vmatpush1.bf16.msra.mxu0 %v899_v31  ;;  %1788 = vmatpush1.bf16.msra.mxu1 %v901_v32  ;;  %v944_v31 = vunpack.c.h.s8.bf16 %v656_v20  ;;  %v946_v32 = vunpack.c.h.s8.bf16 %v658_v21  ;;  %v678_v20 = vld [vmem:[%s3746_s26 + $0x198] sm:$0xff] }
 0x123   : > { %1461 = vmatprep.subr.bf16.mxu0 %v904_v33  ;;  %1789 = vmatprep.subr.bf16.mxu1 %v906_v34  ;;  %v660_v33 = vld [vmem:[%s3746_s26 + $0x108] sm:$0xff]  ;;  %v662_v34 = vld [vmem:[%s3746_s26 + $0x118] sm:$0xff] }
 0x124   : > { %v948_v37 = vunpack.c.l.s8.bf16 %v660_v33 }
 0x126   : > { %1462 = vmatpush1.bf16.msra.mxu0 %v903_v38  ;;  %1790 = vmatpush1.bf16.msra.mxu1 %v905_v39  ;;  %v950_v38 = vunpack.c.l.s8.bf16 %v662_v34  ;;  %v659_v39 = vld [vmem:[%s3746_s26 + $0x100] sm:$0xff] }
 0x127   : > { %1463 = vmatprep.subr.bf16.mxu0 %v908_v40  ;;  %1791 = vmatprep.subr.bf16.mxu1 %v910_v41  ;;  %v661_v40 = vld [vmem:[%s3746_s26 + $0x110] sm:$0xff]  ;;  %v2725_v41 = vcombine.low %v3789_v30, %v3789_v30  ;;  %v947_v43 = vunpack.c.l.s8.bf16 %v659_v39  ;;  %v951_v30 = vunpack.c.h.s8.bf16 %v659_v39 }
 0x128   : > { %v681_v39 = vld [vmem:[%s3746_s26 + $0x1b0] sm:$0xff] }
 0x12a   : > { %1464 = vmatpush1.bf16.msra.mxu0 %v907_v44  ;;  %1792 = vmatpush1.bf16.msra.mxu1 %v909_v45  ;;  %v949_v44 = vunpack.c.l.s8.bf16 %v661_v40  ;;  %v952_v45 = vunpack.c.h.s8.bf16 %v660_v33  ;;  %v682_v33 = vld [vmem:[%s3746_s26 + $0x1b8] sm:$0xff] }
 0x12b   : > { %1465 = vmatprep.subr.bf16.mxu0 %v912_v46  ;;  %1793 = vmatprep.subr.bf16.mxu1 %v914_v47  ;;  %v954_v46 = vunpack.c.h.s8.bf16 %v662_v34  ;;  %v664_v47 = vld [vmem:[%s3746_s26 + $0x128] sm:$0xff] }
 0x12e   : > { %1466 = vmatpush1.bf16.msra.mxu0 %v911_v50  ;;  %1794 = vmatpush1.bf16.msra.mxu1 %v913_v51  ;;  %v953_v50 = vunpack.c.h.s8.bf16 %v661_v40  ;;  %v956_v51 = vunpack.c.l.s8.bf16 %v664_v47 }
 0x12f   : > { %1467 = vmatprep.subr.bf16.mxu0 %v916_v52  ;;  %1795 = vmatprep.subr.bf16.mxu1 %v918_v53  ;;  %v958_v52 = vunpack.c.l.s8.bf16 %v666_v48  ;;  %v663_v53 = vld [vmem:[%s3746_s26 + $0x120] sm:$0xff] }
 0x130   : > { %v955_v55 = vunpack.c.l.s8.bf16 %v663_v53  ;;  %v959_v61 = vunpack.c.h.s8.bf16 %v663_v53 }
 0x132   : > { %1468 = vmatpush1.bf16.msra.mxu0 %v915_v56  ;;  %1796 = vmatpush1.bf16.msra.mxu1 %v917_v57  ;;  %v957_v56 = vunpack.c.l.s8.bf16 %v665_v54  ;;  %v960_v57 = vunpack.c.h.s8.bf16 %v664_v47 }
 0x133   : > { %1469 = vmatprep.subr.bf16.mxu0 %v920_v58  ;;  %1797 = vmatprep.subr.bf16.mxu1 %v922_v59  ;;  %v962_v58 = vunpack.c.h.s8.bf16 %v666_v48  ;;  %v668_v59 = vld [vmem:[%s3746_s26 + $0x148] sm:$0xff]  ;;  %v993_v48 = vunpack.c.h.s8.bf16 %v681_v39 }
 0x136   : > { %1470 = vmatpush1.bf16.msra.mxu0 %v919_v62  ;;  %1798 = vmatpush1.bf16.msra.mxu1 %v921_v63  ;;  %v961_v62 = vunpack.c.h.s8.bf16 %v665_v54  ;;  %v964_v63 = vunpack.c.l.s8.bf16 %v668_v59 }
 0x137   : > { %1471 = vmatprep.subr.bf16.mxu0 %v924_v0  ;;  %1799 = vmatprep.subr.bf16.mxu1 %v926_v1  ;;  %v966_v0 = vunpack.c.l.s8.bf16 %v670_v60  ;;  %v667_v1 = vld [vmem:[%s3746_s26 + $0x140] sm:$0xff] }
 0x138   : > { %v963_v3 = vunpack.c.l.s8.bf16 %v667_v1  ;;  %v967_v9 = vunpack.c.h.s8.bf16 %v667_v1 }
 0x13a   : > { %1472 = vmatpush1.bf16.msra.mxu0 %v923_v4  ;;  %1800 = vmatpush1.bf16.msra.mxu1 %v925_v5  ;;  %v965_v4 = vunpack.c.l.s8.bf16 %v669_v2  ;;  %v968_v5 = vunpack.c.h.s8.bf16 %v668_v59 }
 0x13b   : > { %1473 = vmatprep.subr.bf16.mxu0 %v928_v6  ;;  %1801 = vmatprep.subr.bf16.mxu1 %v930_v7  ;;  %v970_v6 = vunpack.c.h.s8.bf16 %v670_v60  ;;  %v672_v7 = vld [vmem:[%s3746_s26 + $0x168] sm:$0xff] }
 0x13e   : > { %1474 = vmatpush1.bf16.msra.mxu0 %v927_v10  ;;  %1802 = vmatpush1.bf16.msra.mxu1 %v929_v11  ;;  %v969_v10 = vunpack.c.h.s8.bf16 %v669_v2  ;;  %v972_v11 = vunpack.c.l.s8.bf16 %v672_v7 }
 0x13f   : > { %1475 = vmatprep.subr.bf16.mxu0 %v932_v12  ;;  %1803 = vmatprep.subr.bf16.mxu1 %v934_v13  ;;  %v974_v12 = vunpack.c.l.s8.bf16 %v674_v8  ;;  %v671_v13 = vld [vmem:[%s3746_s26 + $0x160] sm:$0xff] }
 0x140   : > { %v971_v15 = vunpack.c.l.s8.bf16 %v671_v13  ;;  %v975_v21 = vunpack.c.h.s8.bf16 %v671_v13  ;;  %v3859_v13 = vld [vmem:[%s3738_s9 + $0x10] sm:$0xff] }
 0x142   : > { %1476 = vmatpush1.bf16.msra.mxu0 %v931_v16  ;;  %1804 = vmatpush1.bf16.msra.mxu1 %v933_v17  ;;  %v973_v16 = vunpack.c.l.s8.bf16 %v673_v14  ;;  %v976_v17 = vunpack.c.h.s8.bf16 %v672_v7 }
 0x143   : > { %1477 = vmatprep.subr.bf16.mxu0 %v936_v18  ;;  %1805 = vmatprep.subr.bf16.mxu1 %v938_v19  ;;  %v978_v18 = vunpack.c.h.s8.bf16 %v674_v8  ;;  %v676_v19 = vld [vmem:[%s3746_s26 + $0x188] sm:$0xff] }
 0x146   : > { %1478 = vmatpush1.bf16.msra.mxu0 %v935_v22  ;;  %1806 = vmatpush1.bf16.msra.mxu1 %v937_v23  ;;  %v977_v22 = vunpack.c.h.s8.bf16 %v673_v14  ;;  %v980_v23 = vunpack.c.l.s8.bf16 %v676_v19 }
 0x147   : > { %1479 = vmatprep.subr.bf16.mxu0 %v940_v24  ;;  %1807 = vmatprep.subr.bf16.mxu1 %v942_v25  ;;  %v982_v24 = vunpack.c.l.s8.bf16 %v678_v20  ;;  %v675_v25 = vld [vmem:[%s3746_s26 + $0x180] sm:$0xff] }
 0x148   : > { %v979_v27 = vunpack.c.l.s8.bf16 %v675_v25  ;;  %v983_v34 = vunpack.c.h.s8.bf16 %v675_v25  ;;  %v697_v25 = vld [vmem:[%s3746_s26 + $0x230] sm:$0xff] }
 0x14a   : > { %1480 = vmatpush1.bf16.msra.mxu0 %v939_v28  ;;  %1808 = vmatpush1.bf16.msra.mxu1 %v941_v29  ;;  %v981_v28 = vunpack.c.l.s8.bf16 %v677_v26  ;;  %v984_v29 = vunpack.c.h.s8.bf16 %v676_v19  ;;  %v698_v19 = vld [vmem:[%s3746_s26 + $0x238] sm:$0xff] }
 0x14b   : > { %1481 = vmatprep.subr.bf16.mxu0 %v944_v31  ;;  %1809 = vmatprep.subr.bf16.mxu1 %v946_v32  ;;  %v986_v31 = vunpack.c.h.s8.bf16 %v678_v20  ;;  %v680_v32 = vld [vmem:[%s3746_s26 + $0x1a8] sm:$0xff]  ;;  %v2730_v20 = vcombine.high %v3859_v13, %v3859_v13 }
 0x14e   : > { %1482 = vmatpush1.bf16.msra.mxu0 %v943_v35  ;;  %1810 = vmatpush1.bf16.msra.mxu1 %v945_v36  ;;  %v985_v35 = vunpack.c.h.s8.bf16 %v677_v26  ;;  %v988_v36 = vunpack.c.l.s8.bf16 %v680_v32 }
 0x14f   : > { %1492 = vmatprep.subr.bf16.mxu0 %v948_v37  ;;  %1820 = vmatprep.subr.bf16.mxu1 %v950_v38  ;;  %v990_v37 = vunpack.c.l.s8.bf16 %v682_v33  ;;  %v679_v38 = vld [vmem:[%s3746_s26 + $0x1a0] sm:$0xff] }
 0x150   : > { %v987_v40 = vunpack.c.l.s8.bf16 %v679_v38  ;;  %v991_v47 = vunpack.c.h.s8.bf16 %v679_v38  ;;  %v701_v38 = vld [vmem:[%s3746_s26 + $0x250] sm:$0xff] }
 0x151   : > { %1484 = vmatmul.mubr.bf16.vlgmr.msra.gmra.mrb[0].mxu0 %v2725_v41  ;;  %1812 = vmatmul.mubr.bf16.vlgmr.msra.gmra.mrb[0].mxu1 %v2725_v41  ;;  %v989_v41 = vunpack.c.l.s8.bf16 %v681_v39 }
 0x152   : > { %1493 = vmatpush1.bf16.msra.mxu0 %v947_v43  ;;  %1821 = vmatpush1.bf16.msra.mxu1 %v949_v44  ;;  %v992_v43 = vunpack.c.h.s8.bf16 %v680_v32  ;;  %v994_v44 = vunpack.c.h.s8.bf16 %v682_v33  ;;  %v702_v32 = vld [vmem:[%s3746_s26 + $0x258] sm:$0xff] }
 0x153   : > { %1494 = vmatprep.subr.bf16.mxu0 %v952_v45  ;;  %1822 = vmatprep.subr.bf16.mxu1 %v954_v46  ;;  %v684_v45 = vld [vmem:[%s3746_s26 + $0x1c8] sm:$0xff]  ;;  %v686_v46 = vld [vmem:[%s3746_s26 + $0x1d8] sm:$0xff] }
 0x154   : > { %1524 = vmatprep.mubr.bf16.mxu0 %v2728_v49  ;;  %1852 = vmatprep.mubr.bf16.mxu1 %v2728_v49  ;;  %v996_v49 = vunpack.c.l.s8.bf16 %v684_v45  ;;  %v1000_v54 = vunpack.c.h.s8.bf16 %v684_v45  ;;  %v706_v45 = vld [vmem:[%s3746_s26 + $0x278] sm:$0xff] }
 0x156   : > { %1495 = vmatpush1.bf16.msra.mxu0 %v951_v30  ;;  %1823 = vmatpush1.bf16.msra.mxu1 %v953_v50  ;;  %v998_v30 = vunpack.c.l.s8.bf16 %v686_v46  ;;  %v683_v50 = vld [vmem:[%s3746_s26 + $0x1c0] sm:$0xff] }
 0x157   : > { %1496 = vmatprep.subr.bf16.mxu0 %v956_v51  ;;  %1824 = vmatprep.subr.bf16.mxu1 %v958_v52  ;;  %v685_v51 = vld [vmem:[%s3746_s26 + $0x1d0] sm:$0xff]  ;;  %v995_v52 = vunpack.c.l.s8.bf16 %v683_v50 }
 0x158   : > { %v997_v53 = vunpack.c.l.s8.bf16 %v685_v51  ;;  %v1001_v59 = vunpack.c.h.s8.bf16 %v685_v51 }
 0x15a   : > { %1497 = vmatpush1.bf16.msra.mxu0 %v955_v55  ;;  %1825 = vmatpush1.bf16.msra.mxu1 %v957_v56  ;;  %v1002_v55 = vunpack.c.h.s8.bf16 %v686_v46  ;;  %v688_v56 = vld [vmem:[%s3746_s26 + $0x1e8] sm:$0xff] }
 0x15b   : > { %1498 = vmatprep.subr.bf16.mxu0 %v960_v57  ;;  %1826 = vmatprep.subr.bf16.mxu1 %v962_v58  ;;  %v690_v57 = vld [vmem:[%s3746_s26 + $0x1f8] sm:$0xff]  ;;  %v999_v58 = vunpack.c.h.s8.bf16 %v683_v50  ;;  %v1004_v60 = vunpack.c.l.s8.bf16 %v688_v56  ;;  %v1008_v2 = vunpack.c.h.s8.bf16 %v688_v56  ;;  %v705_v50 = vld [vmem:[%s3746_s26 + $0x270] sm:$0xff] }
 0x15c   : > { %v710_v56 = vld [vmem:[%s3746_s26 + $0x298] sm:$0xff] }
 0x15e   : > { %1499 = vmatpush1.bf16.msra.mxu0 %v959_v61  ;;  %1827 = vmatpush1.bf16.msra.mxu1 %v961_v62  ;;  %v1006_v61 = vunpack.c.l.s8.bf16 %v690_v57  ;;  %v687_v62 = vld [vmem:[%s3746_s26 + $0x1e0] sm:$0xff] }
 0x15f   : > { %1500 = vmatprep.subr.bf16.mxu0 %v964_v63  ;;  %1828 = vmatprep.subr.bf16.mxu1 %v966_v0  ;;  %v689_v63 = vld [vmem:[%s3746_s26 + $0x1f0] sm:$0xff]  ;;  %v1003_v0 = vunpack.c.l.s8.bf16 %v687_v62 }
 0x160   : > { %v1005_v1 = vunpack.c.l.s8.bf16 %v689_v63  ;;  %v1009_v7 = vunpack.c.h.s8.bf16 %v689_v63 }
 0x162   : > { %1501 = vmatpush1.bf16.msra.mxu0 %v963_v3  ;;  %1829 = vmatpush1.bf16.msra.mxu1 %v965_v4  ;;  %v1010_v3 = vunpack.c.h.s8.bf16 %v690_v57  ;;  %v692_v4 = vld [vmem:[%s3746_s26 + $0x208] sm:$0xff] }
 0x163   : > { %1502 = vmatprep.subr.bf16.mxu0 %v968_v5  ;;  %1830 = vmatprep.subr.bf16.mxu1 %v970_v6  ;;  %v694_v5 = vld [vmem:[%s3746_s26 + $0x218] sm:$0xff]  ;;  %v1007_v6 = vunpack.c.h.s8.bf16 %v687_v62  ;;  %v1012_v8 = vunpack.c.l.s8.bf16 %v692_v4  ;;  %v709_v62 = vld [vmem:[%s3746_s26 + $0x290] sm:$0xff] }
 0x166   : > { %1503 = vmatpush1.bf16.msra.mxu0 %v967_v9  ;;  %1831 = vmatpush1.bf16.msra.mxu1 %v969_v10  ;;  %v1014_v9 = vunpack.c.l.s8.bf16 %v694_v5  ;;  %v691_v10 = vld [vmem:[%s3746_s26 + $0x200] sm:$0xff] }
 0x167   : > { %1504 = vmatprep.subr.bf16.mxu0 %v972_v11  ;;  %1832 = vmatprep.subr.bf16.mxu1 %v974_v12  ;;  %v693_v11 = vld [vmem:[%s3746_s26 + $0x210] sm:$0xff]  ;;  %v2727_v12 = vcombine.low %v3820_v42, %v3820_v42  ;;  %v1011_v14 = vunpack.c.l.s8.bf16 %v691_v10  ;;  %v1015_v42 = vunpack.c.h.s8.bf16 %v691_v10 }
 0x168   : > { %v713_v10 = vld [vmem:[%s3746_s26 + $0x2b0] sm:$0xff] }
 0x16a   : > { %1505 = vmatpush1.bf16.msra.mxu0 %v971_v15  ;;  %1833 = vmatpush1.bf16.msra.mxu1 %v973_v16  ;;  %v1013_v15 = vunpack.c.l.s8.bf16 %v693_v11  ;;  %v1016_v16 = vunpack.c.h.s8.bf16 %v692_v4  ;;  %v714_v4 = vld [vmem:[%s3746_s26 + $0x2b8] sm:$0xff] }
 0x16b   : > { %1506 = vmatprep.subr.bf16.mxu0 %v976_v17  ;;  %1834 = vmatprep.subr.bf16.mxu1 %v978_v18  ;;  %v1018_v17 = vunpack.c.h.s8.bf16 %v694_v5  ;;  %v696_v18 = vld [vmem:[%s3746_s26 + $0x228] sm:$0xff] }
 0x16e   : > { %1507 = vmatpush1.bf16.msra.mxu0 %v975_v21  ;;  %1835 = vmatpush1.bf16.msra.mxu1 %v977_v22  ;;  %v1017_v21 = vunpack.c.h.s8.bf16 %v693_v11  ;;  %v1020_v22 = vunpack.c.l.s8.bf16 %v696_v18 }
 0x16f   : > { %1508 = vmatprep.subr.bf16.mxu0 %v980_v23  ;;  %1836 = vmatprep.subr.bf16.mxu1 %v982_v24  ;;  %v1022_v23 = vunpack.c.l.s8.bf16 %v698_v19  ;;  %v695_v24 = vld [vmem:[%s3746_s26 + $0x220] sm:$0xff] }
 0x170   : > { %v1019_v26 = vunpack.c.l.s8.bf16 %v695_v24  ;;  %v1023_v33 = vunpack.c.h.s8.bf16 %v695_v24 }
 0x172   : > { %1509 = vmatpush1.bf16.msra.mxu0 %v979_v27  ;;  %1837 = vmatpush1.bf16.msra.mxu1 %v981_v28  ;;  %v1021_v27 = vunpack.c.l.s8.bf16 %v697_v25  ;;  %v1024_v28 = vunpack.c.h.s8.bf16 %v696_v18 }
 0x173   : > { %1510 = vmatprep.subr.bf16.mxu0 %v984_v29  ;;  %1838 = vmatprep.subr.bf16.mxu1 %v986_v31  ;;  %v1026_v29 = vunpack.c.h.s8.bf16 %v698_v19  ;;  %v700_v31 = vld [vmem:[%s3746_s26 + $0x248] sm:$0xff]  ;;  %v1057_v19 = vunpack.c.h.s8.bf16 %v713_v10 }
 0x176   : > { %1511 = vmatpush1.bf16.msra.mxu0 %v983_v34  ;;  %1839 = vmatpush1.bf16.msra.mxu1 %v985_v35  ;;  %v1025_v34 = vunpack.c.h.s8.bf16 %v697_v25  ;;  %v1028_v35 = vunpack.c.l.s8.bf16 %v700_v31 }
 0x177   : > { %1512 = vmatprep.subr.bf16.mxu0 %v988_v36  ;;  %1840 = vmatprep.subr.bf16.mxu1 %v990_v37  ;;  %v1030_v36 = vunpack.c.l.s8.bf16 %v702_v32  ;;  %v699_v37 = vld [vmem:[%s3746_s26 + $0x240] sm:$0xff] }
 0x178   : > { %v1027_v39 = vunpack.c.l.s8.bf16 %v699_v37  ;;  %v1031_v46 = vunpack.c.h.s8.bf16 %v699_v37 }
 0x17a   : > { %1513 = vmatpush1.bf16.msra.mxu0 %v987_v40  ;;  %1841 = vmatpush1.bf16.msra.mxu1 %v989_v41  ;;  %v1029_v40 = vunpack.c.l.s8.bf16 %v701_v38  ;;  %v1032_v41 = vunpack.c.h.s8.bf16 %v700_v31 }
 0x17b   : > { %1514 = vmatprep.subr.bf16.mxu0 %v992_v43  ;;  %1842 = vmatprep.subr.bf16.mxu1 %v994_v44  ;;  %v1034_v43 = vunpack.c.h.s8.bf16 %v702_v32  ;;  %v704_v44 = vld [vmem:[%s3746_s26 + $0x268] sm:$0xff] }
 0x17e   : > { %1515 = vmatpush1.bf16.msra.mxu0 %v991_v47  ;;  %1843 = vmatpush1.bf16.msra.mxu1 %v993_v48  ;;  %v1033_v47 = vunpack.c.h.s8.bf16 %v701_v38  ;;  %v1036_v48 = vunpack.c.l.s8.bf16 %v704_v44 }
 0x17f   : > { %1516 = vmatprep.subr.bf16.mxu0 %v996_v49  ;;  %1844 = vmatprep.subr.bf16.mxu1 %v998_v30  ;;  %v1038_v49 = vunpack.c.l.s8.bf16 %v706_v45  ;;  %v703_v30 = vld [vmem:[%s3746_s26 + $0x260] sm:$0xff] }
 0x180   : > { %v1035_v51 = vunpack.c.l.s8.bf16 %v703_v30  ;;  %v1039_v57 = vunpack.c.h.s8.bf16 %v703_v30  ;;  %v3898_v30 = vld [vmem:[%s3738_s9 + $0x18] sm:$0xff] }
 0x182   : > { %1517 = vmatpush1.bf16.msra.mxu0 %v995_v52  ;;  %1845 = vmatpush1.bf16.msra.mxu1 %v997_v53  ;;  %v1037_v52 = vunpack.c.l.s8.bf16 %v705_v50  ;;  %v1040_v53 = vunpack.c.h.s8.bf16 %v704_v44 }
 0x183   : > { %1518 = vmatprep.subr.bf16.mxu0 %v1000_v54  ;;  %1846 = vmatprep.subr.bf16.mxu1 %v1002_v55  ;;  %v1042_v54 = vunpack.c.h.s8.bf16 %v706_v45  ;;  %v708_v55 = vld [vmem:[%s3746_s26 + $0x288] sm:$0xff] }
 0x186   : > { %1519 = vmatpush1.bf16.msra.mxu0 %v999_v58  ;;  %1847 = vmatpush1.bf16.msra.mxu1 %v1001_v59  ;;  %v1041_v58 = vunpack.c.h.s8.bf16 %v705_v50  ;;  %v1044_v59 = vunpack.c.l.s8.bf16 %v708_v55 }
 0x187   : > { %1520 = vmatprep.subr.bf16.mxu0 %v1004_v60  ;;  %1848 = vmatprep.subr.bf16.mxu1 %v1006_v61  ;;  %v1046_v60 = vunpack.c.l.s8.bf16 %v710_v56  ;;  %v707_v61 = vld [vmem:[%s3746_s26 + $0x280] sm:$0xff] }
 0x188   : > { %v1043_v63 = vunpack.c.l.s8.bf16 %v707_v61  ;;  %v1047_v5 = vunpack.c.h.s8.bf16 %v707_v61  ;;  %v729_v61 = vld [vmem:[%s3746_s26 + $0x330] sm:$0xff] }
 0x18a   : > { %1521 = vmatpush1.bf16.msra.mxu0 %v1003_v0  ;;  %1849 = vmatpush1.bf16.msra.mxu1 %v1005_v1  ;;  %v1045_v0 = vunpack.c.l.s8.bf16 %v709_v62  ;;  %v1048_v1 = vunpack.c.h.s8.bf16 %v708_v55  ;;  %v730_v55 = vld [vmem:[%s3746_s26 + $0x338] sm:$0xff] }
 0x18b   : > { %1522 = vmatprep.subr.bf16.mxu0 %v1008_v2  ;;  %1850 = vmatprep.subr.bf16.mxu1 %v1010_v3  ;;  %v1050_v2 = vunpack.c.h.s8.bf16 %v710_v56  ;;  %v712_v3 = vld [vmem:[%s3746_s26 + $0x2a8] sm:$0xff]  ;;  %v2732_v56 = vcombine.high %v3898_v30, %v3898_v30 }
 0x18e   : > { %1523 = vmatpush1.bf16.msra.mxu0 %v1007_v6  ;;  %1851 = vmatpush1.bf16.msra.mxu1 %v1009_v7  ;;  %v1049_v6 = vunpack.c.h.s8.bf16 %v709_v62  ;;  %v1052_v7 = vunpack.c.l.s8.bf16 %v712_v3 }
 0x18f   : > { %1533 = vmatprep.subr.bf16.mxu0 %v1012_v8  ;;  %1861 = vmatprep.subr.bf16.mxu1 %v1014_v9  ;;  %v1054_v8 = vunpack.c.l.s8.bf16 %v714_v4  ;;  %v711_v9 = vld [vmem:[%s3746_s26 + $0x2a0] sm:$0xff] }
 0x190   : > { %v1051_v11 = vunpack.c.l.s8.bf16 %v711_v9  ;;  %v1055_v18 = vunpack.c.h.s8.bf16 %v711_v9  ;;  %v733_v9 = vld [vmem:[%s3746_s26 + $0x350] sm:$0xff] }
 0x191   : > { %1525 = vmatmul.mubr.bf16.vlgmr.msra.gmra.mrb[0].mxu0 %v2727_v12  ;;  %1853 = vmatmul.mubr.bf16.vlgmr.msra.gmra.mrb[0].mxu1 %v2727_v12  ;;  %v1053_v12 = vunpack.c.l.s8.bf16 %v713_v10 }
 0x192   : > { %1534 = vmatpush1.bf16.msra.mxu0 %v1011_v14  ;;  %1862 = vmatpush1.bf16.msra.mxu1 %v1013_v15  ;;  %v1056_v14 = vunpack.c.h.s8.bf16 %v712_v3  ;;  %v1058_v15 = vunpack.c.h.s8.bf16 %v714_v4  ;;  %v734_v3 = vld [vmem:[%s3746_s26 + $0x358] sm:$0xff] }
 0x193   : > { %1535 = vmatprep.subr.bf16.mxu0 %v1016_v16  ;;  %1863 = vmatprep.subr.bf16.mxu1 %v1018_v17  ;;  %v716_v16 = vld [vmem:[%s3746_s26 + $0x2c8] sm:$0xff]  ;;  %v718_v17 = vld [vmem:[%s3746_s26 + $0x2d8] sm:$0xff] }
 0x194   : > { %1565 = vmatprep.mubr.bf16.mxu0 %v2730_v20  ;;  %1893 = vmatprep.mubr.bf16.mxu1 %v2730_v20  ;;  %v1060_v20 = vunpack.c.l.s8.bf16 %v716_v16  ;;  %v1064_v25 = vunpack.c.h.s8.bf16 %v716_v16  ;;  %v738_v16 = vld [vmem:[%s3746_s26 + $0x378] sm:$0xff] }
 0x196   : > { %1536 = vmatpush1.bf16.msra.mxu0 %v1015_v42  ;;  %1864 = vmatpush1.bf16.msra.mxu1 %v1017_v21  ;;  %v1062_v42 = vunpack.c.l.s8.bf16 %v718_v17  ;;  %v715_v21 = vld [vmem:[%s3746_s26 + $0x2c0] sm:$0xff] }
 0x197   : > { %1537 = vmatprep.subr.bf16.mxu0 %v1020_v22  ;;  %1865 = vmatprep.subr.bf16.mxu1 %v1022_v23  ;;  %v717_v22 = vld [vmem:[%s3746_s26 + $0x2d0] sm:$0xff]  ;;  %v1059_v23 = vunpack.c.l.s8.bf16 %v715_v21 }
 0x198   : > { %v1061_v24 = vunpack.c.l.s8.bf16 %v717_v22  ;;  %v1065_v31 = vunpack.c.h.s8.bf16 %v717_v22 }
 0x19a   : > { %1538 = vmatpush1.bf16.msra.mxu0 %v1019_v26  ;;  %1866 = vmatpush1.bf16.msra.mxu1 %v1021_v27  ;;  %v1066_v26 = vunpack.c.h.s8.bf16 %v718_v17  ;;  %v720_v27 = vld [vmem:[%s3746_s26 + $0x2e8] sm:$0xff] }
 0x19b   : > { %1539 = vmatprep.subr.bf16.mxu0 %v1024_v28  ;;  %1867 = vmatprep.subr.bf16.mxu1 %v1026_v29  ;;  %v722_v28 = vld [vmem:[%s3746_s26 + $0x2f8] sm:$0xff]  ;;  %v1063_v29 = vunpack.c.h.s8.bf16 %v715_v21  ;;  %v1068_v32 = vunpack.c.l.s8.bf16 %v720_v27  ;;  %v1072_v38 = vunpack.c.h.s8.bf16 %v720_v27  ;;  %v737_v21 = vld [vmem:[%s3746_s26 + $0x370] sm:$0xff] }
 0x19c   : > { %v742_v27 = vld [vmem:[%s3746_s26 + $0x398] sm:$0xff] }
 0x19e   : > { %1540 = vmatpush1.bf16.msra.mxu0 %v1023_v33  ;;  %1868 = vmatpush1.bf16.msra.mxu1 %v1025_v34  ;;  %v1070_v33 = vunpack.c.l.s8.bf16 %v722_v28  ;;  %v719_v34 = vld [vmem:[%s3746_s26 + $0x2e0] sm:$0xff] }
 0x19f   : > { %1541 = vmatprep.subr.bf16.mxu0 %v1028_v35  ;;  %1869 = vmatprep.subr.bf16.mxu1 %v1030_v36  ;;  %v721_v35 = vld [vmem:[%s3746_s26 + $0x2f0] sm:$0xff]  ;;  %v1067_v36 = vunpack.c.l.s8.bf16 %v719_v34 }
 0x1a0   : > { %v1069_v37 = vunpack.c.l.s8.bf16 %v721_v35  ;;  %v1073_v44 = vunpack.c.h.s8.bf16 %v721_v35 }
 0x1a2   : > { %1542 = vmatpush1.bf16.msra.mxu0 %v1027_v39  ;;  %1870 = vmatpush1.bf16.msra.mxu1 %v1029_v40  ;;  %v1074_v39 = vunpack.c.h.s8.bf16 %v722_v28  ;;  %v724_v40 = vld [vmem:[%s3746_s26 + $0x308] sm:$0xff] }
 0x1a3   : > { %1543 = vmatprep.subr.bf16.mxu0 %v1032_v41  ;;  %1871 = vmatprep.subr.bf16.mxu1 %v1034_v43  ;;  %v726_v41 = vld [vmem:[%s3746_s26 + $0x318] sm:$0xff]  ;;  %v1071_v43 = vunpack.c.h.s8.bf16 %v719_v34  ;;  %v1076_v45 = vunpack.c.l.s8.bf16 %v724_v40  ;;  %v741_v34 = vld [vmem:[%s3746_s26 + $0x390] sm:$0xff] }
 0x1a6   : > { %1544 = vmatpush1.bf16.msra.mxu0 %v1031_v46  ;;  %1872 = vmatpush1.bf16.msra.mxu1 %v1033_v47  ;;  %v1078_v46 = vunpack.c.l.s8.bf16 %v726_v41  ;;  %v723_v47 = vld [vmem:[%s3746_s26 + $0x300] sm:$0xff] }
 0x1a7   : > { %1545 = vmatprep.subr.bf16.mxu0 %v1036_v48  ;;  %1873 = vmatprep.subr.bf16.mxu1 %v1038_v49  ;;  %v725_v48 = vld [vmem:[%s3746_s26 + $0x310] sm:$0xff]  ;;  %v2729_v49 = vcombine.low %v3859_v13, %v3859_v13  ;;  %v1075_v50 = vunpack.c.l.s8.bf16 %v723_v47  ;;  %v1079_v13 = vunpack.c.h.s8.bf16 %v723_v47 }
 0x1a8   : > { %v745_v47 = vld [vmem:[%s3746_s26 + $0x3b0] sm:$0xff] }
 0x1aa   : > { %1546 = vmatpush1.bf16.msra.mxu0 %v1035_v51  ;;  %1874 = vmatpush1.bf16.msra.mxu1 %v1037_v52  ;;  %v1077_v51 = vunpack.c.l.s8.bf16 %v725_v48  ;;  %v1080_v52 = vunpack.c.h.s8.bf16 %v724_v40  ;;  %v746_v40 = vld [vmem:[%s3746_s26 + $0x3b8] sm:$0xff] }
 0x1ab   : > { %1547 = vmatprep.subr.bf16.mxu0 %v1040_v53  ;;  %1875 = vmatprep.subr.bf16.mxu1 %v1042_v54  ;;  %v1082_v53 = vunpack.c.h.s8.bf16 %v726_v41  ;;  %v728_v54 = vld [vmem:[%s3746_s26 + $0x328] sm:$0xff] }
 0x1ae   : > { %1548 = vmatpush1.bf16.msra.mxu0 %v1039_v57  ;;  %1876 = vmatpush1.bf16.msra.mxu1 %v1041_v58  ;;  %v1081_v57 = vunpack.c.h.s8.bf16 %v725_v48  ;;  %v1084_v58 = vunpack.c.l.s8.bf16 %v728_v54 }
 0x1af   : > { %1549 = vmatprep.subr.bf16.mxu0 %v1044_v59  ;;  %1877 = vmatprep.subr.bf16.mxu1 %v1046_v60  ;;  %v1086_v59 = vunpack.c.l.s8.bf16 %v730_v55  ;;  %v727_v60 = vld [vmem:[%s3746_s26 + $0x320] sm:$0xff] }
 0x1b0   : > { %v1083_v62 = vunpack.c.l.s8.bf16 %v727_v60  ;;  %v1087_v4 = vunpack.c.h.s8.bf16 %v727_v60 }
 0x1b2   : > { %1550 = vmatpush1.bf16.msra.mxu0 %v1043_v63  ;;  %1878 = vmatpush1.bf16.msra.mxu1 %v1045_v0  ;;  %v1085_v63 = vunpack.c.l.s8.bf16 %v729_v61  ;;  %v1088_v0 = vunpack.c.h.s8.bf16 %v728_v54 }
 0x1b3   : > { %1551 = vmatprep.subr.bf16.mxu0 %v1048_v1  ;;  %1879 = vmatprep.subr.bf16.mxu1 %v1050_v2  ;;  %v1090_v1 = vunpack.c.h.s8.bf16 %v730_v55  ;;  %v732_v2 = vld [vmem:[%s3746_s26 + $0x348] sm:$0xff]  ;;  %v1121_v55 = vunpack.c.h.s8.bf16 %v745_v47 }
 0x1b6   : > { %1552 = vmatpush1.bf16.msra.mxu0 %v1047_v5  ;;  %1880 = vmatpush1.bf16.msra.mxu1 %v1049_v6  ;;  %v1089_v5 = vunpack.c.h.s8.bf16 %v729_v61  ;;  %v1092_v6 = vunpack.c.l.s8.bf16 %v732_v2 }
 0x1b7   : > { %1553 = vmatprep.subr.bf16.mxu0 %v1052_v7  ;;  %1881 = vmatprep.subr.bf16.mxu1 %v1054_v8  ;;  %v1094_v7 = vunpack.c.l.s8.bf16 %v734_v3  ;;  %v731_v8 = vld [vmem:[%s3746_s26 + $0x340] sm:$0xff] }
 0x1b8   : > { %v1091_v10 = vunpack.c.l.s8.bf16 %v731_v8  ;;  %v1095_v17 = vunpack.c.h.s8.bf16 %v731_v8 }
 0x1ba   : > { %1554 = vmatpush1.bf16.msra.mxu0 %v1051_v11  ;;  %1882 = vmatpush1.bf16.msra.mxu1 %v1053_v12  ;;  %v1093_v11 = vunpack.c.l.s8.bf16 %v733_v9  ;;  %v1096_v12 = vunpack.c.h.s8.bf16 %v732_v2 }
 0x1bb   : > { %1555 = vmatprep.subr.bf16.mxu0 %v1056_v14  ;;  %1883 = vmatprep.subr.bf16.mxu1 %v1058_v15  ;;  %v1098_v14 = vunpack.c.h.s8.bf16 %v734_v3  ;;  %v736_v15 = vld [vmem:[%s3746_s26 + $0x368] sm:$0xff] }
 0x1be   : > { %1556 = vmatpush1.bf16.msra.mxu0 %v1055_v18  ;;  %1884 = vmatpush1.bf16.msra.mxu1 %v1057_v19  ;;  %v1097_v18 = vunpack.c.h.s8.bf16 %v733_v9  ;;  %v1100_v19 = vunpack.c.l.s8.bf16 %v736_v15 }
 0x1bf   : > { %1557 = vmatprep.subr.bf16.mxu0 %v1060_v20  ;;  %1885 = vmatprep.subr.bf16.mxu1 %v1062_v42  ;;  %v1102_v20 = vunpack.c.l.s8.bf16 %v738_v16  ;;  %v735_v42 = vld [vmem:[%s3746_s26 + $0x360] sm:$0xff] }
 0x1c0   : > { %v1099_v22 = vunpack.c.l.s8.bf16 %v735_v42  ;;  %v1103_v28 = vunpack.c.h.s8.bf16 %v735_v42  ;;  %v3937_v42 = vld [vmem:[%s3738_s9 + $0x20] sm:$0xff] }
 0x1c2   : > { %1558 = vmatpush1.bf16.msra.mxu0 %v1059_v23  ;;  %1886 = vmatpush1.bf16.msra.mxu1 %v1061_v24  ;;  %v1101_v23 = vunpack.c.l.s8.bf16 %v737_v21  ;;  %v1104_v24 = vunpack.c.h.s8.bf16 %v736_v15 }
 0x1c3   : > { %1559 = vmatprep.subr.bf16.mxu0 %v1064_v25  ;;  %1887 = vmatprep.subr.bf16.mxu1 %v1066_v26  ;;  %v1106_v25 = vunpack.c.h.s8.bf16 %v738_v16  ;;  %v740_v26 = vld [vmem:[%s3746_s26 + $0x388] sm:$0xff] }
 0x1c6   : > { %1560 = vmatpush1.bf16.msra.mxu0 %v1063_v29  ;;  %1888 = vmatpush1.bf16.msra.mxu1 %v1065_v31  ;;  %v1105_v29 = vunpack.c.h.s8.bf16 %v737_v21  ;;  %v1108_v31 = vunpack.c.l.s8.bf16 %v740_v26 }
 0x1c7   : > { %1561 = vmatprep.subr.bf16.mxu0 %v1068_v32  ;;  %1889 = vmatprep.subr.bf16.mxu1 %v1070_v33  ;;  %v1110_v32 = vunpack.c.l.s8.bf16 %v742_v27  ;;  %v739_v33 = vld [vmem:[%s3746_s26 + $0x380] sm:$0xff] }
 0x1c8   : > { %v1107_v35 = vunpack.c.l.s8.bf16 %v739_v33  ;;  %v1111_v41 = vunpack.c.h.s8.bf16 %v739_v33  ;;  %v761_v33 = vld [vmem:[%s3746_s26 + $0x430] sm:$0xff] }
 0x1ca   : > { %1562 = vmatpush1.bf16.msra.mxu0 %v1067_v36  ;;  %1890 = vmatpush1.bf16.msra.mxu1 %v1069_v37  ;;  %v1109_v36 = vunpack.c.l.s8.bf16 %v741_v34  ;;  %v1112_v37 = vunpack.c.h.s8.bf16 %v740_v26  ;;  %v762_v26 = vld [vmem:[%s3746_s26 + $0x438] sm:$0xff] }
 0x1cb   : > { %1563 = vmatprep.subr.bf16.mxu0 %v1072_v38  ;;  %1891 = vmatprep.subr.bf16.mxu1 %v1074_v39  ;;  %v1114_v38 = vunpack.c.h.s8.bf16 %v742_v27  ;;  %v744_v39 = vld [vmem:[%s3746_s26 + $0x3a8] sm:$0xff]  ;;  %v2734_v27 = vcombine.high %v3937_v42, %v3937_v42 }
 0x1ce   : > { %1564 = vmatpush1.bf16.msra.mxu0 %v1071_v43  ;;  %1892 = vmatpush1.bf16.msra.mxu1 %v1073_v44  ;;  %v1113_v43 = vunpack.c.h.s8.bf16 %v741_v34  ;;  %v1116_v44 = vunpack.c.l.s8.bf16 %v744_v39 }
 0x1cf   : > { %1574 = vmatprep.subr.bf16.mxu0 %v1076_v45  ;;  %1902 = vmatprep.subr.bf16.mxu1 %v1078_v46  ;;  %v1118_v45 = vunpack.c.l.s8.bf16 %v746_v40  ;;  %v743_v46 = vld [vmem:[%s3746_s26 + $0x3a0] sm:$0xff] }
 0x1d0   : > { %v1115_v48 = vunpack.c.l.s8.bf16 %v743_v46  ;;  %v1119_v54 = vunpack.c.h.s8.bf16 %v743_v46  ;;  %v765_v46 = vld [vmem:[%s3746_s26 + $0x450] sm:$0xff] }
 0x1d1   : > { %1566 = vmatmul.mubr.bf16.vlgmr.msra.gmra.mrb[0].mxu0 %v2729_v49  ;;  %1894 = vmatmul.mubr.bf16.vlgmr.msra.gmra.mrb[0].mxu1 %v2729_v49  ;;  %v1117_v49 = vunpack.c.l.s8.bf16 %v745_v47 }
 0x1d2   : > { %1575 = vmatpush1.bf16.msra.mxu0 %v1075_v50  ;;  %1903 = vmatpush1.bf16.msra.mxu1 %v1077_v51  ;;  %v1120_v50 = vunpack.c.h.s8.bf16 %v744_v39  ;;  %v1122_v51 = vunpack.c.h.s8.bf16 %v746_v40  ;;  %v766_v39 = vld [vmem:[%s3746_s26 + $0x458] sm:$0xff] }
 0x1d3   : > { %1576 = vmatprep.subr.bf16.mxu0 %v1080_v52  ;;  %1904 = vmatprep.subr.bf16.mxu1 %v1082_v53  ;;  %v748_v52 = vld [vmem:[%s3746_s26 + $0x3c8] sm:$0xff]  ;;  %v750_v53 = vld [vmem:[%s3746_s26 + $0x3d8] sm:$0xff] }
 0x1d4   : > { %1606 = vmatprep.mubr.bf16.mxu0 %v2732_v56  ;;  %1934 = vmatprep.mubr.bf16.mxu1 %v2732_v56  ;;  %v1124_v56 = vunpack.c.l.s8.bf16 %v748_v52  ;;  %v1128_v61 = vunpack.c.h.s8.bf16 %v748_v52  ;;  %v770_v52 = vld [vmem:[%s3746_s26 + $0x478] sm:$0xff] }
 0x1d6   : > { %1577 = vmatpush1.bf16.msra.mxu0 %v1079_v13  ;;  %1905 = vmatpush1.bf16.msra.mxu1 %v1081_v57  ;;  %v1126_v13 = vunpack.c.l.s8.bf16 %v750_v53  ;;  %v747_v57 = vld [vmem:[%s3746_s26 + $0x3c0] sm:$0xff] }
 0x1d7   : > { %1578 = vmatprep.subr.bf16.mxu0 %v1084_v58  ;;  %1906 = vmatprep.subr.bf16.mxu1 %v1086_v59  ;;  %v749_v58 = vld [vmem:[%s3746_s26 + $0x3d0] sm:$0xff]  ;;  %v1123_v59 = vunpack.c.l.s8.bf16 %v747_v57 }
 0x1d8   : > { %v1125_v60 = vunpack.c.l.s8.bf16 %v749_v58  ;;  %v1129_v2 = vunpack.c.h.s8.bf16 %v749_v58 }
 0x1da   : > { %1579 = vmatpush1.bf16.msra.mxu0 %v1083_v62  ;;  %1907 = vmatpush1.bf16.msra.mxu1 %v1085_v63  ;;  %v1130_v62 = vunpack.c.h.s8.bf16 %v750_v53  ;;  %v752_v63 = vld [vmem:[%s3746_s26 + $0x3e8] sm:$0xff] }
 0x1db   : > { %1580 = vmatprep.subr.bf16.mxu0 %v1088_v0  ;;  %1908 = vmatprep.subr.bf16.mxu1 %v1090_v1  ;;  %v754_v0 = vld [vmem:[%s3746_s26 + $0x3f8] sm:$0xff]  ;;  %v1127_v1 = vunpack.c.h.s8.bf16 %v747_v57  ;;  %v1132_v3 = vunpack.c.l.s8.bf16 %v752_v63  ;;  %v1136_v9 = vunpack.c.h.s8.bf16 %v752_v63  ;;  %v769_v57 = vld [vmem:[%s3746_s26 + $0x470] sm:$0xff] }
 0x1dc   : > { %v774_v63 = vld [vmem:[%s3746_s26 + $0x498] sm:$0xff] }
 0x1de   : > { %1581 = vmatpush1.bf16.msra.mxu0 %v1087_v4  ;;  %1909 = vmatpush1.bf16.msra.mxu1 %v1089_v5  ;;  %v1134_v4 = vunpack.c.l.s8.bf16 %v754_v0  ;;  %v751_v5 = vld [vmem:[%s3746_s26 + $0x3e0] sm:$0xff] }
 0x1df   : > { %1582 = vmatprep.subr.bf16.mxu0 %v1092_v6  ;;  %1910 = vmatprep.subr.bf16.mxu1 %v1094_v7  ;;  %v753_v6 = vld [vmem:[%s3746_s26 + $0x3f0] sm:$0xff]  ;;  %v1131_v7 = vunpack.c.l.s8.bf16 %v751_v5 }
 0x1e0   : > { %v1133_v8 = vunpack.c.l.s8.bf16 %v753_v6  ;;  %v1137_v15 = vunpack.c.h.s8.bf16 %v753_v6 }
 0x1e2   : > { %1583 = vmatpush1.bf16.msra.mxu0 %v1091_v10  ;;  %1911 = vmatpush1.bf16.msra.mxu1 %v1093_v11  ;;  %v1138_v10 = vunpack.c.h.s8.bf16 %v754_v0  ;;  %v756_v11 = vld [vmem:[%s3746_s26 + $0x408] sm:$0xff] }
 0x1e3   : > { %1584 = vmatprep.subr.bf16.mxu0 %v1096_v12  ;;  %1912 = vmatprep.subr.bf16.mxu1 %v1098_v14  ;;  %v758_v12 = vld [vmem:[%s3746_s26 + $0x418] sm:$0xff]  ;;  %v1135_v14 = vunpack.c.h.s8.bf16 %v751_v5  ;;  %v1140_v16 = vunpack.c.l.s8.bf16 %v756_v11  ;;  %v773_v5 = vld [vmem:[%s3746_s26 + $0x490] sm:$0xff] }
 0x1e6   : > { %1585 = vmatpush1.bf16.msra.mxu0 %v1095_v17  ;;  %1913 = vmatpush1.bf16.msra.mxu1 %v1097_v18  ;;  %v1142_v17 = vunpack.c.l.s8.bf16 %v758_v12  ;;  %v755_v18 = vld [vmem:[%s3746_s26 + $0x400] sm:$0xff] }
 0x1e7   : > { %1586 = vmatprep.subr.bf16.mxu0 %v1100_v19  ;;  %1914 = vmatprep.subr.bf16.mxu1 %v1102_v20  ;;  %v757_v19 = vld [vmem:[%s3746_s26 + $0x410] sm:$0xff]  ;;  %v2731_v20 = vcombine.low %v3898_v30, %v3898_v30  ;;  %v1139_v21 = vunpack.c.l.s8.bf16 %v755_v18  ;;  %v1143_v30 = vunpack.c.h.s8.bf16 %v755_v18 }
 0x1e8   : > { %v777_v18 = vld [vmem:[%s3746_s26 + $0x4b0] sm:$0xff] }
 0x1ea   : > { %1587 = vmatpush1.bf16.msra.mxu0 %v1099_v22  ;;  %1915 = vmatpush1.bf16.msra.mxu1 %v1101_v23  ;;  %v1141_v22 = vunpack.c.l.s8.bf16 %v757_v19  ;;  %v1144_v23 = vunpack.c.h.s8.bf16 %v756_v11  ;;  %v778_v11 = vld [vmem:[%s3746_s26 + $0x4b8] sm:$0xff] }
 0x1eb   : > { %1588 = vmatprep.subr.bf16.mxu0 %v1104_v24  ;;  %1916 = vmatprep.subr.bf16.mxu1 %v1106_v25  ;;  %v1146_v24 = vunpack.c.h.s8.bf16 %v758_v12  ;;  %v760_v25 = vld [vmem:[%s3746_s26 + $0x428] sm:$0xff] }
 0x1ee   : > { %1589 = vmatpush1.bf16.msra.mxu0 %v1103_v28  ;;  %1917 = vmatpush1.bf16.msra.mxu1 %v1105_v29  ;;  %v1145_v28 = vunpack.c.h.s8.bf16 %v757_v19  ;;  %v1148_v29 = vunpack.c.l.s8.bf16 %v760_v25 }
 0x1ef   : > { %1590 = vmatprep.subr.bf16.mxu0 %v1108_v31  ;;  %1918 = vmatprep.subr.bf16.mxu1 %v1110_v32  ;;  %v1150_v31 = vunpack.c.l.s8.bf16 %v762_v26  ;;  %v759_v32 = vld [vmem:[%s3746_s26 + $0x420] sm:$0xff] }
 0x1f0   : > { %v1147_v34 = vunpack.c.l.s8.bf16 %v759_v32  ;;  %v1151_v40 = vunpack.c.h.s8.bf16 %v759_v32 }
 0x1f2   : > { %1591 = vmatpush1.bf16.msra.mxu0 %v1107_v35  ;;  %1919 = vmatpush1.bf16.msra.mxu1 %v1109_v36  ;;  %v1149_v35 = vunpack.c.l.s8.bf16 %v761_v33  ;;  %v1152_v36 = vunpack.c.h.s8.bf16 %v760_v25 }
 0x1f3   : > { %1592 = vmatprep.subr.bf16.mxu0 %v1112_v37  ;;  %1920 = vmatprep.subr.bf16.mxu1 %v1114_v38  ;;  %v1154_v37 = vunpack.c.h.s8.bf16 %v762_v26  ;;  %v764_v38 = vld [vmem:[%s3746_s26 + $0x448] sm:$0xff]  ;;  %v1185_v26 = vunpack.c.h.s8.bf16 %v777_v18 }
 0x1f6   : > { %1593 = vmatpush1.bf16.msra.mxu0 %v1111_v41  ;;  %1921 = vmatpush1.bf16.msra.mxu1 %v1113_v43  ;;  %v1153_v41 = vunpack.c.h.s8.bf16 %v761_v33  ;;  %v1156_v43 = vunpack.c.l.s8.bf16 %v764_v38 }
 0x1f7   : > { %1594 = vmatprep.subr.bf16.mxu0 %v1116_v44  ;;  %1922 = vmatprep.subr.bf16.mxu1 %v1118_v45  ;;  %v1158_v44 = vunpack.c.l.s8.bf16 %v766_v39  ;;  %v763_v45 = vld [vmem:[%s3746_s26 + $0x440] sm:$0xff] }
 0x1f8   : > { %v1155_v47 = vunpack.c.l.s8.bf16 %v763_v45  ;;  %v1159_v53 = vunpack.c.h.s8.bf16 %v763_v45 }
 0x1fa   : > { %1595 = vmatpush1.bf16.msra.mxu0 %v1115_v48  ;;  %1923 = vmatpush1.bf16.msra.mxu1 %v1117_v49  ;;  %v1157_v48 = vunpack.c.l.s8.bf16 %v765_v46  ;;  %v1160_v49 = vunpack.c.h.s8.bf16 %v764_v38 }
 0x1fb   : > { %1596 = vmatprep.subr.bf16.mxu0 %v1120_v50  ;;  %1924 = vmatprep.subr.bf16.mxu1 %v1122_v51  ;;  %v1162_v50 = vunpack.c.h.s8.bf16 %v766_v39  ;;  %v768_v51 = vld [vmem:[%s3746_s26 + $0x468] sm:$0xff] }
 0x1fe   : > { %1597 = vmatpush1.bf16.msra.mxu0 %v1119_v54  ;;  %1925 = vmatpush1.bf16.msra.mxu1 %v1121_v55  ;;  %v1161_v54 = vunpack.c.h.s8.bf16 %v765_v46  ;;  %v1164_v55 = vunpack.c.l.s8.bf16 %v768_v51 }
 0x1ff   : > { %1598 = vmatprep.subr.bf16.mxu0 %v1124_v56  ;;  %1926 = vmatprep.subr.bf16.mxu1 %v1126_v13  ;;  %v1166_v56 = vunpack.c.l.s8.bf16 %v770_v52  ;;  %v767_v13 = vld [vmem:[%s3746_s26 + $0x460] sm:$0xff] }
 0x200   : > { %v1163_v58 = vunpack.c.l.s8.bf16 %v767_v13  ;;  %v1167_v0 = vunpack.c.h.s8.bf16 %v767_v13  ;;  %v3976_v13 = vld [vmem:[%s3738_s9 + $0x28] sm:$0xff] }
 0x202   : > { %1599 = vmatpush1.bf16.msra.mxu0 %v1123_v59  ;;  %1927 = vmatpush1.bf16.msra.mxu1 %v1125_v60  ;;  %v1165_v59 = vunpack.c.l.s8.bf16 %v769_v57  ;;  %v1168_v60 = vunpack.c.h.s8.bf16 %v768_v51 }
 0x203   : > { %1600 = vmatprep.subr.bf16.mxu0 %v1128_v61  ;;  %1928 = vmatprep.subr.bf16.mxu1 %v1130_v62  ;;  %v1170_v61 = vunpack.c.h.s8.bf16 %v770_v52  ;;  %v772_v62 = vld [vmem:[%s3746_s26 + $0x488] sm:$0xff] }
 0x206   : > { %1601 = vmatpush1.bf16.msra.mxu0 %v1127_v1  ;;  %1929 = vmatpush1.bf16.msra.mxu1 %v1129_v2  ;;  %v1169_v1 = vunpack.c.h.s8.bf16 %v769_v57  ;;  %v1172_v2 = vunpack.c.l.s8.bf16 %v772_v62 }
 0x207   : > { %1602 = vmatprep.subr.bf16.mxu0 %v1132_v3  ;;  %1930 = vmatprep.subr.bf16.mxu1 %v1134_v4  ;;  %v1174_v3 = vunpack.c.l.s8.bf16 %v774_v63  ;;  %v771_v4 = vld [vmem:[%s3746_s26 + $0x480] sm:$0xff] }
 0x208   : > { %v1171_v6 = vunpack.c.l.s8.bf16 %v771_v4  ;;  %v1175_v12 = vunpack.c.h.s8.bf16 %v771_v4  ;;  %v793_v4 = vld [vmem:[%s3746_s26 + $0x530] sm:$0xff] }
 0x20a   : > { %1603 = vmatpush1.bf16.msra.mxu0 %v1131_v7  ;;  %1931 = vmatpush1.bf16.msra.mxu1 %v1133_v8  ;;  %v1173_v7 = vunpack.c.l.s8.bf16 %v773_v5  ;;  %v1176_v8 = vunpack.c.h.s8.bf16 %v772_v62  ;;  %v794_v62 = vld [vmem:[%s3746_s26 + $0x538] sm:$0xff] }
 0x20b   : > { %1604 = vmatprep.subr.bf16.mxu0 %v1136_v9  ;;  %1932 = vmatprep.subr.bf16.mxu1 %v1138_v10  ;;  %v1178_v9 = vunpack.c.h.s8.bf16 %v774_v63  ;;  %v776_v10 = vld [vmem:[%s3746_s26 + $0x4a8] sm:$0xff]  ;;  %v2736_v63 = vcombine.high %v3976_v13, %v3976_v13 }
 0x20e   : > { %1605 = vmatpush1.bf16.msra.mxu0 %v1135_v14  ;;  %1933 = vmatpush1.bf16.msra.mxu1 %v1137_v15  ;;  %v1177_v14 = vunpack.c.h.s8.bf16 %v773_v5  ;;  %v1180_v15 = vunpack.c.l.s8.bf16 %v776_v10 }
 0x20f   : > { %1615 = vmatprep.subr.bf16.mxu0 %v1140_v16  ;;  %1943 = vmatprep.subr.bf16.mxu1 %v1142_v17  ;;  %v1182_v16 = vunpack.c.l.s8.bf16 %v778_v11  ;;  %v775_v17 = vld [vmem:[%s3746_s26 + $0x4a0] sm:$0xff] }
 0x210   : > { %v1179_v19 = vunpack.c.l.s8.bf16 %v775_v17  ;;  %v1183_v25 = vunpack.c.h.s8.bf16 %v775_v17  ;;  %v797_v17 = vld [vmem:[%s3746_s26 + $0x550] sm:$0xff] }
 0x211   : > { %1607 = vmatmul.mubr.bf16.vlgmr.msra.gmra.mrb[0].mxu0 %v2731_v20  ;;  %1935 = vmatmul.mubr.bf16.vlgmr.msra.gmra.mrb[0].mxu1 %v2731_v20  ;;  %v1181_v20 = vunpack.c.l.s8.bf16 %v777_v18 }
 0x212   : > { %1616 = vmatpush1.bf16.msra.mxu0 %v1139_v21  ;;  %1944 = vmatpush1.bf16.msra.mxu1 %v1141_v22  ;;  %v1184_v21 = vunpack.c.h.s8.bf16 %v776_v10  ;;  %v1186_v22 = vunpack.c.h.s8.bf16 %v778_v11  ;;  %v798_v10 = vld [vmem:[%s3746_s26 + $0x558] sm:$0xff] }
 0x213   : > { %1617 = vmatprep.subr.bf16.mxu0 %v1144_v23  ;;  %1945 = vmatprep.subr.bf16.mxu1 %v1146_v24  ;;  %v780_v23 = vld [vmem:[%s3746_s26 + $0x4c8] sm:$0xff]  ;;  %v782_v24 = vld [vmem:[%s3746_s26 + $0x4d8] sm:$0xff] }
 0x214   : > { %1647 = vmatprep.mubr.bf16.mxu0 %v2734_v27  ;;  %1975 = vmatprep.mubr.bf16.mxu1 %v2734_v27  ;;  %v1188_v27 = vunpack.c.l.s8.bf16 %v780_v23  ;;  %v1192_v33 = vunpack.c.h.s8.bf16 %v780_v23  ;;  %v802_v23 = vld [vmem:[%s3746_s26 + $0x578] sm:$0xff] }
 0x216   : > { %1618 = vmatpush1.bf16.msra.mxu0 %v1143_v30  ;;  %1946 = vmatpush1.bf16.msra.mxu1 %v1145_v28  ;;  %v1190_v30 = vunpack.c.l.s8.bf16 %v782_v24  ;;  %v779_v28 = vld [vmem:[%s3746_s26 + $0x4c0] sm:$0xff] }
 0x217   : > { %1619 = vmatprep.subr.bf16.mxu0 %v1148_v29  ;;  %1947 = vmatprep.subr.bf16.mxu1 %v1150_v31  ;;  %v781_v29 = vld [vmem:[%s3746_s26 + $0x4d0] sm:$0xff]  ;;  %v1187_v31 = vunpack.c.l.s8.bf16 %v779_v28 }
 0x218   : > { %v1189_v32 = vunpack.c.l.s8.bf16 %v781_v29  ;;  %v1193_v38 = vunpack.c.h.s8.bf16 %v781_v29 }
 0x21a   : > { %1620 = vmatpush1.bf16.msra.mxu0 %v1147_v34  ;;  %1948 = vmatpush1.bf16.msra.mxu1 %v1149_v35  ;;  %v1194_v34 = vunpack.c.h.s8.bf16 %v782_v24  ;;  %v784_v35 = vld [vmem:[%s3746_s26 + $0x4e8] sm:$0xff] }
 0x21b   : > { %1621 = vmatprep.subr.bf16.mxu0 %v1152_v36  ;;  %1949 = vmatprep.subr.bf16.mxu1 %v1154_v37  ;;  %v786_v36 = vld [vmem:[%s3746_s26 + $0x4f8] sm:$0xff]  ;;  %v1191_v37 = vunpack.c.h.s8.bf16 %v779_v28  ;;  %v1196_v39 = vunpack.c.l.s8.bf16 %v784_v35  ;;  %v1200_v46 = vunpack.c.h.s8.bf16 %v784_v35  ;;  %v801_v28 = vld [vmem:[%s3746_s26 + $0x570] sm:$0xff] }
 0x21c   : > { %v806_v35 = vld [vmem:[%s3746_s26 + $0x598] sm:$0xff] }
 0x21e   : > { %1622 = vmatpush1.bf16.msra.mxu0 %v1151_v40  ;;  %1950 = vmatpush1.bf16.msra.mxu1 %v1153_v41  ;;  %v1198_v40 = vunpack.c.l.s8.bf16 %v786_v36  ;;  %v783_v41 = vld [vmem:[%s3746_s26 + $0x4e0] sm:$0xff] }
 0x21f   : > { %1623 = vmatprep.subr.bf16.mxu0 %v1156_v43  ;;  %1951 = vmatprep.subr.bf16.mxu1 %v1158_v44  ;;  %v785_v43 = vld [vmem:[%s3746_s26 + $0x4f0] sm:$0xff]  ;;  %v1195_v44 = vunpack.c.l.s8.bf16 %v783_v41 }
 0x220   : > { %v1197_v45 = vunpack.c.l.s8.bf16 %v785_v43  ;;  %v1201_v51 = vunpack.c.h.s8.bf16 %v785_v43 }
 0x222   : > { %1624 = vmatpush1.bf16.msra.mxu0 %v1155_v47  ;;  %1952 = vmatpush1.bf16.msra.mxu1 %v1157_v48  ;;  %v1202_v47 = vunpack.c.h.s8.bf16 %v786_v36  ;;  %v788_v48 = vld [vmem:[%s3746_s26 + $0x508] sm:$0xff] }
 0x223   : > { %1625 = vmatprep.subr.bf16.mxu0 %v1160_v49  ;;  %1953 = vmatprep.subr.bf16.mxu1 %v1162_v50  ;;  %v790_v49 = vld [vmem:[%s3746_s26 + $0x518] sm:$0xff]  ;;  %v1199_v50 = vunpack.c.h.s8.bf16 %v783_v41  ;;  %v1204_v52 = vunpack.c.l.s8.bf16 %v788_v48  ;;  %v805_v41 = vld [vmem:[%s3746_s26 + $0x590] sm:$0xff] }
 0x226   : > { %1626 = vmatpush1.bf16.msra.mxu0 %v1159_v53  ;;  %1954 = vmatpush1.bf16.msra.mxu1 %v1161_v54  ;;  %v1206_v53 = vunpack.c.l.s8.bf16 %v790_v49  ;;  %v787_v54 = vld [vmem:[%s3746_s26 + $0x500] sm:$0xff] }
 0x227   : > { %1627 = vmatprep.subr.bf16.mxu0 %v1164_v55  ;;  %1955 = vmatprep.subr.bf16.mxu1 %v1166_v56  ;;  %v789_v55 = vld [vmem:[%s3746_s26 + $0x510] sm:$0xff]  ;;  %v2733_v56 = vcombine.low %v3937_v42, %v3937_v42  ;;  %v1203_v57 = vunpack.c.l.s8.bf16 %v787_v54  ;;  %v1207_v42 = vunpack.c.h.s8.bf16 %v787_v54 }
 0x228   : > { %v809_v54 = vld [vmem:[%s3746_s26 + $0x5b0] sm:$0xff] }
 0x22a   : > { %1628 = vmatpush1.bf16.msra.mxu0 %v1163_v58  ;;  %1956 = vmatpush1.bf16.msra.mxu1 %v1165_v59  ;;  %v1205_v58 = vunpack.c.l.s8.bf16 %v789_v55  ;;  %v1208_v59 = vunpack.c.h.s8.bf16 %v788_v48  ;;  %v810_v48 = vld [vmem:[%s3746_s26 + $0x5b8] sm:$0xff] }
 0x22b   : > { %1629 = vmatprep.subr.bf16.mxu0 %v1168_v60  ;;  %1957 = vmatprep.subr.bf16.mxu1 %v1170_v61  ;;  %v1210_v60 = vunpack.c.h.s8.bf16 %v790_v49  ;;  %v792_v61 = vld [vmem:[%s3746_s26 + $0x528] sm:$0xff] }
 0x22e   : > { %1630 = vmatpush1.bf16.msra.mxu0 %v1167_v0  ;;  %1958 = vmatpush1.bf16.msra.mxu1 %v1169_v1  ;;  %v1209_v0 = vunpack.c.h.s8.bf16 %v789_v55  ;;  %v1212_v1 = vunpack.c.l.s8.bf16 %v792_v61 }
 0x22f   : > { %1631 = vmatprep.subr.bf16.mxu0 %v1172_v2  ;;  %1959 = vmatprep.subr.bf16.mxu1 %v1174_v3  ;;  %v1214_v2 = vunpack.c.l.s8.bf16 %v794_v62  ;;  %v791_v3 = vld [vmem:[%s3746_s26 + $0x520] sm:$0xff] }
 0x230   : > { %v1211_v5 = vunpack.c.l.s8.bf16 %v791_v3  ;;  %v1215_v11 = vunpack.c.h.s8.bf16 %v791_v3 }
 0x232   : > { %1632 = vmatpush1.bf16.msra.mxu0 %v1171_v6  ;;  %1960 = vmatpush1.bf16.msra.mxu1 %v1173_v7  ;;  %v1213_v6 = vunpack.c.l.s8.bf16 %v793_v4  ;;  %v1216_v7 = vunpack.c.h.s8.bf16 %v792_v61 }
 0x233   : > { %1633 = vmatprep.subr.bf16.mxu0 %v1176_v8  ;;  %1961 = vmatprep.subr.bf16.mxu1 %v1178_v9  ;;  %v1218_v8 = vunpack.c.h.s8.bf16 %v794_v62  ;;  %v796_v9 = vld [vmem:[%s3746_s26 + $0x548] sm:$0xff]  ;;  %v1249_v62 = vunpack.c.h.s8.bf16 %v809_v54 }
 0x236   : > { %1634 = vmatpush1.bf16.msra.mxu0 %v1175_v12  ;;  %1962 = vmatpush1.bf16.msra.mxu1 %v1177_v14  ;;  %v1217_v12 = vunpack.c.h.s8.bf16 %v793_v4  ;;  %v1220_v14 = vunpack.c.l.s8.bf16 %v796_v9 }
 0x237   : > { %1635 = vmatprep.subr.bf16.mxu0 %v1180_v15  ;;  %1963 = vmatprep.subr.bf16.mxu1 %v1182_v16  ;;  %v1222_v15 = vunpack.c.l.s8.bf16 %v798_v10  ;;  %v795_v16 = vld [vmem:[%s3746_s26 + $0x540] sm:$0xff] }
 0x238   : > { %v1219_v18 = vunpack.c.l.s8.bf16 %v795_v16  ;;  %v1223_v24 = vunpack.c.h.s8.bf16 %v795_v16 }
 0x23a   : > { %1636 = vmatpush1.bf16.msra.mxu0 %v1179_v19  ;;  %1964 = vmatpush1.bf16.msra.mxu1 %v1181_v20  ;;  %v1221_v19 = vunpack.c.l.s8.bf16 %v797_v17  ;;  %v1224_v20 = vunpack.c.h.s8.bf16 %v796_v9 }
 0x23b   : > { %1637 = vmatprep.subr.bf16.mxu0 %v1184_v21  ;;  %1965 = vmatprep.subr.bf16.mxu1 %v1186_v22  ;;  %v1226_v21 = vunpack.c.h.s8.bf16 %v798_v10  ;;  %v800_v22 = vld [vmem:[%s3746_s26 + $0x568] sm:$0xff] }
 0x23e   : > { %1638 = vmatpush1.bf16.msra.mxu0 %v1183_v25  ;;  %1966 = vmatpush1.bf16.msra.mxu1 %v1185_v26  ;;  %v1225_v25 = vunpack.c.h.s8.bf16 %v797_v17  ;;  %v1228_v26 = vunpack.c.l.s8.bf16 %v800_v22 }
 0x23f   : > { %1639 = vmatprep.subr.bf16.mxu0 %v1188_v27  ;;  %1967 = vmatprep.subr.bf16.mxu1 %v1190_v30  ;;  %v1230_v27 = vunpack.c.l.s8.bf16 %v802_v23  ;;  %v799_v30 = vld [vmem:[%s3746_s26 + $0x560] sm:$0xff] }
 0x240   : > { %v1227_v29 = vunpack.c.l.s8.bf16 %v799_v30  ;;  %v1231_v36 = vunpack.c.h.s8.bf16 %v799_v30  ;;  %v4015_v30 = vld [vmem:[%s3738_s9 + $0x30] sm:$0xff] }
 0x242   : > { %1640 = vmatpush1.bf16.msra.mxu0 %v1187_v31  ;;  %1968 = vmatpush1.bf16.msra.mxu1 %v1189_v32  ;;  %v1229_v31 = vunpack.c.l.s8.bf16 %v801_v28  ;;  %v1232_v32 = vunpack.c.h.s8.bf16 %v800_v22 }
 0x243   : > { %1641 = vmatprep.subr.bf16.mxu0 %v1192_v33  ;;  %1969 = vmatprep.subr.bf16.mxu1 %v1194_v34  ;;  %v1234_v33 = vunpack.c.h.s8.bf16 %v802_v23  ;;  %v804_v34 = vld [vmem:[%s3746_s26 + $0x588] sm:$0xff] }
 0x246   : > { %1642 = vmatpush1.bf16.msra.mxu0 %v1191_v37  ;;  %1970 = vmatpush1.bf16.msra.mxu1 %v1193_v38  ;;  %v1233_v37 = vunpack.c.h.s8.bf16 %v801_v28  ;;  %v1236_v38 = vunpack.c.l.s8.bf16 %v804_v34 }
 0x247   : > { %1643 = vmatprep.subr.bf16.mxu0 %v1196_v39  ;;  %1971 = vmatprep.subr.bf16.mxu1 %v1198_v40  ;;  %v1238_v39 = vunpack.c.l.s8.bf16 %v806_v35  ;;  %v803_v40 = vld [vmem:[%s3746_s26 + $0x580] sm:$0xff] }
 0x248   : > { %v1235_v43 = vunpack.c.l.s8.bf16 %v803_v40  ;;  %v1239_v49 = vunpack.c.h.s8.bf16 %v803_v40  ;;  %v825_v40 = vld [vmem:[%s3746_s26 + $0x630] sm:$0xff] }
 0x24a   : > { %1644 = vmatpush1.bf16.msra.mxu0 %v1195_v44  ;;  %1972 = vmatpush1.bf16.msra.mxu1 %v1197_v45  ;;  %v1237_v44 = vunpack.c.l.s8.bf16 %v805_v41  ;;  %v1240_v45 = vunpack.c.h.s8.bf16 %v804_v34  ;;  %v826_v34 = vld [vmem:[%s3746_s26 + $0x638] sm:$0xff] }
 0x24b   : > { %1645 = vmatprep.subr.bf16.mxu0 %v1200_v46  ;;  %1973 = vmatprep.subr.bf16.mxu1 %v1202_v47  ;;  %v1242_v46 = vunpack.c.h.s8.bf16 %v806_v35  ;;  %v808_v47 = vld [vmem:[%s3746_s26 + $0x5a8] sm:$0xff]  ;;  %v2738_v35 = vcombine.high %v4015_v30, %v4015_v30 }
 0x24e   : > { %1646 = vmatpush1.bf16.msra.mxu0 %v1199_v50  ;;  %1974 = vmatpush1.bf16.msra.mxu1 %v1201_v51  ;;  %v1241_v50 = vunpack.c.h.s8.bf16 %v805_v41  ;;  %v1244_v51 = vunpack.c.l.s8.bf16 %v808_v47 }
 0x24f   : > { %1656 = vmatprep.subr.bf16.mxu0 %v1204_v52  ;;  %1984 = vmatprep.subr.bf16.mxu1 %v1206_v53  ;;  %v1246_v52 = vunpack.c.l.s8.bf16 %v810_v48  ;;  %v807_v53 = vld [vmem:[%s3746_s26 + $0x5a0] sm:$0xff] }
 0x250   : > { %v1243_v55 = vunpack.c.l.s8.bf16 %v807_v53  ;;  %v1247_v61 = vunpack.c.h.s8.bf16 %v807_v53  ;;  %v829_v53 = vld [vmem:[%s3746_s26 + $0x650] sm:$0xff] }
 0x251   : > { %1648 = vmatmul.mubr.bf16.vlgmr.msra.gmra.mrb[0].mxu0 %v2733_v56  ;;  %1976 = vmatmul.mubr.bf16.vlgmr.msra.gmra.mrb[0].mxu1 %v2733_v56  ;;  %v1245_v56 = vunpack.c.l.s8.bf16 %v809_v54 }
 0x252   : > { %1657 = vmatpush1.bf16.msra.mxu0 %v1203_v57  ;;  %1985 = vmatpush1.bf16.msra.mxu1 %v1205_v58  ;;  %v1248_v57 = vunpack.c.h.s8.bf16 %v808_v47  ;;  %v1250_v58 = vunpack.c.h.s8.bf16 %v810_v48  ;;  %v830_v47 = vld [vmem:[%s3746_s26 + $0x658] sm:$0xff] }
 0x253   : > { %1658 = vmatprep.subr.bf16.mxu0 %v1208_v59  ;;  %1986 = vmatprep.subr.bf16.mxu1 %v1210_v60  ;;  %v812_v59 = vld [vmem:[%s3746_s26 + $0x5c8] sm:$0xff]  ;;  %v814_v60 = vld [vmem:[%s3746_s26 + $0x5d8] sm:$0xff] }
 0x254   : > { %1688 = vmatprep.mubr.bf16.mxu0 %v2736_v63  ;;  %2016 = vmatprep.mubr.bf16.mxu1 %v2736_v63  ;;  %v1252_v63 = vunpack.c.l.s8.bf16 %v812_v59  ;;  %v1256_v4 = vunpack.c.h.s8.bf16 %v812_v59  ;;  %v834_v59 = vld [vmem:[%s3746_s26 + $0x678] sm:$0xff] }
 0x256   : > { %1659 = vmatpush1.bf16.msra.mxu0 %v1207_v42  ;;  %1987 = vmatpush1.bf16.msra.mxu1 %v1209_v0  ;;  %v1254_v42 = vunpack.c.l.s8.bf16 %v814_v60  ;;  %v811_v0 = vld [vmem:[%s3746_s26 + $0x5c0] sm:$0xff] }
 0x257   : > { %1660 = vmatprep.subr.bf16.mxu0 %v1212_v1  ;;  %1988 = vmatprep.subr.bf16.mxu1 %v1214_v2  ;;  %v813_v1 = vld [vmem:[%s3746_s26 + $0x5d0] sm:$0xff]  ;;  %v1251_v2 = vunpack.c.l.s8.bf16 %v811_v0 }
 0x258   : > { %v1253_v3 = vunpack.c.l.s8.bf16 %v813_v1  ;;  %v1257_v9 = vunpack.c.h.s8.bf16 %v813_v1 }
 0x25a   : > { %1661 = vmatpush1.bf16.msra.mxu0 %v1211_v5  ;;  %1989 = vmatpush1.bf16.msra.mxu1 %v1213_v6  ;;  %v1258_v5 = vunpack.c.h.s8.bf16 %v814_v60  ;;  %v816_v6 = vld [vmem:[%s3746_s26 + $0x5e8] sm:$0xff] }
 0x25b   : > { %1662 = vmatprep.subr.bf16.mxu0 %v1216_v7  ;;  %1990 = vmatprep.subr.bf16.mxu1 %v1218_v8  ;;  %v818_v7 = vld [vmem:[%s3746_s26 + $0x5f8] sm:$0xff]  ;;  %v1255_v8 = vunpack.c.h.s8.bf16 %v811_v0  ;;  %v1260_v10 = vunpack.c.l.s8.bf16 %v816_v6  ;;  %v1264_v17 = vunpack.c.h.s8.bf16 %v816_v6  ;;  %v833_v0 = vld [vmem:[%s3746_s26 + $0x670] sm:$0xff] }
 0x25c   : > { %v838_v6 = vld [vmem:[%s3746_s26 + $0x698] sm:$0xff] }
 0x25e   : > { %1663 = vmatpush1.bf16.msra.mxu0 %v1215_v11  ;;  %1991 = vmatpush1.bf16.msra.mxu1 %v1217_v12  ;;  %v1262_v11 = vunpack.c.l.s8.bf16 %v818_v7  ;;  %v815_v12 = vld [vmem:[%s3746_s26 + $0x5e0] sm:$0xff] }
 0x25f   : > { %1664 = vmatprep.subr.bf16.mxu0 %v1220_v14  ;;  %1992 = vmatprep.subr.bf16.mxu1 %v1222_v15  ;;  %v817_v14 = vld [vmem:[%s3746_s26 + $0x5f0] sm:$0xff]  ;;  %v1259_v15 = vunpack.c.l.s8.bf16 %v815_v12 }
 0x260   : > { %v1261_v16 = vunpack.c.l.s8.bf16 %v817_v14  ;;  %v1265_v22 = vunpack.c.h.s8.bf16 %v817_v14 }
 0x262   : > { %1665 = vmatpush1.bf16.msra.mxu0 %v1219_v18  ;;  %1993 = vmatpush1.bf16.msra.mxu1 %v1221_v19  ;;  %v1266_v18 = vunpack.c.h.s8.bf16 %v818_v7  ;;  %v820_v19 = vld [vmem:[%s3746_s26 + $0x608] sm:$0xff] }
 0x263   : > { %1666 = vmatprep.subr.bf16.mxu0 %v1224_v20  ;;  %1994 = vmatprep.subr.bf16.mxu1 %v1226_v21  ;;  %v822_v20 = vld [vmem:[%s3746_s26 + $0x618] sm:$0xff]  ;;  %v1263_v21 = vunpack.c.h.s8.bf16 %v815_v12  ;;  %v1268_v23 = vunpack.c.l.s8.bf16 %v820_v19  ;;  %v837_v12 = vld [vmem:[%s3746_s26 + $0x690] sm:$0xff] }
 0x266   : > { %1667 = vmatpush1.bf16.msra.mxu0 %v1223_v24  ;;  %1995 = vmatpush1.bf16.msra.mxu1 %v1225_v25  ;;  %v1270_v24 = vunpack.c.l.s8.bf16 %v822_v20  ;;  %v819_v25 = vld [vmem:[%s3746_s26 + $0x600] sm:$0xff] }
 0x267   : > { %1668 = vmatprep.subr.bf16.mxu0 %v1228_v26  ;;  %1996 = vmatprep.subr.bf16.mxu1 %v1230_v27  ;;  %v821_v26 = vld [vmem:[%s3746_s26 + $0x610] sm:$0xff]  ;;  %v2735_v27 = vcombine.low %v3976_v13, %v3976_v13  ;;  %v1267_v28 = vunpack.c.l.s8.bf16 %v819_v25  ;;  %v1271_v13 = vunpack.c.h.s8.bf16 %v819_v25 }
 0x268   : > { %v841_v25 = vld [vmem:[%s3746_s26 + $0x6b0] sm:$0xff] }
 0x26a   : > { %1669 = vmatpush1.bf16.msra.mxu0 %v1227_v29  ;;  %1997 = vmatpush1.bf16.msra.mxu1 %v1229_v31  ;;  %v1269_v29 = vunpack.c.l.s8.bf16 %v821_v26  ;;  %v1272_v31 = vunpack.c.h.s8.bf16 %v820_v19  ;;  %v842_v19 = vld [vmem:[%s3746_s26 + $0x6b8] sm:$0xff] }
 0x26b   : > { %1670 = vmatprep.subr.bf16.mxu0 %v1232_v32  ;;  %1998 = vmatprep.subr.bf16.mxu1 %v1234_v33  ;;  %v1274_v32 = vunpack.c.h.s8.bf16 %v822_v20  ;;  %v824_v33 = vld [vmem:[%s3746_s26 + $0x628] sm:$0xff] }
 0x26e   : > { %1671 = vmatpush1.bf16.msra.mxu0 %v1231_v36  ;;  %1999 = vmatpush1.bf16.msra.mxu1 %v1233_v37  ;;  %v1273_v36 = vunpack.c.h.s8.bf16 %v821_v26  ;;  %v1276_v37 = vunpack.c.l.s8.bf16 %v824_v33 }
 0x26f   : > { %1672 = vmatprep.subr.bf16.mxu0 %v1236_v38  ;;  %2000 = vmatprep.subr.bf16.mxu1 %v1238_v39  ;;  %v1278_v38 = vunpack.c.l.s8.bf16 %v826_v34  ;;  %v823_v39 = vld [vmem:[%s3746_s26 + $0x620] sm:$0xff] }
 0x270   : > { %v1275_v41 = vunpack.c.l.s8.bf16 %v823_v39  ;;  %v1279_v48 = vunpack.c.h.s8.bf16 %v823_v39 }
 0x272   : > { %1673 = vmatpush1.bf16.msra.mxu0 %v1235_v43  ;;  %2001 = vmatpush1.bf16.msra.mxu1 %v1237_v44  ;;  %v1277_v43 = vunpack.c.l.s8.bf16 %v825_v40  ;;  %v1280_v44 = vunpack.c.h.s8.bf16 %v824_v33 }
 0x273   : > { %1674 = vmatprep.subr.bf16.mxu0 %v1240_v45  ;;  %2002 = vmatprep.subr.bf16.mxu1 %v1242_v46  ;;  %v1282_v45 = vunpack.c.h.s8.bf16 %v826_v34  ;;  %v828_v46 = vld [vmem:[%s3746_s26 + $0x648] sm:$0xff]  ;;  %v1313_v34 = vunpack.c.h.s8.bf16 %v841_v25 }
 0x276   : > { %1675 = vmatpush1.bf16.msra.mxu0 %v1239_v49  ;;  %2003 = vmatpush1.bf16.msra.mxu1 %v1241_v50  ;;  %v1281_v49 = vunpack.c.h.s8.bf16 %v825_v40  ;;  %v1284_v50 = vunpack.c.l.s8.bf16 %v828_v46 }
 0x277   : > { %1676 = vmatprep.subr.bf16.mxu0 %v1244_v51  ;;  %2004 = vmatprep.subr.bf16.mxu1 %v1246_v52  ;;  %v1286_v51 = vunpack.c.l.s8.bf16 %v830_v47  ;;  %v827_v52 = vld [vmem:[%s3746_s26 + $0x640] sm:$0xff] }
 0x278   : > { %v1283_v54 = vunpack.c.l.s8.bf16 %v827_v52  ;;  %v1287_v60 = vunpack.c.h.s8.bf16 %v827_v52 }
 0x27a   : > { %1677 = vmatpush1.bf16.msra.mxu0 %v1243_v55  ;;  %2005 = vmatpush1.bf16.msra.mxu1 %v1245_v56  ;;  %v1285_v55 = vunpack.c.l.s8.bf16 %v829_v53  ;;  %v1288_v56 = vunpack.c.h.s8.bf16 %v828_v46 }
 0x27b   : > { %1678 = vmatprep.subr.bf16.mxu0 %v1248_v57  ;;  %2006 = vmatprep.subr.bf16.mxu1 %v1250_v58  ;;  %v1290_v57 = vunpack.c.h.s8.bf16 %v830_v47  ;;  %v832_v58 = vld [vmem:[%s3746_s26 + $0x668] sm:$0xff] }
 0x27e   : > { %1679 = vmatpush1.bf16.msra.mxu0 %v1247_v61  ;;  %2007 = vmatpush1.bf16.msra.mxu1 %v1249_v62  ;;  %v1289_v61 = vunpack.c.h.s8.bf16 %v829_v53  ;;  %v1292_v62 = vunpack.c.l.s8.bf16 %v832_v58 }
 0x27f   : > { %1680 = vmatprep.subr.bf16.mxu0 %v1252_v63  ;;  %2008 = vmatprep.subr.bf16.mxu1 %v1254_v42  ;;  %v1294_v63 = vunpack.c.l.s8.bf16 %v834_v59  ;;  %v831_v42 = vld [vmem:[%s3746_s26 + $0x660] sm:$0xff] }
 0x280   : > { %v1291_v1 = vunpack.c.l.s8.bf16 %v831_v42  ;;  %v1295_v7 = vunpack.c.h.s8.bf16 %v831_v42  ;;  %v4054_v42 = vld [vmem:[%s3738_s9 + $0x38] sm:$0xff]  ;;  %s617_s9 = scalar_lea.vmem %s4172_s7, %s2766_s5 }
 0x282   : > { %1681 = vmatpush1.bf16.msra.mxu0 %v1251_v2  ;;  %2009 = vmatpush1.bf16.msra.mxu1 %v1253_v3  ;;  %v1293_v2 = vunpack.c.l.s8.bf16 %v833_v0  ;;  %v1296_v3 = vunpack.c.h.s8.bf16 %v832_v58 }
 0x283   : > { %1682 = vmatprep.subr.bf16.mxu0 %v1256_v4  ;;  %2010 = vmatprep.subr.bf16.mxu1 %v1258_v5  ;;  %v1298_v4 = vunpack.c.h.s8.bf16 %v834_v59  ;;  %v836_v5 = vld [vmem:[%s3746_s26 + $0x688] sm:$0xff] }
 0x286   : > { %1683 = vmatpush1.bf16.msra.mxu0 %v1255_v8  ;;  %2011 = vmatpush1.bf16.msra.mxu1 %v1257_v9  ;;  %v1297_v8 = vunpack.c.h.s8.bf16 %v833_v0  ;;  %v1300_v9 = vunpack.c.l.s8.bf16 %v836_v5 }
 0x287   : > { %1684 = vmatprep.subr.bf16.mxu0 %v1260_v10  ;;  %2012 = vmatprep.subr.bf16.mxu1 %v1262_v11  ;;  %v1302_v10 = vunpack.c.l.s8.bf16 %v838_v6  ;;  %v835_v11 = vld [vmem:[%s3746_s26 + $0x680] sm:$0xff] }
 0x288   : > { %v1299_v14 = vunpack.c.l.s8.bf16 %v835_v11  ;;  %v1303_v20 = vunpack.c.h.s8.bf16 %v835_v11  ;;  %v857_v11 = vld [vmem:[%s3746_s26 + $0x730] sm:$0xff] }
 0x28a   : > { %1685 = vmatpush1.bf16.msra.mxu0 %v1259_v15  ;;  %2013 = vmatpush1.bf16.msra.mxu1 %v1261_v16  ;;  %v1301_v15 = vunpack.c.l.s8.bf16 %v837_v12  ;;  %v1304_v16 = vunpack.c.h.s8.bf16 %v836_v5  ;;  %v858_v5 = vld [vmem:[%s3746_s26 + $0x738] sm:$0xff] }
 0x28b   : > { %1686 = vmatprep.subr.bf16.mxu0 %v1264_v17  ;;  %2014 = vmatprep.subr.bf16.mxu1 %v1266_v18  ;;  %v1306_v17 = vunpack.c.h.s8.bf16 %v838_v6  ;;  %v840_v18 = vld [vmem:[%s3746_s26 + $0x6a8] sm:$0xff]  ;;  %v2740_v6 = vcombine.high %v4054_v42, %v4054_v42 }
 0x28e   : > { %1687 = vmatpush1.bf16.msra.mxu0 %v1263_v21  ;;  %2015 = vmatpush1.bf16.msra.mxu1 %v1265_v22  ;;  %v1305_v21 = vunpack.c.h.s8.bf16 %v837_v12  ;;  %v1308_v22 = vunpack.c.l.s8.bf16 %v840_v18 }
 0x28f   : > { %1697 = vmatprep.subr.bf16.mxu0 %v1268_v23  ;;  %2025 = vmatprep.subr.bf16.mxu1 %v1270_v24  ;;  %v1310_v23 = vunpack.c.l.s8.bf16 %v842_v19  ;;  %v839_v24 = vld [vmem:[%s3746_s26 + $0x6a0] sm:$0xff] }
 0x290   : > { %v1307_v26 = vunpack.c.l.s8.bf16 %v839_v24  ;;  %v1311_v33 = vunpack.c.h.s8.bf16 %v839_v24  ;;  %v861_v24 = vld [vmem:[%s3746_s26 + $0x750] sm:$0xff] }
 0x291   : > { %1689 = vmatmul.mubr.bf16.vlgmr.msra.gmra.mrb[0].mxu0 %v2735_v27  ;;  %2017 = vmatmul.mubr.bf16.vlgmr.msra.gmra.mrb[0].mxu1 %v2735_v27  ;;  %v1309_v27 = vunpack.c.l.s8.bf16 %v841_v25 }
 0x292   : > { %1698 = vmatpush1.bf16.msra.mxu0 %v1267_v28  ;;  %2026 = vmatpush1.bf16.msra.mxu1 %v1269_v29  ;;  %v1312_v28 = vunpack.c.h.s8.bf16 %v840_v18  ;;  %v1314_v29 = vunpack.c.h.s8.bf16 %v842_v19  ;;  %v862_v18 = vld [vmem:[%s3746_s26 + $0x758] sm:$0xff] }
 0x293   : > { %1699 = vmatprep.subr.bf16.mxu0 %v1272_v31  ;;  %2027 = vmatprep.subr.bf16.mxu1 %v1274_v32  ;;  %v844_v31 = vld [vmem:[%s3746_s26 + $0x6c8] sm:$0xff]  ;;  %v846_v32 = vld [vmem:[%s3746_s26 + $0x6d8] sm:$0xff] }
 0x294   : > { %1729 = vmatprep.mubr.bf16.mxu0 %v2738_v35  ;;  %2057 = vmatprep.mubr.bf16.mxu1 %v2738_v35  ;;  %v1316_v35 = vunpack.c.l.s8.bf16 %v844_v31  ;;  %v1320_v40 = vunpack.c.h.s8.bf16 %v844_v31  ;;  %v866_v31 = vld [vmem:[%s3746_s26 + $0x778] sm:$0xff] }
 0x296   : > { %1700 = vmatpush1.bf16.msra.mxu0 %v1271_v13  ;;  %2028 = vmatpush1.bf16.msra.mxu1 %v1273_v36  ;;  %v1318_v13 = vunpack.c.l.s8.bf16 %v846_v32  ;;  %v843_v36 = vld [vmem:[%s3746_s26 + $0x6c0] sm:$0xff] }
 0x297   : > { %1701 = vmatprep.subr.bf16.mxu0 %v1276_v37  ;;  %2029 = vmatprep.subr.bf16.mxu1 %v1278_v38  ;;  %v845_v37 = vld [vmem:[%s3746_s26 + $0x6d0] sm:$0xff]  ;;  %v1315_v38 = vunpack.c.l.s8.bf16 %v843_v36 }
 0x298   : > { %v1317_v39 = vunpack.c.l.s8.bf16 %v845_v37  ;;  %v1321_v46 = vunpack.c.h.s8.bf16 %v845_v37 }
 0x29a   : > { %1702 = vmatpush1.bf16.msra.mxu0 %v1275_v41  ;;  %2030 = vmatpush1.bf16.msra.mxu1 %v1277_v43  ;;  %v1322_v41 = vunpack.c.h.s8.bf16 %v846_v32  ;;  %v848_v43 = vld [vmem:[%s3746_s26 + $0x6e8] sm:$0xff] }
 0x29b   : > { %1703 = vmatprep.subr.bf16.mxu0 %v1280_v44  ;;  %2031 = vmatprep.subr.bf16.mxu1 %v1282_v45  ;;  %v850_v44 = vld [vmem:[%s3746_s26 + $0x6f8] sm:$0xff]  ;;  %v1319_v45 = vunpack.c.h.s8.bf16 %v843_v36  ;;  %v1324_v47 = vunpack.c.l.s8.bf16 %v848_v43  ;;  %v1328_v53 = vunpack.c.h.s8.bf16 %v848_v43  ;;  %v865_v36 = vld [vmem:[%s3746_s26 + $0x770] sm:$0xff] }
 0x29c   : > { %v870_v43 = vld [vmem:[%s3746_s26 + $0x798] sm:$0xff] }
 0x29e   : > { %1704 = vmatpush1.bf16.msra.mxu0 %v1279_v48  ;;  %2032 = vmatpush1.bf16.msra.mxu1 %v1281_v49  ;;  %v1326_v48 = vunpack.c.l.s8.bf16 %v850_v44  ;;  %v847_v49 = vld [vmem:[%s3746_s26 + $0x6e0] sm:$0xff] }
 0x29f   : > { %1705 = vmatprep.subr.bf16.mxu0 %v1284_v50  ;;  %2033 = vmatprep.subr.bf16.mxu1 %v1286_v51  ;;  %v849_v50 = vld [vmem:[%s3746_s26 + $0x6f0] sm:$0xff]  ;;  %v1323_v51 = vunpack.c.l.s8.bf16 %v847_v49 }
 0x2a0   : > { %v1325_v52 = vunpack.c.l.s8.bf16 %v849_v50  ;;  %v1329_v58 = vunpack.c.h.s8.bf16 %v849_v50 }
 0x2a2   : > { %1706 = vmatpush1.bf16.msra.mxu0 %v1283_v54  ;;  %2034 = vmatpush1.bf16.msra.mxu1 %v1285_v55  ;;  %v1330_v54 = vunpack.c.h.s8.bf16 %v850_v44  ;;  %v852_v55 = vld [vmem:[%s3746_s26 + $0x708] sm:$0xff] }
 0x2a3   : > { %1707 = vmatprep.subr.bf16.mxu0 %v1288_v56  ;;  %2035 = vmatprep.subr.bf16.mxu1 %v1290_v57  ;;  %v854_v56 = vld [vmem:[%s3746_s26 + $0x718] sm:$0xff]  ;;  %v1327_v57 = vunpack.c.h.s8.bf16 %v847_v49  ;;  %v1332_v59 = vunpack.c.l.s8.bf16 %v852_v55  ;;  %v869_v49 = vld [vmem:[%s3746_s26 + $0x790] sm:$0xff] }
 0x2a6   : > { %1708 = vmatpush1.bf16.msra.mxu0 %v1287_v60  ;;  %2036 = vmatpush1.bf16.msra.mxu1 %v1289_v61  ;;  %v1334_v60 = vunpack.c.l.s8.bf16 %v854_v56  ;;  %v851_v61 = vld [vmem:[%s3746_s26 + $0x700] sm:$0xff] }
 0x2a7   : > { %1709 = vmatprep.subr.bf16.mxu0 %v1292_v62  ;;  %2037 = vmatprep.subr.bf16.mxu1 %v1294_v63  ;;  %v853_v62 = vld [vmem:[%s3746_s26 + $0x710] sm:$0xff]  ;;  %v2737_v63 = vcombine.low %v4015_v30, %v4015_v30  ;;  %v1331_v0 = vunpack.c.l.s8.bf16 %v851_v61  ;;  %v1335_v30 = vunpack.c.h.s8.bf16 %v851_v61 }
 0x2a8   : > { %v873_v61 = vld [vmem:[%s3746_s26 + $0x7b0] sm:$0xff] }
 0x2aa   : > { %1710 = vmatpush1.bf16.msra.mxu0 %v1291_v1  ;;  %2038 = vmatpush1.bf16.msra.mxu1 %v1293_v2  ;;  %v1333_v1 = vunpack.c.l.s8.bf16 %v853_v62  ;;  %v1336_v2 = vunpack.c.h.s8.bf16 %v852_v55  ;;  %v874_v55 = vld [vmem:[%s3746_s26 + $0x7b8] sm:$0xff] }
 0x2ab   : > { %1711 = vmatprep.subr.bf16.mxu0 %v1296_v3  ;;  %2039 = vmatprep.subr.bf16.mxu1 %v1298_v4  ;;  %v1338_v3 = vunpack.c.h.s8.bf16 %v854_v56  ;;  %v856_v4 = vld [vmem:[%s3746_s26 + $0x728] sm:$0xff] }
 0x2ae   : > { %1712 = vmatpush1.bf16.msra.mxu0 %v1295_v7  ;;  %2040 = vmatpush1.bf16.msra.mxu1 %v1297_v8  ;;  %v1337_v7 = vunpack.c.h.s8.bf16 %v853_v62  ;;  %v1340_v8 = vunpack.c.l.s8.bf16 %v856_v4 }
 0x2af   : > { %1713 = vmatprep.subr.bf16.mxu0 %v1300_v9  ;;  %2041 = vmatprep.subr.bf16.mxu1 %v1302_v10  ;;  %v1342_v9 = vunpack.c.l.s8.bf16 %v858_v5  ;;  %v855_v10 = vld [vmem:[%s3746_s26 + $0x720] sm:$0xff] }
 0x2b0   : > { %v1339_v12 = vunpack.c.l.s8.bf16 %v855_v10  ;;  %v1343_v19 = vunpack.c.h.s8.bf16 %v855_v10 }
 0x2b2   : > { %1714 = vmatpush1.bf16.msra.mxu0 %v1299_v14  ;;  %2042 = vmatpush1.bf16.msra.mxu1 %v1301_v15  ;;  %v1341_v14 = vunpack.c.l.s8.bf16 %v857_v11  ;;  %v1344_v15 = vunpack.c.h.s8.bf16 %v856_v4 }
 0x2b3   : > { %1715 = vmatprep.subr.bf16.mxu0 %v1304_v16  ;;  %2043 = vmatprep.subr.bf16.mxu1 %v1306_v17  ;;  %v1346_v16 = vunpack.c.h.s8.bf16 %v858_v5  ;;  %v860_v17 = vld [vmem:[%s3746_s26 + $0x748] sm:$0xff]  ;;  %v1377_v5 = vunpack.c.h.s8.bf16 %v873_v61 }
 0x2b6   : > { %1716 = vmatpush1.bf16.msra.mxu0 %v1303_v20  ;;  %2044 = vmatpush1.bf16.msra.mxu1 %v1305_v21  ;;  %v1345_v20 = vunpack.c.h.s8.bf16 %v857_v11  ;;  %v1348_v21 = vunpack.c.l.s8.bf16 %v860_v17 }
 0x2b7   : > { %1717 = vmatprep.subr.bf16.mxu0 %v1308_v22  ;;  %2045 = vmatprep.subr.bf16.mxu1 %v1310_v23  ;;  %v1350_v22 = vunpack.c.l.s8.bf16 %v862_v18  ;;  %v859_v23 = vld [vmem:[%s3746_s26 + $0x740] sm:$0xff] }
 0x2b8   : > { %v1347_v25 = vunpack.c.l.s8.bf16 %v859_v23  ;;  %v1351_v32 = vunpack.c.h.s8.bf16 %v859_v23 }
 0x2ba   : > { %1718 = vmatpush1.bf16.msra.mxu0 %v1307_v26  ;;  %2046 = vmatpush1.bf16.msra.mxu1 %v1309_v27  ;;  %v1349_v26 = vunpack.c.l.s8.bf16 %v861_v24  ;;  %v1352_v27 = vunpack.c.h.s8.bf16 %v860_v17 }
 0x2bb   : > { %1719 = vmatprep.subr.bf16.mxu0 %v1312_v28  ;;  %2047 = vmatprep.subr.bf16.mxu1 %v1314_v29  ;;  %v1354_v28 = vunpack.c.h.s8.bf16 %v862_v18  ;;  %v864_v29 = vld [vmem:[%s3746_s26 + $0x768] sm:$0xff] }
 0x2be   : > { %1720 = vmatpush1.bf16.msra.mxu0 %v1311_v33  ;;  %2048 = vmatpush1.bf16.msra.mxu1 %v1313_v34  ;;  %v1353_v33 = vunpack.c.h.s8.bf16 %v861_v24  ;;  %v1356_v34 = vunpack.c.l.s8.bf16 %v864_v29 }
 0x2bf   : > { %1721 = vmatprep.subr.bf16.mxu0 %v1316_v35  ;;  %2049 = vmatprep.subr.bf16.mxu1 %v1318_v13  ;;  %v1358_v35 = vunpack.c.l.s8.bf16 %v866_v31  ;;  %v863_v13 = vld [vmem:[%s3746_s26 + $0x760] sm:$0xff] }
 0x2c0   : > { %v1355_v37 = vunpack.c.l.s8.bf16 %v863_v13  ;;  %v1359_v44 = vunpack.c.h.s8.bf16 %v863_v13 }
 0x2c2   : > { %1722 = vmatpush1.bf16.msra.mxu0 %v1315_v38  ;;  %2050 = vmatpush1.bf16.msra.mxu1 %v1317_v39  ;;  %v1357_v38 = vunpack.c.l.s8.bf16 %v865_v36  ;;  %v1360_v39 = vunpack.c.h.s8.bf16 %v864_v29  ;;  %v2191_v29 = vld [vmem:[%s3762_s30 + $0x20] sm:$0xff] }
 0x2c3   : > { %1723 = vmatprep.subr.bf16.mxu0 %v1320_v40  ;;  %2051 = vmatprep.subr.bf16.mxu1 %v1322_v41  ;;  %v1362_v40 = vunpack.c.h.s8.bf16 %v866_v31  ;;  %v868_v41 = vld [vmem:[%s3746_s26 + $0x788] sm:$0xff]  ;;  %v2199_v31 = vld [vmem:[%s3762_s30 + $0x60] sm:$0xff] }
 0x2c6   : > { %1724 = vmatpush1.bf16.msra.mxu0 %v1319_v45  ;;  %2052 = vmatpush1.bf16.msra.mxu1 %v1321_v46  ;;  %v1361_v45 = vunpack.c.h.s8.bf16 %v865_v36  ;;  %v1364_v46 = vunpack.c.l.s8.bf16 %v868_v41 }
 0x2c7   : > { %1725 = vmatprep.subr.bf16.mxu0 %v1324_v47  ;;  %2053 = vmatprep.subr.bf16.mxu1 %v1326_v48  ;;  %v1366_v47 = vunpack.c.l.s8.bf16 %v870_v43  ;;  %v867_v48 = vld [vmem:[%s3746_s26 + $0x780] sm:$0xff] }
 0x2c8   : > { %v1363_v50 = vunpack.c.l.s8.bf16 %v867_v48  ;;  %v1367_v56 = vunpack.c.h.s8.bf16 %v867_v48 }
 0x2ca   : > { %1726 = vmatpush1.bf16.msra.mxu0 %v1323_v51  ;;  %2054 = vmatpush1.bf16.msra.mxu1 %v1325_v52  ;;  %v1365_v51 = vunpack.c.l.s8.bf16 %v869_v49  ;;  %v1368_v52 = vunpack.c.h.s8.bf16 %v868_v41  ;;  %v2200_v41 = vld [vmem:[%s3762_s30 + $0x68] sm:$0xff] }
 0x2cb   : > { %1727 = vmatprep.subr.bf16.mxu0 %v1328_v53  ;;  %2055 = vmatprep.subr.bf16.mxu1 %v1330_v54  ;;  %v1370_v53 = vunpack.c.h.s8.bf16 %v870_v43  ;;  %v872_v54 = vld [vmem:[%s3746_s26 + $0x7a8] sm:$0xff] }
 0x2ce   : > { %1728 = vmatpush1.bf16.msra.mxu0 %v1327_v57  ;;  %2056 = vmatpush1.bf16.msra.mxu1 %v1329_v58  ;;  %v1369_v57 = vunpack.c.h.s8.bf16 %v869_v49  ;;  %v1372_v58 = vunpack.c.l.s8.bf16 %v872_v54 }
 0x2cf   : > { %1738 = vmatprep.subr.bf16.mxu0 %v1332_v59  ;;  %2066 = vmatprep.subr.bf16.mxu1 %v1334_v60  ;;  %v1374_v59 = vunpack.c.l.s8.bf16 %v874_v55  ;;  %v871_v60 = vld [vmem:[%s3746_s26 + $0x7a0] sm:$0xff] }
 0x2d0   : > { %v1371_v62 = vunpack.c.l.s8.bf16 %v871_v60  ;;  %v1375_v4 = vunpack.c.h.s8.bf16 %v871_v60 }
 0x2d1   : > { %1730 = vmatmul.mubr.bf16.vlgmr.msra.gmra.mrb[0].mxu0 %v2737_v63  ;;  %2058 = vmatmul.mubr.bf16.vlgmr.msra.gmra.mrb[0].mxu1 %v2737_v63  ;;  %v1373_v63 = vunpack.c.l.s8.bf16 %v873_v61 }
 0x2d2   : > { %1739 = vmatpush1.bf16.msra.mxu0 %v1331_v0  ;;  %2067 = vmatpush1.bf16.msra.mxu1 %v1333_v1  ;;  %v1376_v0 = vunpack.c.h.s8.bf16 %v872_v54  ;;  %v1378_v1 = vunpack.c.h.s8.bf16 %v874_v55  ;;  %v2201_v54 = vld [vmem:[%s3762_s30 + $0x70] sm:$0xff] }
 0x2d3   : > { %1740 = vmatprep.subr.bf16.mxu0 %v1336_v2  ;;  %2068 = vmatprep.subr.bf16.mxu1 %v1338_v3  ;;  %v876_v2 = vld [vmem:[%s3746_s26 + $0x7c8] sm:$0xff]  ;;  %v878_v3 = vld [vmem:[%s3746_s26 + $0x7d8] sm:$0xff] }
 0x2d4   : > { %1770 = vmatprep.mubr.bf16.mxu0 %v2740_v6  ;;  %2098 = vmatprep.mubr.bf16.mxu1 %v2740_v6  ;;  %v1380_v6 = vunpack.c.l.s8.bf16 %v876_v2  ;;  %v1384_v11 = vunpack.c.h.s8.bf16 %v876_v2  ;;  %v2202_v2 = vld [vmem:[%s3762_s30 + $0x78] sm:$0xff] }
 0x2d6   : > { %1741 = vmatpush1.bf16.msra.mxu0 %v1335_v30  ;;  %2069 = vmatpush1.bf16.msra.mxu1 %v1337_v7  ;;  %v1382_v30 = vunpack.c.l.s8.bf16 %v878_v3  ;;  %v875_v7 = vld [vmem:[%s3746_s26 + $0x7c0] sm:$0xff] }
 0x2d7   : > { %1742 = vmatprep.subr.bf16.mxu0 %v1340_v8  ;;  %2070 = vmatprep.subr.bf16.mxu1 %v1342_v9  ;;  %v877_v8 = vld [vmem:[%s3746_s26 + $0x7d0] sm:$0xff]  ;;  %v1379_v9 = vunpack.c.l.s8.bf16 %v875_v7 }
 0x2d8   : > { %v1381_v10 = vunpack.c.l.s8.bf16 %v877_v8  ;;  %v1385_v17 = vunpack.c.h.s8.bf16 %v877_v8 }
 0x2da   : > { %1743 = vmatpush1.bf16.msra.mxu0 %v1339_v12  ;;  %2071 = vmatpush1.bf16.msra.mxu1 %v1341_v14  ;;  %v1386_v12 = vunpack.c.h.s8.bf16 %v878_v3  ;;  %v880_v14 = vld [vmem:[%s3746_s26 + $0x7e8] sm:$0xff] }
 0x2db   : > { %1744 = vmatprep.subr.bf16.mxu0 %v1344_v15  ;;  %2072 = vmatprep.subr.bf16.mxu1 %v1346_v16  ;;  %v882_v15 = vld [vmem:[%s3746_s26 + $0x7f8] sm:$0xff]  ;;  %v1383_v16 = vunpack.c.h.s8.bf16 %v875_v7  ;;  %v1388_v18 = vunpack.c.l.s8.bf16 %v880_v14  ;;  %v1392_v24 = vunpack.c.h.s8.bf16 %v880_v14 }
 0x2de   : > { %1745 = vmatpush1.bf16.msra.mxu0 %v1343_v19  ;;  %2073 = vmatpush1.bf16.msra.mxu1 %v1345_v20  ;;  %v1390_v19 = vunpack.c.l.s8.bf16 %v882_v15  ;;  %v879_v20 = vld [vmem:[%s3746_s26 + $0x7e0] sm:$0xff] }
 0x2df   : > { %1746 = vmatprep.subr.bf16.mxu0 %v1348_v21  ;;  %2074 = vmatprep.subr.bf16.mxu1 %v1350_v22  ;;  %v881_v21 = vld [vmem:[%s3746_s26 + $0x7f0] sm:$0xff]  ;;  %v1387_v22 = vunpack.c.l.s8.bf16 %v879_v20  ;;  %s2470_s26 = sshll.u32 %s612_s29, 4  ;;  %s4124_s26 = int_to_ptr.vmem [resolvable:$true] %s2470_s26 }
 0x2e0   : > { %v1389_v23 = vunpack.c.l.s8.bf16 %v881_v21  ;;  %s3267_s21 = scalar_lea.vmem %s4124_s26, 128 }
 0x2e1   : > { %p3268_p11 = scmp.ne.s32.totalorder %s4124_s26, %s3267_s21 }
 0x2e2   : > { %1747 = vmatpush1.bf16.msra.mxu0 %v1347_v25  ;;  %2075 = vmatpush1.bf16.msra.mxu1 %v1349_v26  ;;  %v1394_v25 = vunpack.c.h.s8.bf16 %v882_v15  ;;  %v1391_v26 = vunpack.c.h.s8.bf16 %v879_v20  ;;  %v2133_v20 = vld [vmem:[%s3755_s18] sm:$0xf]  ;;  %s4122_s18 = scalar_lea.hbm %s4219_s24, %s2758_s27 }
 0x2e3   : > { %1748 = vmatprep.subr.bf16.mxu0 %v1352_v27  ;;  %2076 = vmatprep.subr.bf16.mxu1 %v1354_v28  ;;  %v1393_v27 = vunpack.c.h.s8.bf16 %v881_v21  ;;  %v2739_v28 = vcombine.low %v4054_v42, %v4054_v42  ;;  %v2212_v42 = vunpack.c.h.s8.bf16 %v2191_v29  ;;  %p3269_p0 = pnand %p3268_p11, %p4220_p12 }
 0x2e5   : > { %p3270_p9 = pneg %p3269_p0 }
 0x2e6   : > { %1749 = vmatpush1.bf16.msra.mxu0 %v1351_v32  ;;  %2077 = vmatpush1.bf16.msra.mxu1 %v1353_v33  ;;  %v2211_v32 = vunpack.c.l.s8.bf16 %v2191_v29  ;;  %v2227_v33 = vunpack.c.l.s8.bf16 %v2199_v31 }
 0x2e7   : > { %1750 = vmatprep.subr.bf16.mxu0 %v1356_v34  ;;  %2078 = vmatprep.subr.bf16.mxu1 %v1358_v35  ;;  %v2187_v34 = vld [vmem:[%s3762_s30] sm:$0xff] }
 0x2e8   : > { %v2195_v35 = vld [vmem:[%s3762_s30 + $0x40] sm:$0xff]  ;;  %v2203_v13 = vunpack.c.l.s8.bf16 %v2187_v34 }
 0x2e9   : > { %v2219_v36 = vunpack.c.l.s8.bf16 %v2195_v35 }
 0x2ea   : > { %1751 = vmatpush1.bf16.msra.mxu0 %v1355_v37  ;;  %2079 = vmatpush1.bf16.msra.mxu1 %v1357_v38  ;;  %v2228_v37 = vunpack.c.h.s8.bf16 %v2199_v31  ;;  %v2204_v38 = vunpack.c.h.s8.bf16 %v2187_v34 }
 0x2eb   : > { %1752 = vmatprep.subr.bf16.mxu0 %v1360_v39  ;;  %2080 = vmatprep.subr.bf16.mxu1 %v1362_v40  ;;  %v2220_v39 = vunpack.c.h.s8.bf16 %v2195_v35  ;;  %v2192_v40 = vld [vmem:[%s3762_s30 + $0x28] sm:$0xff] }
 0x2ec   : > { %v2213_v43 = vunpack.c.l.s8.bf16 %v2192_v40  ;;  %v2214_v49 = vunpack.c.h.s8.bf16 %v2192_v40 }
 0x2ee   : > { %1753 = vmatpush1.bf16.msra.mxu0 %v1359_v44  ;;  %2081 = vmatpush1.bf16.msra.mxu1 %v1361_v45  ;;  %v2229_v44 = vunpack.c.l.s8.bf16 %v2200_v41  ;;  %v2188_v45 = vld [vmem:[%s3762_s30 + $0x8] sm:$0xff] }
 0x2ef   : > { %1754 = vmatprep.subr.bf16.mxu0 %v1364_v46  ;;  %2082 = vmatprep.subr.bf16.mxu1 %v1366_v47  ;;  %v2196_v46 = vld [vmem:[%s3762_s30 + $0x48] sm:$0xff]  ;;  %v2205_v47 = vunpack.c.l.s8.bf16 %v2188_v45 }
 0x2f0   : > { %v2221_v48 = vunpack.c.l.s8.bf16 %v2196_v46 }
 0x2f2   : > { %1755 = vmatpush1.bf16.msra.mxu0 %v1363_v50  ;;  %2083 = vmatpush1.bf16.msra.mxu1 %v1365_v51  ;;  %v2230_v50 = vunpack.c.h.s8.bf16 %v2200_v41  ;;  %v2206_v51 = vunpack.c.h.s8.bf16 %v2188_v45 }
 0x2f3   : > { %1756 = vmatprep.subr.bf16.mxu0 %v1368_v52  ;;  %2084 = vmatprep.subr.bf16.mxu1 %v1370_v53  ;;  %v2222_v52 = vunpack.c.h.s8.bf16 %v2196_v46  ;;  %v2193_v53 = vld [vmem:[%s3762_s30 + $0x30] sm:$0xff] }
 0x2f4   : > { %v2215_v55 = vunpack.c.l.s8.bf16 %v2193_v53  ;;  %v2216_v61 = vunpack.c.h.s8.bf16 %v2193_v53 }
 0x2f6   : > { %1757 = vmatpush1.bf16.msra.mxu0 %v1367_v56  ;;  %2085 = vmatpush1.bf16.msra.mxu1 %v1369_v57  ;;  %v2231_v56 = vunpack.c.l.s8.bf16 %v2201_v54  ;;  %v2189_v57 = vld [vmem:[%s3762_s30 + $0x10] sm:$0xff] }
 0x2f7   : > { %1758 = vmatprep.subr.bf16.mxu0 %v1372_v58  ;;  %2086 = vmatprep.subr.bf16.mxu1 %v1374_v59  ;;  %v2197_v58 = vld [vmem:[%s3762_s30 + $0x50] sm:$0xff]  ;;  %v2207_v59 = vunpack.c.l.s8.bf16 %v2189_v57 }
 0x2f8   : > { %v2223_v60 = vunpack.c.l.s8.bf16 %v2197_v58 }
 0x2fa   : > { %1759 = vmatpush1.bf16.msra.mxu0 %v1371_v62  ;;  %2087 = vmatpush1.bf16.msra.mxu1 %v1373_v63  ;;  %v2232_v62 = vunpack.c.h.s8.bf16 %v2201_v54  ;;  %v2208_v63 = vunpack.c.h.s8.bf16 %v2189_v57 }
 0x2fb   : > { %1760 = vmatprep.subr.bf16.mxu0 %v1376_v0  ;;  %2088 = vmatprep.subr.bf16.mxu1 %v1378_v1  ;;  %v2224_v0 = vunpack.c.h.s8.bf16 %v2197_v58  ;;  %v2194_v1 = vld [vmem:[%s3762_s30 + $0x38] sm:$0xff] }
 0x2fc   : > { %v2217_v3 = vunpack.c.l.s8.bf16 %v2194_v1  ;;  %v2218_v8 = vunpack.c.h.s8.bf16 %v2194_v1 }
 0x2fe   : > { %1761 = vmatpush1.bf16.msra.mxu0 %v1375_v4  ;;  %2089 = vmatpush1.bf16.msra.mxu1 %v1377_v5  ;;  %v2233_v4 = vunpack.c.l.s8.bf16 %v2202_v2  ;;  %v2190_v5 = vld [vmem:[%s3762_s30 + $0x18] sm:$0xff] }
 0x2ff   : > { %1762 = vmatprep.subr.bf16.mxu0 %v1380_v6  ;;  %2090 = vmatprep.subr.bf16.mxu1 %v1382_v30  ;;  %v2198_v6 = vld [vmem:[%s3762_s30 + $0x58] sm:$0xff]  ;;  %v2209_v30 = vunpack.c.l.s8.bf16 %v2190_v5  ;;  %s3365_s30 = smov [#allocation16]  }
 0x300   : > { %v2225_v7 = vunpack.c.l.s8.bf16 %v2198_v6  ;;  %s3271_s1 = sshll.u32 %s3365_s30, 4  ;;  %s3272_s1 = int_to_ptr.vmem [resolvable:$false] %s3271_s1 }
 0x301   : > { %p3274_p10 = scmp.lt.s32.totalorder %s4124_s26, %s3272_s1 }
 0x302   : > { %1763 = vmatpush1.bf16.msra.mxu0 %v1379_v9  ;;  %2091 = vmatpush1.bf16.msra.mxu1 %v1381_v10  ;;  %v2234_v9 = vunpack.c.h.s8.bf16 %v2202_v2  ;;  %v2210_v10 = vunpack.c.h.s8.bf16 %v2190_v5  ;;  %v2999_v5 = vld [vmem:[%s617_s9] sm:$0xff]  }
 0x303   : > { %1764 = vmatprep.subr.bf16.mxu0 %v1384_v11  ;;  %2092 = vmatprep.subr.bf16.mxu1 %v1386_v12  ;;  %v2226_v11 = vunpack.c.h.s8.bf16 %v2198_v6  ;;  %v2109_v12 = vlaneseq  ;;  %v3363_v6 = vmov 0.0  }
 0x305   : > { %v2110_v14 = vshrl.u32 %v2109_v12, 7  ;;  %v3006_v12 = vld [vmem:[%s617_s9 + $0x38] sm:$0xff]  }
 0x306   : > { %1765 = vmatpush1.bf16.msra.mxu0 %v1383_v16  ;;  %2093 = vmatpush1.bf16.msra.mxu1 %v1385_v17  ;;  %v2107_v17 = vld [vmem:[%s3753_s3] sm:$0xf] }
 0x307   : > { %1766 = vmatprep.subr.bf16.mxu0 %v1388_v18  ;;  %2094 = vmatprep.subr.bf16.mxu1 %v1390_v19  ;;  %v2111_v15 = vsub.s32 0, %v2110_v14  ;;  %v2119_v16 = vsub.s32 2, %v2110_v14  ;;  %v2115_v18 = vsub.s32 1, %v2110_v14  ;;  %v2123_v19 = vsub.s32 3, %v2110_v14 }
 0x309   : > { %v2112_v21 = vrot.slane %v2107_v17, %v2111_v15  ;;  %v2142_v29 = vrot.slane %v2133_v20, %v2115_v18  ;;  %v2150_v31 = vrot.slane %v2133_v20, %v2123_v19 }
 0x30a   : > { %1767 = vmatpush1.bf16.msra.mxu0 %v1387_v22  ;;  %2095 = vmatpush1.bf16.msra.mxu1 %v1389_v23  ;;  %v2120_v22 = vrot.slane %v2107_v17, %v2119_v16  ;;  %v2116_v23 = vrot.slane %v2107_v17, %v2115_v18 }
 0x30b   : > { %1768 = vmatprep.subr.bf16.mxu0 %v1392_v24  ;;  %2096 = vmatprep.subr.bf16.mxu1 %v1394_v25  ;;  %v2124_v24 = vrot.slane %v2107_v17, %v2123_v19  ;;  %v2138_v25 = vrot.slane %v2133_v20, %v2111_v15 }
 0x30e   : > { %1769 = vmatpush1.bf16.msra.mxu0 %v1391_v26  ;;  %2097 = vmatpush1.bf16.msra.mxu1 %v1393_v27  ;;  %v2146_v26 = vrot.slane %v2133_v20, %v2119_v16 }
 0x30f   : > { %2767 = vmatprep.subr.bf16.mxu0 %v2211_v32  ;;  %2789 = vmatprep.subr.bf16.mxu1 %v2227_v33 }
 0x311   : > { %1771 = vmatmul.mubr.bf16.vlgmr.msra.gmra.mrb[0].mxu0 %v2739_v28  ;;  %2099 = vmatmul.mubr.bf16.vlgmr.msra.gmra.mrb[0].mxu1 %v2739_v28 }
 0x312   : > { %2768 = vmatpush3.bf16.msra.mxu0 %v2203_v13  ;;  %2790 = vmatpush3.bf16.msra.mxu1 %v2219_v36 }
 0x313   : > { %2769 = vmatprep.subr.bf16.mxu0 %v2212_v42  ;;  %2791 = vmatprep.subr.bf16.mxu1 %v2228_v37 }
 0x316   : > { %2770 = vmatpush3.bf16.msra.mxu0 %v2204_v38  ;;  %2792 = vmatpush3.bf16.msra.mxu1 %v2220_v39 }
 0x317   : > { %2771 = vmatprep.subr.bf16.mxu0 %v2213_v43  ;;  %2793 = vmatprep.subr.bf16.mxu1 %v2229_v44 }
 0x31a   : > { %2772 = vmatpush3.bf16.msra.mxu0 %v2205_v47  ;;  %2794 = vmatpush3.bf16.msra.mxu1 %v2221_v48 }
 0x31b   : > { %2773 = vmatprep.subr.bf16.mxu0 %v2214_v49  ;;  %2795 = vmatprep.subr.bf16.mxu1 %v2230_v50 }
 0x31e   : > { %2774 = vmatpush3.bf16.msra.mxu0 %v2206_v51  ;;  %2796 = vmatpush3.bf16.msra.mxu1 %v2222_v52 }
 0x31f   : > { %2775 = vmatprep.subr.bf16.mxu0 %v2215_v55  ;;  %2797 = vmatprep.subr.bf16.mxu1 %v2231_v56 }
 0x322   : > { %2776 = vmatpush3.bf16.msra.mxu0 %v2207_v59  ;;  %2798 = vmatpush3.bf16.msra.mxu1 %v2223_v60 }
 0x323   : > { %2777 = vmatprep.subr.bf16.mxu0 %v2216_v61  ;;  %2799 = vmatprep.subr.bf16.mxu1 %v2232_v62 }
 0x326   : > { %2778 = vmatpush3.bf16.msra.mxu0 %v2208_v63  ;;  %2800 = vmatpush3.bf16.msra.mxu1 %v2224_v0 }
 0x327   : > { %2779 = vmatprep.subr.bf16.mxu0 %v2217_v3  ;;  %2801 = vmatprep.subr.bf16.mxu1 %v2233_v4 }
 0x32a   : > { %2780 = vmatpush3.bf16.msra.mxu0 %v2209_v30  ;;  %2802 = vmatpush3.bf16.msra.mxu1 %v2225_v7  ;;  %v3000_v30 = vld [vmem:[%s617_s9 + $0x8] sm:$0xff]   ;;  %v3001_v7 = vld [vmem:[%s617_s9 + $0x10] sm:$0xff]  }
 0x32b   : > { %2781 = vmatprep.subr.bf16.mxu0 %v2218_v8  ;;  %2803 = vmatprep.subr.bf16.mxu1 %v2234_v9  ;;  %v3002_v8 = vld [vmem:[%s617_s9 + $0x18] sm:$0xff]   ;;  %v3003_v9 = vld [vmem:[%s617_s9 + $0x20] sm:$0xff]  }
 0x32e   : > { %2782 = vmatpush3.bf16.msra.mxu0 %v2210_v10  ;;  %2804 = vmatpush3.bf16.msra.mxu1 %v2226_v11  ;;  %v3004_v10 = vld [vmem:[%s617_s9 + $0x28] sm:$0xff]   ;;  %v3005_v11 = vld [vmem:[%s617_s9 + $0x30] sm:$0xff]  }
 0x32f   : > { %2820 = vmatprep.subr.bf16.mxu0 %v3363_v6 }
 0x3e4   : > { %v1772_v27 = vpop.f32.mrb[0].mxu0  ;;  %v2100_v28 = vpop.f32.mrb[0].mxu1 }
 0x3e5   : > { %v2129_v32 = vmul.f32 %v2112_v21, %v1772_v27  ;;  %v2131_v33 = vmul.f32 %v2120_v22, %v2100_v28  ;;  %v1774_v34 = vpop.f32.mrb[1].mxu0  ;;  %v2102_v35 = vpop.f32.mrb[1].mxu1 }
 0x3e6   : > { %v2130_v13 = vmul.f32 %v2116_v23, %v1774_v34  ;;  %v2132_v36 = vmul.f32 %v2124_v24, %v2102_v35  ;;  %v1776_v42 = vpop.f32.mrb[2].mxu0  ;;  %v2104_v37 = vpop.f32.mrb[2].mxu1  ;;  %v2745_v23 = vld [vmem:[%s525_s25] ss:$0 sm:$0xff]  ;;  %s3273_s25 = scalar_lea.vmem %s3272_s1, 256 }
 0x3e7   : > { %v2155_v38 = vadd.f32 %v2138_v25, %v2129_v32  ;;  %v2157_v39 = vadd.f32 %v2146_v26, %v2131_v33  ;;  %v1777_v40 = vpop.f32.mrb[3].mxu0  ;;  %v2105_v41 = vpop.f32.mrb[3].mxu1  ;;  %v2746_v26 = vld [vmem:[%s533_s22] ss:$0 sm:$0xff]  ;;  %p3275_p7 = scmp.lt.s32.totalorder %s3273_s25, %s3267_s21 }
 0x3e8   : > { %v2156_v43 = vadd.f32 %v2142_v29, %v2130_v13  ;;  %v2158_v44 = vadd.f32 %v2150_v31, %v2132_v36  ;;  %v2748_v13 = vld [vmem:[%s541_s28] ss:$0 sm:$0xff] }
 0x3e9   : > { %v2741_v45 = vmul.f32 -1.442695, %v2155_v38  ;;  %v2743_v46 = vmul.f32 -1.442695, %v2157_v39  ;;  %p3276_p4 = por %p3275_p7, %p3274_p10 }
 0x3ea   : > { %v2742_v47 = vmul.f32 -1.442695, %v2156_v43  ;;  %v2744_v48 = vmul.f32 -1.442695, %v2158_v44 }
 0x3eb   : > { %3007 = vpow2.f32 %v2741_v45  ;;  %p3277_p2 = pnand %p3276_p4, %p3270_p9 }
 0x3ec   : > { %3009 = vpow2.f32 %v2743_v46 }
 0x3ed   : > { %3011 = vpow2.f32 %v2742_v47 }
 0x3ee   : > { %3013 = vpow2.f32 %v2744_v48 }
 0x3f5   : > { %v3008_v49 = vpop.eup %3007 }
 0x3f6   : > { %v3010_v50 = vpop.eup %3009  ;;  %v2171_v51 = vadd.f32 1.0, %v3008_v49 }
 0x3f7   : > { %v3012_v52 = vpop.eup %3011  ;;  %v2173_v53 = vadd.f32 1.0, %v3010_v50 }
 0x3f8   : > { %v3014_v54 = vpop.eup %3013  ;;  %3015 = vrcp.f32 %v2171_v51  ;;  %v2172_v55 = vadd.f32 1.0, %v3012_v52 }
 0x3f9   : > { %3017 = vrcp.f32 %v2173_v53  ;;  %v2174_v56 = vadd.f32 1.0, %v3014_v54 }
 0x3fa   : > { %3019 = vrcp.f32 %v2172_v55 }
 0x3fb   : > { %3021 = vrcp.f32 %v2174_v56 }
 0x402   : > { %v3016_v57 = vpop.eup %3015 }
 0x403   : > { %v3018_v58 = vpop.eup %3017  ;;  %v2183_v60 = vmul.f32 %v3016_v57, %v2155_v38 }
 0x404   : > { %v3020_v59 = vpop.eup %3019  ;;  %v2185_v62 = vmul.f32 %v3018_v58, %v2157_v39 }
 0x405   : > { %v3022_v61 = vpop.eup %3021  ;;  %v2184_v63 = vmul.f32 %v3020_v59, %v2156_v43  ;;  %v2235_v2 = vpack.c.bf16 %v2183_v60, %v2183_v60 }
 0x406   : > { %v2186_v0 = vmul.f32 %v3022_v61, %v2158_v44  ;;  %v2237_v4 = vpack.c.bf16 %v2185_v62, %v2185_v62 }
 0x407   : > { %v2236_v1 = vpack.c.bf16 %v2184_v63, %v2184_v63 }
 0x408   : > { %v2238_v3 = vpack.c.bf16 %v2186_v0, %v2186_v0 }
 0x409   : > { %2271 = vmatprep.mubr.bf16.mxu0 %v2236_v1 }
 0x40a   : > { %2311 = vmatprep.mubr.bf16.mxu1 %v2238_v3  ;;  %2272 = vmatmul.mubr.bf16.vlgmr.msra.gmra.mrb[4].mxu0 %v2235_v2 }
 0x40b   : > { %2312 = vmatmul.mubr.bf16.vlgmr.msra.gmra.mrb[4].mxu1 %v2237_v4  ;;  %2821 = vmatpush3.bf16.msra.mxu0 %v2999_v5 }
 0x40c   : > { %2822 = vmatprep.subr.bf16.mxu0 %v3363_v6  ;;  %2836 = vmatprep.mubr.msk.bf16.mxu0 %vm3364_vm0, %v3363_v6 }
 0x40f   : > { %2823 = vmatpush3.bf16.msra.mxu0 %v3000_v30 }
 0x410   : > { %2824 = vmatprep.subr.bf16.mxu0 %v3363_v6 }
 0x413   : > { %2825 = vmatpush3.bf16.msra.mxu0 %v3001_v7 }
 0x414   : > { %2826 = vmatprep.subr.bf16.mxu0 %v3363_v6 }
 0x417   : > { %2827 = vmatpush3.bf16.msra.mxu0 %v3002_v8 }
 0x418   : > { %2828 = vmatprep.subr.bf16.mxu0 %v3363_v6 }
 0x41b   : > { %2829 = vmatpush3.bf16.msra.mxu0 %v3003_v9 }
 0x41c   : > { %2830 = vmatprep.subr.bf16.mxu0 %v3363_v6 }
 0x41f   : > { %2831 = vmatpush3.bf16.msra.mxu0 %v3004_v10 }
 0x420   : > { %2832 = vmatprep.subr.bf16.mxu0 %v3363_v6 }
 0x423   : > { %2833 = vmatpush3.bf16.msra.mxu0 %v3005_v11 }
 0x424   : > { %2834 = vmatprep.subr.bf16.mxu0 %v3363_v6 }
 0x427   : > { %2835 = vmatpush3.bf16.msra.mxu0 %v3006_v12 }
 0x4dd   : > { %v2783_v14 = vpop.f32.mrb[4].mxu0 }
 0x4de   : > { %v2805_v15 = vpop.f32.mrb[4].mxu1  ;;  %v2784_v16 = vpop.f32.mrb[5].mxu0 }
 0x4df   : > { %v2785_v17 = vadd.f32 %v2784_v16, %v2783_v14  ;;  %v2806_v18 = vpop.f32.mrb[5].mxu1  ;;  %v2786_v19 = vpop.f32.mrb[6].mxu0 }
 0x4e0   : > { %v2807_v20 = vadd.f32 %v2806_v18, %v2805_v15  ;;  %v2808_v21 = vpop.f32.mrb[6].mxu1  ;;  %v2787_v22 = vpop.f32.mrb[7].mxu0 }
 0x4e1   : > { %v2809_v24 = vpop.f32.mrb[7].mxu1 }
 0x4e2   : > { %v2314_v25 = vadd.f32 %v2807_v20, %v2785_v17 }
 0x4e4   : > { %v2326_v27 = vmul.f32 %v2745_v23, %v2314_v25 }
 0x4e6   : > { %v2334_v28 = vadd.f32 %v2746_v26, %v2326_v27 }
 0x4e8   : > { %v2747_v29 = vmul.f32 -1.442695, %v2334_v28 }
 0x4ea   : > { %3023 = vpow2.f32 %v2747_v29 }
 0x4f4   : > { %v3024_v31 = vpop.eup %3023 }
 0x4f5   : > { %v2338_v32 = vadd.f32 1.0, %v3024_v31 }
 0x4f7   : > { %3025 = vrcp.f32 %v2338_v32 }
 0x501   : > { %v3026_v33 = vpop.eup %3025 }
 0x502   : > { %v2341_v34 = vmul.f32 %v3026_v33, %v2334_v28 }
 0x504   : > { %v2342_v35 = vpack.c.bf16 %v2341_v34, %v2341_v34 }
 0x506   : > { %2837 = vmatmul.mubr.bf16.vlgmr.msra.gmra.mrb[8].mxu0 %v2342_v35 }
 0x5d9   : > { %v2448_v36 = vpop.f32.mrb[8].mxu0 }
 0x5da   : > { %v2449_v42 = vadd.f32 %v2748_v13, %v2448_v36  ;;  %v2838_v37 = vpop.f32.mrb[9].mxu0 }
 0x5db   : > { %v2451_v38 = vpop.f32.mrb[10].mxu0 }
 0x5dc   : > { %v2839_v39 = vpop.f32.mrb[11].mxu0  ;;  %2455 = vst.msk [vmem:[%s612_s29] sm:$0xff] %vm2454_vm1, %v2449_v42 }
 0x5dd   : > { %3280 = shalt.err (!%p3277_p2)
}
 0x5de   : > { %s3281_s11 = scalar_lea.hbm %s4122_s18, 128  ;;  %s3285_s28 = scalar_lea.hbm %s4219_s24, 384 }
 0x5df   : > { %p3282_p5 = scmp.ne.s32.totalorder %s4122_s18, %s3281_s11  ;;  %p3286_p6 = scmp.lt.u32.totalorder %s4122_s18, %s4219_s24 }
 0x5e0   : > { %p3287_p1 = scmp.lt.u32.totalorder %s3285_s28, %s3281_s11  ;;  %p3289_p11 = scmp.lt.u32.totalorder %s3281_s11, %s4122_s18 }
 0x5e1   : > { %p3283_p3 = pnand %p3282_p5, %p4220_p12 }
 0x5e2   : > { %p3288_p13 = por %p3287_p1, %p3286_p6 }
 0x5e3   : > { %p3284_p8 = pneg %p3283_p3 }
 0x5e4   : > { %p3290_p0 = por %p3289_p11, %p3288_p13 }
 0x5e6   : > { %p3291_p9 = pnand %p3290_p0, %p3284_p8 }
 0x5e8   : > { %3294 = shalt.err (!%p3291_p9)
}
 0x5e9   : > { %2912 = dma.vmem_to_hbm [thread:$0]  (%p4220_p12), %s4124_s26, 128, %s4122_s18, %s2457_s13  }
 0x5ea PF: > { %s4221_s15 = sld [smem:[#allocation23_spill]]  ;;  %s4222_s17 = sld [smem:[#allocation27_spill]] }
 0x5eb   : > { %p2944_p10 = scmp.ge.s32.totalorder %s3349_s12, 2 }
 0x5f0   : > { %s2482_s9 = sand.u32 1, %s4221_s15   ;;  %p4223_p7 = scmp.ne.s32.totalorder %s4222_s17, 0 }
 0x5f1   : > { %s2483_s23 = scalar_lea.sflag [#allocation4], %s2482_s9 }
 0x5f2   : > { %p2940_p4 = pnand %p2944_p10, %p4223_p7 }
 0x5f4   : > { %3332 = dma.done.wait (!%p2940_p4), %s2483_s23, 128  }
 0x5f5   : > { %3334 = vsyncadd (!%p2940_p4), %s2483_s23, 4294967168  ;;  %s4224_s12 = sld [smem:[#allocation25_spill]]  ;;  %s4225_s27 = sld [smem:[#allocation24_spill]] }
 0x5f6   : > { %s4226_s11 = sld [smem:[#allocation26_spill]]  ;;  %s4227_s30 = smov %s3341_s10 }
 0x5fb   : > { %p34_p2 = scmp.ge.s32.totalorder %s4224_s12, 5   ;;  %s4228_s10 = smov %s4225_s27 }
 0x5fd   :  { %36 = sbr.rel (!%p34_p2) target bundleno = 18 (0x12), region = 189 }
 0x604   :  { %2488 = vsyncpa [#allocation3], 1 }
 0x605   :  { %2490 = vsyncpa [#allocation3 + $0x1], 1 }
 0x606   :  { %2491 = vsyncpa [#allocation6], 1 }
 0x607   :  { %2493 = vsyncpa [#allocation6 + $0x1], 1 }
 0x608   :  { %2494 = vsyncpa [#allocation9], 1 }
 0x609   :  { %2496 = vsyncpa [#allocation9 + $0x1], 1 }
 0x60a   :  { %2497 = vsyncpa [#allocation12], 1 }
 0x60b   :  { %2499 = vsyncpa [#allocation12 + $0x1], 1 }
 0x60c   :  { %2500 = vsyncpa [#allocation15], 1 }
 0x60d   :  { %2502 = vsyncpa [#allocation15 + $0x1], 1 }
 0x60e   :  { %2503 = vsyncpa [#allocation4], 1 }
 0x60f   :  { %2505 = vsyncpa [#allocation4 + $0x1], 1 }

</bundles_post_ra>
